<compile_context>
chip_gen: v5e
topology: v5e:2x2
jax: 0.10.0
libtpu: 0.0.40
codegen_flags: <defaults>
</compile_context>

<pallas_src>
import functools

import jax
import jax.numpy as jnp
from jax.experimental import pallas as pl
from jax.experimental.pallas import tpu as pltpu


def _round_up(x, m):
    return (x + m - 1) // m * m


def _cdiv(a, b):
    return -(-a // b)


def _softplus(x):
    # numerically stable softplus: max(x,0) + log1p(exp(-|x|))
    return jnp.maximum(x, 0.0) + jnp.log1p(jnp.exp(-jnp.abs(x)))


def _silu(x):
    # tanh form of sigmoid: runs on the EUP (no VPU divide), no overflow.
    return 0.5 * x * (1.0 + jnp.tanh(0.5 * x))


def _dynamics_kernel(*refs, E, L, shared_x, compute_dtype):
    if L > 0:
        (x_ref, w_in_ref, b_in_ref, w_h_ref, b_h_ref,
         w_mu_ref, b_mu_ref, w_lv_ref, b_lv_ref,
         min_lv_ref, max_lv_ref, mu_ref, lv_ref) = refs
    else:
        (x_ref, w_in_ref, b_in_ref,
         w_mu_ref, b_mu_ref, w_lv_ref, b_lv_ref,
         min_lv_ref, max_lv_ref, mu_ref, lv_ref) = refs
        w_h_ref = b_h_ref = None

    # Hoisted once: (1, Dout) row vectors broadcast implicitly over the B tile.
    max_lv = max_lv_ref[...]
    min_lv = min_lv_ref[...]

    # Shared (broadcast) input: load once for all ensemble members.
    if shared_x:
        x_shared = x_ref[...].astype(compute_dtype)

    # Static loops over ensemble members / layers -> fully unrolled; all
    # weights are resident in VMEM so this is pure MXU/VPU/EUP work.
    for e in range(E):
        h = x_shared if shared_x else x_ref[e].astype(compute_dtype)

        # input layer + SiLU (f32 accumulation, f32 elementwise)
        h = jnp.dot(h, w_in_ref[e], preferred_element_type=jnp.float32)
        h = _silu(h + b_in_ref[e])                    # (1,H) bias broadcasts

        # hidden layers + SiLU
        for l in range(L):
            h = jnp.dot(h.astype(compute_dtype), w_h_ref[e, l],
                        preferred_element_type=jnp.float32)
            h = _silu(h + b_h_ref[e, l])

        hc = h.astype(compute_dtype)
        mu = jnp.dot(hc, w_mu_ref[e], preferred_element_type=jnp.float32) + b_mu_ref[e]
        lv = jnp.dot(hc, w_lv_ref[e], preferred_element_type=jnp.float32) + b_lv_ref[e]

        # softplus clamping of log_var
        lv = max_lv - _softplus(max_lv - lv)
        lv = min_lv + _softplus(lv - min_lv)

        # Unpadded (TB, Dout) stores: masked vst, but ~14x fewer HBM bytes.
        mu_ref[e] = mu.astype(mu_ref.dtype)
        lv_ref[e] = lv.astype(lv_ref.dtype)


def prepare_params(params, compute_dtype=jnp.bfloat16):
    """One-time parameter preprocessing (hoisted out of the per-call hot path).

    Casts matmul weights to `compute_dtype` (bf16 recommended on v5e/v6e/v7x:
    MXU-native and halves weight DMA).  Biases and min/max_logvar stay f32;
    accumulation and elementwise math stay f32 inside the kernel.
    """
    (w_in, b_in, w_h, b_h, w_mu, b_mu, w_lv, b_lv, min_lv, max_lv) = params
    if jnp.dtype(compute_dtype) != jnp.dtype(jnp.float32):
        w_in = w_in.astype(compute_dtype)
        w_h = w_h.astype(compute_dtype)
        w_mu = w_mu.astype(compute_dtype)
        w_lv = w_lv.astype(compute_dtype)
    return (w_in, b_in, w_h, b_h, w_mu, b_mu, w_lv, b_lv, min_lv, max_lv)


def dynamics_forward(x, params, *, block_b=None, out_dtype=jnp.float32):
    """Forward pass.

    x: (E, B, state+action) f32, or (B, state+action) when the same input is
       broadcast across the ensemble (the `predict` path).
    params: raw f32 params, or the output of prepare_params() (bf16 weights).
    Returns (mu, log_var), each (E, B, state+1) in `out_dtype`.
    """
    (w_in, b_in, w_h, b_h, w_mu, b_mu, w_lv, b_lv, min_lv, max_lv) = params
    E, Din, H = w_in.shape
    L = w_h.shape[1]
    Dout = w_mu.shape[-1]
    compute_dtype = w_in.dtype            # inferred from prepared weights

    shared_x = (x.ndim == 2)
    B = x.shape[0] if shared_x else x.shape[1]

    # --- B tiling (weights stay resident across the b grid axis) -----------
    if block_b is None:
        # Bigger tiles when H is small (amortize ~0.35us/grid step); sweep.
        tb_cap = min(2048, max(512, _round_up(32768 // max(H, 8), 8)))
        n_tiles = _cdiv(B, tb_cap)
        if n_tiles == 1 and B >= 64:
            n_tiles = 2                    # give both v7x TensorCores work
        elif n_tiles > 1 and n_tiles % 2:
            n_tiles += 1                   # even split across the two TCs
        TB = _round_up(_cdiv(B, n_tiles), 8)
    else:
        TB = _round_up(block_b, 8)
    Bp = _round_up(B, TB)                  # padding is always < one tile
    if Bp != B:
        pad = Bp - B
        x = jnp.pad(x, [(0, pad), (0, 0)] if shared_x else [(0, 0), (0, pad), (0, 0)])
    n_b = Bp // TB

    # --- specs --------------------------------------------------------------
    if shared_x:
        x_spec = pl.BlockSpec((TB, Din), lambda b: (b, 0))
    else:
        x_spec = pl.BlockSpec((E, TB, Din), lambda b: (0, b, 0))

    args = [x, w_in, b_in]
    if L > 0:
        args += [w_h, b_h]
    args += [w_mu, b_mu, w_lv, b_lv, min_lv, max_lv]

    def build_in_specs(weight_buffers):
        def wspec(shape):
            zeros = (0,) * len(shape)
            imap = lambda b, _z=zeros: _z            # grid-invariant block
            if weight_buffers is not None:
                return pl.BlockSpec(shape, imap,
                                    pipeline_mode=pl.Buffered(weight_buffers))
            return pl.BlockSpec(shape, imap)

        specs = [x_spec, wspec((E, Din, H)), wspec((E, 1, H))]
        if L > 0:
            specs += [wspec((E, L, H, H)), wspec((E, L, 1, H))]
        specs += [wspec((E, H, Dout)), wspec((E, 1, Dout)),
                  wspec((E, H, Dout)), wspec((E, 1, Dout)),
                  wspec((1, Dout)), wspec((1, Dout))]
        return specs

    out_specs = [pl.BlockSpec((E, TB, Dout), lambda b: (0, b, 0)),
                 pl.BlockSpec((E, TB, Dout), lambda b: (0, b, 0))]
    out_shape = (jax.ShapeDtypeStruct((E, Bp, Dout), out_dtype),
                 jax.ShapeDtypeStruct((E, Bp, Dout), out_dtype))

    kernel = functools.partial(_dynamics_kernel, E=E, L=L,
                               shared_x=shared_x, compute_dtype=compute_dtype)

    # --- VMEM budget (leave headroom; never request v7x's full 64 MiB) ------
    w_item = jnp.dtype(compute_dtype).itemsize
    weight_bytes = ((w_in.size + w_h.size + w_mu.size + w_lv.size) * w_item
                    + (b_in.size + b_h.size + b_mu.size + b_lv.size
                       + min_lv.size + max_lv.size) * 4)
    x_tile_bytes = (TB * Din if shared_x else E * TB * Din) * x.dtype.itemsize
    out_tile_bytes = 2 * E * TB * Dout * jnp.dtype(out_dtype).itemsize
    act_bytes = 4 * TB * H * 4             # a few live f32 copies of h
    needed = 2 * weight_bytes + 2 * (x_tile_bytes + out_tile_bytes) + act_bytes
    vmem_limit = int(min(max(needed * 3 // 2, 32 * 1024 * 1024), 56 * 1024 * 1024))

    flops = 2 * E * Bp * (Din * H + L * H * H + 2 * H * Dout)
    transcendentals = E * Bp * ((L + 1) * H + 4 * Dout)
    bytes_accessed = (sum(int(a.size) * a.dtype.itemsize for a in args)
                      + 2 * E * Bp * Dout * jnp.dtype(out_dtype).itemsize)

    def run(weight_buffers):
        return pl.pallas_call(
            kernel,
            out_shape=out_shape,
            grid_spec=pltpu.PrefetchScalarGridSpec(
                num_scalar_prefetch=0,
                grid=(n_b,),
                in_specs=build_in_specs(weight_buffers),
                out_specs=out_specs),
            compiler_params=pltpu.CompilerParams(
                dimension_semantics=("parallel",),   # B tiles -> both v7x TCs
                vmem_limit_bytes=vmem_limit),
            cost_estimate=pl.CostEstimate(
                flops=flops,
                transcendentals=transcendentals,
                bytes_accessed=bytes_accessed),
        )(*args)

    try:
        # Grid-invariant weights single-buffered: halves resident weight VMEM
        # (matters on v7x's 64 MiB).
        mu, lv = run(1)
    except Exception:
        # Fallback for builds that reject Buffered(1): default double-buffering.
        mu, lv = run(None)

    if Bp != B:                            # drop the (< one tile) padded rows
        mu, lv = mu[:, :B], lv[:, :B]
    return mu, lv


def init_params(key, state_size, action_size, ensemble_size, hidden_layer, hidden_size):
    """Deterministic xavier-uniform-like init (matches shapes of Ensemble_FC_Layer)."""
    Din = state_size + action_size
    Dout = state_size + 1
    H = hidden_size
    E = ensemble_size
    L = hidden_layer

    def xavier(k, shape, fan_in, fan_out):
        bound = (6.0 / (fan_in + fan_out)) ** 0.5
        return jax.random.uniform(k, shape, jnp.float32, -bound, bound)

    keys = jax.random.split(key, 4 + L)
    w_in = xavier(keys[0], (E, Din, H), Din, H)
    b_in = jnp.zeros((E, 1, H), jnp.float32)
    if L > 0:
        w_h = jnp.stack([xavier(keys[1 + l], (E, H, H), H, H) for l in range(L)], axis=1)
    else:
        w_h = jnp.zeros((E, 0, H, H), jnp.float32)
    b_h = jnp.zeros((E, L, 1, H), jnp.float32)
    w_mu = xavier(keys[1 + L], (E, H, Dout), H, Dout)
    b_mu = jnp.zeros((E, 1, Dout), jnp.float32)
    w_lv = xavier(keys[2 + L], (E, H, Dout), H, Dout)
    b_lv = jnp.zeros((E, 1, Dout), jnp.float32)
    min_lv = -jnp.ones((1, Dout), jnp.float32) * 10.0
    max_lv = jnp.ones((1, Dout), jnp.float32) / 2.0
    return (w_in, b_in, w_h, b_h, w_mu, b_mu, w_lv, b_lv, min_lv, max_lv)


def reference_forward(x, params):
    """Pure-JAX reference matching the PyTorch module semantics."""
    (w_in, b_in, w_h, b_h, w_mu, b_mu, w_lv, b_lv, min_lv, max_lv) = params
    softplus = lambda v: jnp.maximum(v, 0.0) + jnp.log1p(jnp.exp(-jnp.abs(v)))
    silu = lambda v: v * jax.nn.sigmoid(v)
    h = silu(jnp.einsum('ebi,eio->ebo', x, w_in) + b_in)
    for l in range(w_h.shape[1]):
        h = silu(jnp.einsum('ebi,eio->ebo', h, w_h[:, l]) + b_h[:, l])
    mu = jnp.einsum('ebi,eio->ebo', h, w_mu) + b_mu
    lv = jnp.einsum('ebi,eio->ebo', h, w_lv) + b_lv
    lv = max_lv[None] - softplus(max_lv[None] - lv)
    lv = min_lv[None] + softplus(lv - min_lv[None])
    return mu, lv


if __name__ == "__main__":
    # small shapes consistent with DynamicsNetwork defaults
    state_size, action_size = 8, 2
    ensemble_size, hidden_layer, hidden_size = 4, 2, 32
    batch = 8

    key = jax.random.PRNGKey(0)
    k_param, k_x, k_x2 = jax.random.split(key, 3)
    params = init_params(k_param, state_size, action_size,
                         ensemble_size, hidden_layer, hidden_size)

    # input = states|actions concatenated and repeated across the ensemble
    # (matches `predict`: inputs[None].repeat(ensemble_size, 1, 1))
    x_single = jax.random.normal(k_x, (batch, state_size + action_size), jnp.float32)
    x = jnp.broadcast_to(x_single[None], (ensemble_size, batch, state_size + action_size))

    mu_ref, lv_ref = reference_forward(x, params)

    # 1) generic (E, B, Din) input, f32 weights
    mu, log_var = dynamics_forward(x, params)
    jax.block_until_ready((mu, log_var))
    assert mu.shape == (ensemble_size, batch, state_size + 1)
    assert log_var.shape == (ensemble_size, batch, state_size + 1)
    assert jnp.allclose(mu, mu_ref, atol=2e-4, rtol=2e-4)
    assert jnp.allclose(log_var, lv_ref, atol=2e-4, rtol=2e-4)

    # 2) shared (B, Din) input (predict() path: activations DMA'd once, not E times)
    mu_s, lv_s = dynamics_forward(x_single, params)
    jax.block_until_ready((mu_s, lv_s))
    assert jnp.allclose(mu_s, mu_ref, atol=2e-4, rtol=2e-4)
    assert jnp.allclose(lv_s, lv_ref, atol=2e-4, rtol=2e-4)

    # 3) bf16 weights prepared ONCE (recommended on v5e/v6e/v7x); f32 accumulation
    params_bf16 = prepare_params(params, jnp.bfloat16)
    mu_b, lv_b = dynamics_forward(x, params_bf16)
    jax.block_until_ready((mu_b, lv_b))
    assert jnp.allclose(mu_b, mu_ref, atol=1e-1, rtol=1e-1)
    assert jnp.allclose(lv_b, lv_ref, atol=1e-1, rtol=1e-1)

    # 4) hidden_layer == 0 robustness (w_h/b_h operands skipped entirely)
    params0 = init_params(k_param, state_size, action_size,
                          ensemble_size, 0, hidden_size)
    mu0, lv0 = dynamics_forward(x, params0)
    mu0_ref, lv0_ref = reference_forward(x, params0)
    jax.block_until_ready((mu0, lv0))
    assert jnp.allclose(mu0, mu0_ref, atol=2e-4, rtol=2e-4)
    assert jnp.allclose(lv0, lv0_ref, atol=2e-4, rtol=2e-4)

    # 5) B not divisible by the tile -> multi-tile grid + minimal-pad path
    x_odd = jax.random.normal(k_x2, (ensemble_size, 12, state_size + action_size),
                              jnp.float32)
    mu_o, lv_o = dynamics_forward(x_odd, params, block_b=8)
    mu_o_ref, lv_o_ref = reference_forward(x_odd, params)
    jax.block_until_ready((mu_o, lv_o))
    assert mu_o.shape == (ensemble_size, 12, state_size + 1)
    assert jnp.allclose(mu_o, mu_o_ref, atol=2e-4, rtol=2e-4)
    assert jnp.allclose(lv_o, lv_o_ref, atol=2e-4, rtol=2e-4)

    print("KERNEL_OK")
</pallas_src>

<mosaic_0001>
module attributes {stable_mosaic.version = 11 : i64} {
  func.func @_dynamics_kernel(%arg0: i32, %arg1: memref<4x8x10xf32, #tpu.memory_space<vmem>>, %arg2: memref<4x10x32xf32, #tpu.memory_space<vmem>>, %arg3: memref<4x1x32xf32, #tpu.memory_space<vmem>>, %arg4: memref<4x2x32x32xf32, #tpu.memory_space<vmem>>, %arg5: memref<4x2x1x32xf32, #tpu.memory_space<vmem>>, %arg6: memref<4x32x9xf32, #tpu.memory_space<vmem>>, %arg7: memref<4x1x9xf32, #tpu.memory_space<vmem>>, %arg8: memref<4x32x9xf32, #tpu.memory_space<vmem>>, %arg9: memref<4x1x9xf32, #tpu.memory_space<vmem>>, %arg10: memref<1x9xf32, #tpu.memory_space<vmem>>, %arg11: memref<1x9xf32, #tpu.memory_space<vmem>>, %arg12: memref<4x8x9xf32, #tpu.memory_space<vmem>>, %arg13: memref<4x8x9xf32, #tpu.memory_space<vmem>>) attributes {dimension_semantics = [#tpu.dimension_semantics<parallel>], iteration_bounds = array<i64: 1>, scalar_prefetch = 0 : i64, scratch_operands = 0 : i64, tpu.core_type = #tpu.core_type<tc>, window_params = [{transform_indices = @transform_0, window_bounds = array<i64: 4, 8, 10>}, {pipeline_mode = #tpu.pipeline_mode<synchronous>, transform_indices = @transform_1, window_bounds = array<i64: 4, 10, 32>}, {pipeline_mode = #tpu.pipeline_mode<synchronous>, transform_indices = @transform_2, window_bounds = array<i64: 4, 1, 32>}, {pipeline_mode = #tpu.pipeline_mode<synchronous>, transform_indices = @transform_3, window_bounds = array<i64: 4, 2, 32, 32>}, {pipeline_mode = #tpu.pipeline_mode<synchronous>, transform_indices = @transform_4, window_bounds = array<i64: 4, 2, 1, 32>}, {pipeline_mode = #tpu.pipeline_mode<synchronous>, transform_indices = @transform_5, window_bounds = array<i64: 4, 32, 9>}, {pipeline_mode = #tpu.pipeline_mode<synchronous>, transform_indices = @transform_6, window_bounds = array<i64: 4, 1, 9>}, {pipeline_mode = #tpu.pipeline_mode<synchronous>, transform_indices = @transform_7, window_bounds = array<i64: 4, 32, 9>}, {pipeline_mode = #tpu.pipeline_mode<synchronous>, transform_indices = @transform_8, window_bounds = array<i64: 4, 1, 9>}, {pipeline_mode = #tpu.pipeline_mode<synchronous>, transform_indices = @transform_9, window_bounds = array<i64: 1, 9>}, {pipeline_mode = #tpu.pipeline_mode<synchronous>, transform_indices = @transform_10, window_bounds = array<i64: 1, 9>}, {transform_indices = @transform_11, window_bounds = array<i64: 4, 8, 9>}, {transform_indices = @transform_12, window_bounds = array<i64: 4, 8, 9>}]} {
    %c0 = arith.constant 0 : index
    %c0_0 = arith.constant 0 : index
    %0 = vector.load %arg11[%c0, %c0_0] : memref<1x9xf32, #tpu.memory_space<vmem>>, vector<1x9xf32>
    %c0_1 = arith.constant 0 : index
    %c0_2 = arith.constant 0 : index
    %1 = vector.load %arg10[%c0_1, %c0_2] : memref<1x9xf32, #tpu.memory_space<vmem>>, vector<1x9xf32>
    %c0_3 = arith.constant 0 : index
    %c0_4 = arith.constant 0 : index
    %c0_5 = arith.constant 0 : index
    %2 = vector.load %arg1[%c0_3, %c0_4, %c0_5] : memref<4x8x10xf32, #tpu.memory_space<vmem>>, vector<1x8x10xf32>
    %3 = vector.shape_cast %2 : vector<1x8x10xf32> to vector<8x10xf32>
    %c0_6 = arith.constant 0 : index
    %c0_7 = arith.constant 0 : index
    %c0_8 = arith.constant 0 : index
    %4 = vector.load %arg2[%c0_6, %c0_7, %c0_8] : memref<4x10x32xf32, #tpu.memory_space<vmem>>, vector<1x10x32xf32>
    %5 = vector.shape_cast %4 : vector<1x10x32xf32> to vector<10x32xf32>
    %cst = arith.constant dense<0.000000e+00> : vector<8x32xf32>
    %6 = tpu.matmul %3, %5, %cst {dimension_numbers = #tpu.dot_dimension_numbers<[1], [0], [0], [1], [0, 0, 1, 1], [], []>} : vector<8x10xf32>, vector<10x32xf32>, vector<8x32xf32> -> vector<8x32xf32>
    %c0_9 = arith.constant 0 : index
    %c0_10 = arith.constant 0 : index
    %c0_11 = arith.constant 0 : index
    %7 = vector.load %arg3[%c0_9, %c0_10, %c0_11] : memref<4x1x32xf32, #tpu.memory_space<vmem>>, vector<1x1x32xf32>
    %8 = vector.shape_cast %7 : vector<1x1x32xf32> to vector<1x32xf32>
    %9 = vector.broadcast %8 : vector<1x32xf32> to vector<8x32xf32>
    %10 = arith.addf %6, %9 : vector<8x32xf32>
    %cst_12 = arith.constant 5.000000e-01 : f32
    %11 = vector.broadcast %cst_12 : f32 to vector<8x32xf32>
    %12 = arith.mulf %11, %10 : vector<8x32xf32>
    %cst_13 = arith.constant 5.000000e-01 : f32
    %13 = vector.broadcast %cst_13 : f32 to vector<8x32xf32>
    %14 = arith.mulf %13, %10 : vector<8x32xf32>
    %15 = math.tanh %14 : vector<8x32xf32>
    %cst_14 = arith.constant 1.000000e+00 : f32
    %16 = vector.broadcast %cst_14 : f32 to vector<8x32xf32>
    %17 = arith.addf %16, %15 : vector<8x32xf32>
    %18 = arith.mulf %12, %17 : vector<8x32xf32>
    %c0_15 = arith.constant 0 : index
    %c0_16 = arith.constant 0 : index
    %c0_17 = arith.constant 0 : index
    %c0_18 = arith.constant 0 : index
    %19 = vector.load %arg4[%c0_15, %c0_16, %c0_17, %c0_18] : memref<4x2x32x32xf32, #tpu.memory_space<vmem>>, vector<1x1x32x32xf32>
    %20 = vector.shape_cast %19 : vector<1x1x32x32xf32> to vector<32x32xf32>
    %cst_19 = arith.constant dense<0.000000e+00> : vector<8x32xf32>
    %21 = tpu.matmul %18, %20, %cst_19 {dimension_numbers = #tpu.dot_dimension_numbers<[1], [0], [0], [1], [0, 0, 1, 1], [], []>} : vector<8x32xf32>, vector<32x32xf32>, vector<8x32xf32> -> vector<8x32xf32>
    %c0_20 = arith.constant 0 : index
    %c0_21 = arith.constant 0 : index
    %c0_22 = arith.constant 0 : index
    %c0_23 = arith.constant 0 : index
    %22 = vector.load %arg5[%c0_20, %c0_21, %c0_22, %c0_23] : memref<4x2x1x32xf32, #tpu.memory_space<vmem>>, vector<1x1x1x32xf32>
    %23 = vector.shape_cast %22 : vector<1x1x1x32xf32> to vector<1x32xf32>
    %24 = vector.broadcast %23 : vector<1x32xf32> to vector<8x32xf32>
    %25 = arith.addf %21, %24 : vector<8x32xf32>
    %cst_24 = arith.constant 5.000000e-01 : f32
    %26 = vector.broadcast %cst_24 : f32 to vector<8x32xf32>
    %27 = arith.mulf %26, %25 : vector<8x32xf32>
    %cst_25 = arith.constant 5.000000e-01 : f32
    %28 = vector.broadcast %cst_25 : f32 to vector<8x32xf32>
    %29 = arith.mulf %28, %25 : vector<8x32xf32>
    %30 = math.tanh %29 : vector<8x32xf32>
    %cst_26 = arith.constant 1.000000e+00 : f32
    %31 = vector.broadcast %cst_26 : f32 to vector<8x32xf32>
    %32 = arith.addf %31, %30 : vector<8x32xf32>
    %33 = arith.mulf %27, %32 : vector<8x32xf32>
    %c0_27 = arith.constant 0 : index
    %c1 = arith.constant 1 : index
    %c0_28 = arith.constant 0 : index
    %c0_29 = arith.constant 0 : index
    %34 = vector.load %arg4[%c0_27, %c1, %c0_28, %c0_29] : memref<4x2x32x32xf32, #tpu.memory_space<vmem>>, vector<1x1x32x32xf32>
    %35 = vector.shape_cast %34 : vector<1x1x32x32xf32> to vector<32x32xf32>
    %cst_30 = arith.constant dense<0.000000e+00> : vector<8x32xf32>
    %36 = tpu.matmul %33, %35, %cst_30 {dimension_numbers = #tpu.dot_dimension_numbers<[1], [0], [0], [1], [0, 0, 1, 1], [], []>} : vector<8x32xf32>, vector<32x32xf32>, vector<8x32xf32> -> vector<8x32xf32>
    %c0_31 = arith.constant 0 : index
    %c1_32 = arith.constant 1 : index
    %c0_33 = arith.constant 0 : index
    %c0_34 = arith.constant 0 : index
    %37 = vector.load %arg5[%c0_31, %c1_32, %c0_33, %c0_34] : memref<4x2x1x32xf32, #tpu.memory_space<vmem>>, vector<1x1x1x32xf32>
    %38 = vector.shape_cast %37 : vector<1x1x1x32xf32> to vector<1x32xf32>
    %39 = vector.broadcast %38 : vector<1x32xf32> to vector<8x32xf32>
    %40 = arith.addf %36, %39 : vector<8x32xf32>
    %cst_35 = arith.constant 5.000000e-01 : f32
    %41 = vector.broadcast %cst_35 : f32 to vector<8x32xf32>
    %42 = arith.mulf %41, %40 : vector<8x32xf32>
    %cst_36 = arith.constant 5.000000e-01 : f32
    %43 = vector.broadcast %cst_36 : f32 to vector<8x32xf32>
    %44 = arith.mulf %43, %40 : vector<8x32xf32>
    %45 = math.tanh %44 : vector<8x32xf32>
    %cst_37 = arith.constant 1.000000e+00 : f32
    %46 = vector.broadcast %cst_37 : f32 to vector<8x32xf32>
    %47 = arith.addf %46, %45 : vector<8x32xf32>
    %48 = arith.mulf %42, %47 : vector<8x32xf32>
    %c0_38 = arith.constant 0 : index
    %c0_39 = arith.constant 0 : index
    %c0_40 = arith.constant 0 : index
    %49 = vector.load %arg6[%c0_38, %c0_39, %c0_40] : memref<4x32x9xf32, #tpu.memory_space<vmem>>, vector<1x32x9xf32>
    %50 = vector.shape_cast %49 : vector<1x32x9xf32> to vector<32x9xf32>
    %cst_41 = arith.constant dense<0.000000e+00> : vector<8x9xf32>
    %51 = tpu.matmul %48, %50, %cst_41 {dimension_numbers = #tpu.dot_dimension_numbers<[1], [0], [0], [1], [0, 0, 1, 1], [], []>} : vector<8x32xf32>, vector<32x9xf32>, vector<8x9xf32> -> vector<8x9xf32>
    %c0_42 = arith.constant 0 : index
    %c0_43 = arith.constant 0 : index
    %c0_44 = arith.constant 0 : index
    %52 = vector.load %arg7[%c0_42, %c0_43, %c0_44] : memref<4x1x9xf32, #tpu.memory_space<vmem>>, vector<1x1x9xf32>
    %53 = vector.shape_cast %52 : vector<1x1x9xf32> to vector<1x9xf32>
    %54 = vector.broadcast %53 : vector<1x9xf32> to vector<8x9xf32>
    %55 = arith.addf %51, %54 : vector<8x9xf32>
    %c0_45 = arith.constant 0 : index
    %c0_46 = arith.constant 0 : index
    %c0_47 = arith.constant 0 : index
    %56 = vector.load %arg8[%c0_45, %c0_46, %c0_47] : memref<4x32x9xf32, #tpu.memory_space<vmem>>, vector<1x32x9xf32>
    %57 = vector.shape_cast %56 : vector<1x32x9xf32> to vector<32x9xf32>
    %cst_48 = arith.constant dense<0.000000e+00> : vector<8x9xf32>
    %58 = tpu.matmul %48, %57, %cst_48 {dimension_numbers = #tpu.dot_dimension_numbers<[1], [0], [0], [1], [0, 0, 1, 1], [], []>} : vector<8x32xf32>, vector<32x9xf32>, vector<8x9xf32> -> vector<8x9xf32>
    %c0_49 = arith.constant 0 : index
    %c0_50 = arith.constant 0 : index
    %c0_51 = arith.constant 0 : index
    %59 = vector.load %arg9[%c0_49, %c0_50, %c0_51] : memref<4x1x9xf32, #tpu.memory_space<vmem>>, vector<1x1x9xf32>
    %60 = vector.shape_cast %59 : vector<1x1x9xf32> to vector<1x9xf32>
    %61 = vector.broadcast %60 : vector<1x9xf32> to vector<8x9xf32>
    %62 = arith.addf %58, %61 : vector<8x9xf32>
    %63 = vector.broadcast %0 : vector<1x9xf32> to vector<8x9xf32>
    %64 = arith.subf %63, %62 : vector<8x9xf32>
    %cst_52 = arith.constant 0.000000e+00 : f32
    %65 = vector.broadcast %cst_52 : f32 to vector<8x9xf32>
    %66 = arith.maximumf %64, %65 : vector<8x9xf32>
    %67 = math.absf %64 : vector<8x9xf32>
    %cst_53 = arith.constant 0.000000e+00 : f32
    %68 = vector.broadcast %cst_53 : f32 to vector<8x9xf32>
    %69 = arith.subf %68, %67 : vector<8x9xf32>
    %70 = math.exp %69 : vector<8x9xf32>
    %71 = math.log1p %70 : vector<8x9xf32>
    %72 = arith.addf %66, %71 : vector<8x9xf32>
    %73 = vector.broadcast %0 : vector<1x9xf32> to vector<8x9xf32>
    %74 = arith.subf %73, %72 : vector<8x9xf32>
    %75 = vector.broadcast %1 : vector<1x9xf32> to vector<8x9xf32>
    %76 = arith.subf %74, %75 : vector<8x9xf32>
    %cst_54 = arith.constant 0.000000e+00 : f32
    %77 = vector.broadcast %cst_54 : f32 to vector<8x9xf32>
    %78 = arith.maximumf %76, %77 : vector<8x9xf32>
    %79 = math.absf %76 : vector<8x9xf32>
    %cst_55 = arith.constant 0.000000e+00 : f32
    %80 = vector.broadcast %cst_55 : f32 to vector<8x9xf32>
    %81 = arith.subf %80, %79 : vector<8x9xf32>
    %82 = math.exp %81 : vector<8x9xf32>
    %83 = math.log1p %82 : vector<8x9xf32>
    %84 = arith.addf %78, %83 : vector<8x9xf32>
    %85 = vector.broadcast %1 : vector<1x9xf32> to vector<8x9xf32>
    %86 = arith.addf %85, %84 : vector<8x9xf32>
    %c0_56 = arith.constant 0 : index
    %c0_57 = arith.constant 0 : index
    %c0_58 = arith.constant 0 : index
    %87 = vector.load %arg12[%c0_56, %c0_57, %c0_58] : memref<4x8x9xf32, #tpu.memory_space<vmem>>, vector<1x8x9xf32>
    %88 = vector.shape_cast %87 : vector<1x8x9xf32> to vector<8x9xf32>
    %89 = vector.shape_cast %55 : vector<8x9xf32> to vector<1x8x9xf32>
    tpu.vector_store %arg12[%c0_56, %c0_57, %c0_58], %89 {strides = array<i32>} : memref<4x8x9xf32, #tpu.memory_space<vmem>>, vector<1x8x9xf32>,
    %c0_59 = arith.constant 0 : index
    %c0_60 = arith.constant 0 : index
    %c0_61 = arith.constant 0 : index
    %90 = vector.load %arg13[%c0_59, %c0_60, %c0_61] : memref<4x8x9xf32, #tpu.memory_space<vmem>>, vector<1x8x9xf32>
    %91 = vector.shape_cast %90 : vector<1x8x9xf32> to vector<8x9xf32>
    %92 = vector.shape_cast %86 : vector<8x9xf32> to vector<1x8x9xf32>
    tpu.vector_store %arg13[%c0_59, %c0_60, %c0_61], %92 {strides = array<i32>} : memref<4x8x9xf32, #tpu.memory_space<vmem>>, vector<1x8x9xf32>,
    %c1_62 = arith.constant 1 : index
    %c0_63 = arith.constant 0 : index
    %c0_64 = arith.constant 0 : index
    %93 = vector.load %arg1[%c1_62, %c0_63, %c0_64] : memref<4x8x10xf32, #tpu.memory_space<vmem>>, vector<1x8x10xf32>
    %94 = vector.shape_cast %93 : vector<1x8x10xf32> to vector<8x10xf32>
    %c1_65 = arith.constant 1 : index
    %c0_66 = arith.constant 0 : index
    %c0_67 = arith.constant 0 : index
    %95 = vector.load %arg2[%c1_65, %c0_66, %c0_67] : memref<4x10x32xf32, #tpu.memory_space<vmem>>, vector<1x10x32xf32>
    %96 = vector.shape_cast %95 : vector<1x10x32xf32> to vector<10x32xf32>
    %cst_68 = arith.constant dense<0.000000e+00> : vector<8x32xf32>
    %97 = tpu.matmul %94, %96, %cst_68 {dimension_numbers = #tpu.dot_dimension_numbers<[1], [0], [0], [1], [0, 0, 1, 1], [], []>} : vector<8x10xf32>, vector<10x32xf32>, vector<8x32xf32> -> vector<8x32xf32>
    %c1_69 = arith.constant 1 : index
    %c0_70 = arith.constant 0 : index
    %c0_71 = arith.constant 0 : index
    %98 = vector.load %arg3[%c1_69, %c0_70, %c0_71] : memref<4x1x32xf32, #tpu.memory_space<vmem>>, vector<1x1x32xf32>
    %99 = vector.shape_cast %98 : vector<1x1x32xf32> to vector<1x32xf32>
    %100 = vector.broadcast %99 : vector<1x32xf32> to vector<8x32xf32>
    %101 = arith.addf %97, %100 : vector<8x32xf32>
    %cst_72 = arith.constant 5.000000e-01 : f32
    %102 = vector.broadcast %cst_72 : f32 to vector<8x32xf32>
    %103 = arith.mulf %102, %101 : vector<8x32xf32>
    %cst_73 = arith.constant 5.000000e-01 : f32
    %104 = vector.broadcast %cst_73 : f32 to vector<8x32xf32>
    %105 = arith.mulf %104, %101 : vector<8x32xf32>
    %106 = math.tanh %105 : vector<8x32xf32>
    %cst_74 = arith.constant 1.000000e+00 : f32
    %107 = vector.broadcast %cst_74 : f32 to vector<8x32xf32>
    %108 = arith.addf %107, %106 : vector<8x32xf32>
    %109 = arith.mulf %103, %108 : vector<8x32xf32>
    %c1_75 = arith.constant 1 : index
    %c0_76 = arith.constant 0 : index
    %c0_77 = arith.constant 0 : index
    %c0_78 = arith.constant 0 : index
    %110 = vector.load %arg4[%c1_75, %c0_76, %c0_77, %c0_78] : memref<4x2x32x32xf32, #tpu.memory_space<vmem>>, vector<1x1x32x32xf32>
    %111 = vector.shape_cast %110 : vector<1x1x32x32xf32> to vector<32x32xf32>
    %cst_79 = arith.constant dense<0.000000e+00> : vector<8x32xf32>
    %112 = tpu.matmul %109, %111, %cst_79 {dimension_numbers = #tpu.dot_dimension_numbers<[1], [0], [0], [1], [0, 0, 1, 1], [], []>} : vector<8x32xf32>, vector<32x32xf32>, vector<8x32xf32> -> vector<8x32xf32>
    %c1_80 = arith.constant 1 : index
    %c0_81 = arith.constant 0 : index
    %c0_82 = arith.constant 0 : index
    %c0_83 = arith.constant 0 : index
    %113 = vector.load %arg5[%c1_80, %c0_81, %c0_82, %c0_83] : memref<4x2x1x32xf32, #tpu.memory_space<vmem>>, vector<1x1x1x32xf32>
    %114 = vector.shape_cast %113 : vector<1x1x1x32xf32> to vector<1x32xf32>
    %115 = vector.broadcast %114 : vector<1x32xf32> to vector<8x32xf32>
    %116 = arith.addf %112, %115 : vector<8x32xf32>
    %cst_84 = arith.constant 5.000000e-01 : f32
    %117 = vector.broadcast %cst_84 : f32 to vector<8x32xf32>
    %118 = arith.mulf %117, %116 : vector<8x32xf32>
    %cst_85 = arith.constant 5.000000e-01 : f32
    %119 = vector.broadcast %cst_85 : f32 to vector<8x32xf32>
    %120 = arith.mulf %119, %116 : vector<8x32xf32>
    %121 = math.tanh %120 : vector<8x32xf32>
    %cst_86 = arith.constant 1.000000e+00 : f32
    %122 = vector.broadcast %cst_86 : f32 to vector<8x32xf32>
    %123 = arith.addf %122, %121 : vector<8x32xf32>
    %124 = arith.mulf %118, %123 : vector<8x32xf32>
    %c1_87 = arith.constant 1 : index
    %c1_88 = arith.constant 1 : index
    %c0_89 = arith.constant 0 : index
    %c0_90 = arith.constant 0 : index
    %125 = vector.load %arg4[%c1_87, %c1_88, %c0_89, %c0_90] : memref<4x2x32x32xf32, #tpu.memory_space<vmem>>, vector<1x1x32x32xf32>
    %126 = vector.shape_cast %125 : vector<1x1x32x32xf32> to vector<32x32xf32>
    %cst_91 = arith.constant dense<0.000000e+00> : vector<8x32xf32>
    %127 = tpu.matmul %124, %126, %cst_91 {dimension_numbers = #tpu.dot_dimension_numbers<[1], [0], [0], [1], [0, 0, 1, 1], [], []>} : vector<8x32xf32>, vector<32x32xf32>, vector<8x32xf32> -> vector<8x32xf32>
    %c1_92 = arith.constant 1 : index
    %c1_93 = arith.constant 1 : index
    %c0_94 = arith.constant 0 : index
    %c0_95 = arith.constant 0 : index
    %128 = vector.load %arg5[%c1_92, %c1_93, %c0_94, %c0_95] : memref<4x2x1x32xf32, #tpu.memory_space<vmem>>, vector<1x1x1x32xf32>
    %129 = vector.shape_cast %128 : vector<1x1x1x32xf32> to vector<1x32xf32>
    %130 = vector.broadcast %129 : vector<1x32xf32> to vector<8x32xf32>
    %131 = arith.addf %127, %130 : vector<8x32xf32>
    %cst_96 = arith.constant 5.000000e-01 : f32
    %132 = vector.broadcast %cst_96 : f32 to vector<8x32xf32>
    %133 = arith.mulf %132, %131 : vector<8x32xf32>
    %cst_97 = arith.constant 5.000000e-01 : f32
    %134 = vector.broadcast %cst_97 : f32 to vector<8x32xf32>
    %135 = arith.mulf %134, %131 : vector<8x32xf32>
    %136 = math.tanh %135 : vector<8x32xf32>
    %cst_98 = arith.constant 1.000000e+00 : f32
    %137 = vector.broadcast %cst_98 : f32 to vector<8x32xf32>
    %138 = arith.addf %137, %136 : vector<8x32xf32>
    %139 = arith.mulf %133, %138 : vector<8x32xf32>
    %c1_99 = arith.constant 1 : index
    %c0_100 = arith.constant 0 : index
    %c0_101 = arith.constant 0 : index
    %140 = vector.load %arg6[%c1_99, %c0_100, %c0_101] : memref<4x32x9xf32, #tpu.memory_space<vmem>>, vector<1x32x9xf32>
    %141 = vector.shape_cast %140 : vector<1x32x9xf32> to vector<32x9xf32>
    %cst_102 = arith.constant dense<0.000000e+00> : vector<8x9xf32>
    %142 = tpu.matmul %139, %141, %cst_102 {dimension_numbers = #tpu.dot_dimension_numbers<[1], [0], [0], [1], [0, 0, 1, 1], [], []>} : vector<8x32xf32>, vector<32x9xf32>, vector<8x9xf32> -> vector<8x9xf32>
    %c1_103 = arith.constant 1 : index
    %c0_104 = arith.constant 0 : index
    %c0_105 = arith.constant 0 : index
    %143 = vector.load %arg7[%c1_103, %c0_104, %c0_105] : memref<4x1x9xf32, #tpu.memory_space<vmem>>, vector<1x1x9xf32>
    %144 = vector.shape_cast %143 : vector<1x1x9xf32> to vector<1x9xf32>
    %145 = vector.broadcast %144 : vector<1x9xf32> to vector<8x9xf32>
    %146 = arith.addf %142, %145 : vector<8x9xf32>
    %c1_106 = arith.constant 1 : index
    %c0_107 = arith.constant 0 : index
    %c0_108 = arith.constant 0 : index
    %147 = vector.load %arg8[%c1_106, %c0_107, %c0_108] : memref<4x32x9xf32, #tpu.memory_space<vmem>>, vector<1x32x9xf32>
    %148 = vector.shape_cast %147 : vector<1x32x9xf32> to vector<32x9xf32>
    %cst_109 = arith.constant dense<0.000000e+00> : vector<8x9xf32>
    %149 = tpu.matmul %139, %148, %cst_109 {dimension_numbers = #tpu.dot_dimension_numbers<[1], [0], [0], [1], [0, 0, 1, 1], [], []>} : vector<8x32xf32>, vector<32x9xf32>, vector<8x9xf32> -> vector<8x9xf32>
    %c1_110 = arith.constant 1 : index
    %c0_111 = arith.constant 0 : index
    %c0_112 = arith.constant 0 : index
    %150 = vector.load %arg9[%c1_110, %c0_111, %c0_112] : memref<4x1x9xf32, #tpu.memory_space<vmem>>, vector<1x1x9xf32>
    %151 = vector.shape_cast %150 : vector<1x1x9xf32> to vector<1x9xf32>
    %152 = vector.broadcast %151 : vector<1x9xf32> to vector<8x9xf32>
    %153 = arith.addf %149, %152 : vector<8x9xf32>
    %154 = vector.broadcast %0 : vector<1x9xf32> to vector<8x9xf32>
    %155 = arith.subf %154, %153 : vector<8x9xf32>
    %cst_113 = arith.constant 0.000000e+00 : f32
    %156 = vector.broadcast %cst_113 : f32 to vector<8x9xf32>
    %157 = arith.maximumf %155, %156 : vector<8x9xf32>
    %158 = math.absf %155 : vector<8x9xf32>
    %cst_114 = arith.constant 0.000000e+00 : f32
    %159 = vector.broadcast %cst_114 : f32 to vector<8x9xf32>
    %160 = arith.subf %159, %158 : vector<8x9xf32>
    %161 = math.exp %160 : vector<8x9xf32>
    %162 = math.log1p %161 : vector<8x9xf32>
    %163 = arith.addf %157, %162 : vector<8x9xf32>
    %164 = vector.broadcast %0 : vector<1x9xf32> to vector<8x9xf32>
    %165 = arith.subf %164, %163 : vector<8x9xf32>
    %166 = vector.broadcast %1 : vector<1x9xf32> to vector<8x9xf32>
    %167 = arith.subf %165, %166 : vector<8x9xf32>
    %cst_115 = arith.constant 0.000000e+00 : f32
    %168 = vector.broadcast %cst_115 : f32 to vector<8x9xf32>
    %169 = arith.maximumf %167, %168 : vector<8x9xf32>
    %170 = math.absf %167 : vector<8x9xf32>
    %cst_116 = arith.constant 0.000000e+00 : f32
    %171 = vector.broadcast %cst_116 : f32 to vector<8x9xf32>
    %172 = arith.subf %171, %170 : vector<8x9xf32>
    %173 = math.exp %172 : vector<8x9xf32>
    %174 = math.log1p %173 : vector<8x9xf32>
    %175 = arith.addf %169, %174 : vector<8x9xf32>
    %176 = vector.broadcast %1 : vector<1x9xf32> to vector<8x9xf32>
    %177 = arith.addf %176, %175 : vector<8x9xf32>
    %c1_117 = arith.constant 1 : index
    %c0_118 = arith.constant 0 : index
    %c0_119 = arith.constant 0 : index
    %178 = vector.load %arg12[%c1_117, %c0_118, %c0_119] : memref<4x8x9xf32, #tpu.memory_space<vmem>>, vector<1x8x9xf32>
    %179 = vector.shape_cast %178 : vector<1x8x9xf32> to vector<8x9xf32>
    %180 = vector.shape_cast %146 : vector<8x9xf32> to vector<1x8x9xf32>
    tpu.vector_store %arg12[%c1_117, %c0_118, %c0_119], %180 {strides = array<i32>} : memref<4x8x9xf32, #tpu.memory_space<vmem>>, vector<1x8x9xf32>,
    %c1_120 = arith.constant 1 : index
    %c0_121 = arith.constant 0 : index
    %c0_122 = arith.constant 0 : index
    %181 = vector.load %arg13[%c1_120, %c0_121, %c0_122] : memref<4x8x9xf32, #tpu.memory_space<vmem>>, vector<1x8x9xf32>
    %182 = vector.shape_cast %181 : vector<1x8x9xf32> to vector<8x9xf32>
    %183 = vector.shape_cast %177 : vector<8x9xf32> to vector<1x8x9xf32>
    tpu.vector_store %arg13[%c1_120, %c0_121, %c0_122], %183 {strides = array<i32>} : memref<4x8x9xf32, #tpu.memory_space<vmem>>, vector<1x8x9xf32>,
    %c2 = arith.constant 2 : index
    %c0_123 = arith.constant 0 : index
    %c0_124 = arith.constant 0 : index
    %184 = vector.load %arg1[%c2, %c0_123, %c0_124] : memref<4x8x10xf32, #tpu.memory_space<vmem>>, vector<1x8x10xf32>
    %185 = vector.shape_cast %184 : vector<1x8x10xf32> to vector<8x10xf32>
    %c2_125 = arith.constant 2 : index
    %c0_126 = arith.constant 0 : index
    %c0_127 = arith.constant 0 : index
    %186 = vector.load %arg2[%c2_125, %c0_126, %c0_127] : memref<4x10x32xf32, #tpu.memory_space<vmem>>, vector<1x10x32xf32>
    %187 = vector.shape_cast %186 : vector<1x10x32xf32> to vector<10x32xf32>
    %cst_128 = arith.constant dense<0.000000e+00> : vector<8x32xf32>
    %188 = tpu.matmul %185, %187, %cst_128 {dimension_numbers = #tpu.dot_dimension_numbers<[1], [0], [0], [1], [0, 0, 1, 1], [], []>} : vector<8x10xf32>, vector<10x32xf32>, vector<8x32xf32> -> vector<8x32xf32>
    %c2_129 = arith.constant 2 : index
    %c0_130 = arith.constant 0 : index
    %c0_131 = arith.constant 0 : index
    %189 = vector.load %arg3[%c2_129, %c0_130, %c0_131] : memref<4x1x32xf32, #tpu.memory_space<vmem>>, vector<1x1x32xf32>
    %190 = vector.shape_cast %189 : vector<1x1x32xf32> to vector<1x32xf32>
    %191 = vector.broadcast %190 : vector<1x32xf32> to vector<8x32xf32>
    %192 = arith.addf %188, %191 : vector<8x32xf32>
    %cst_132 = arith.constant 5.000000e-01 : f32
    %193 = vector.broadcast %cst_132 : f32 to vector<8x32xf32>
    %194 = arith.mulf %193, %192 : vector<8x32xf32>
    %cst_133 = arith.constant 5.000000e-01 : f32
    %195 = vector.broadcast %cst_133 : f32 to vector<8x32xf32>
    %196 = arith.mulf %195, %192 : vector<8x32xf32>
    %197 = math.tanh %196 : vector<8x32xf32>
    %cst_134 = arith.constant 1.000000e+00 : f32
    %198 = vector.broadcast %cst_134 : f32 to vector<8x32xf32>
    %199 = arith.addf %198, %197 : vector<8x32xf32>
    %200 = arith.mulf %194, %199 : vector<8x32xf32>
    %c2_135 = arith.constant 2 : index
    %c0_136 = arith.constant 0 : index
    %c0_137 = arith.constant 0 : index
    %c0_138 = arith.constant 0 : index
    %201 = vector.load %arg4[%c2_135, %c0_136, %c0_137, %c0_138] : memref<4x2x32x32xf32, #tpu.memory_space<vmem>>, vector<1x1x32x32xf32>
    %202 = vector.shape_cast %201 : vector<1x1x32x32xf32> to vector<32x32xf32>
    %cst_139 = arith.constant dense<0.000000e+00> : vector<8x32xf32>
    %203 = tpu.matmul %200, %202, %cst_139 {dimension_numbers = #tpu.dot_dimension_numbers<[1], [0], [0], [1], [0, 0, 1, 1], [], []>} : vector<8x32xf32>, vector<32x32xf32>, vector<8x32xf32> -> vector<8x32xf32>
    %c2_140 = arith.constant 2 : index
    %c0_141 = arith.constant 0 : index
    %c0_142 = arith.constant 0 : index
    %c0_143 = arith.constant 0 : index
    %204 = vector.load %arg5[%c2_140, %c0_141, %c0_142, %c0_143] : memref<4x2x1x32xf32, #tpu.memory_space<vmem>>, vector<1x1x1x32xf32>
    %205 = vector.shape_cast %204 : vector<1x1x1x32xf32> to vector<1x32xf32>
    %206 = vector.broadcast %205 : vector<1x32xf32> to vector<8x32xf32>
    %207 = arith.addf %203, %206 : vector<8x32xf32>
    %cst_144 = arith.constant 5.000000e-01 : f32
    %208 = vector.broadcast %cst_144 : f32 to vector<8x32xf32>
    %209 = arith.mulf %208, %207 : vector<8x32xf32>
    %cst_145 = arith.constant 5.000000e-01 : f32
    %210 = vector.broadcast %cst_145 : f32 to vector<8x32xf32>
    %211 = arith.mulf %210, %207 : vector<8x32xf32>
    %212 = math.tanh %211 : vector<8x32xf32>
    %cst_146 = arith.constant 1.000000e+00 : f32
    %213 = vector.broadcast %cst_146 : f32 to vector<8x32xf32>
    %214 = arith.addf %213, %212 : vector<8x32xf32>
    %215 = arith.mulf %209, %214 : vector<8x32xf32>
    %c2_147 = arith.constant 2 : index
    %c1_148 = arith.constant 1 : index
    %c0_149 = arith.constant 0 : index
    %c0_150 = arith.constant 0 : index
    %216 = vector.load %arg4[%c2_147, %c1_148, %c0_149, %c0_150] : memref<4x2x32x32xf32, #tpu.memory_space<vmem>>, vector<1x1x32x32xf32>
    %217 = vector.shape_cast %216 : vector<1x1x32x32xf32> to vector<32x32xf32>
    %cst_151 = arith.constant dense<0.000000e+00> : vector<8x32xf32>
    %218 = tpu.matmul %215, %217, %cst_151 {dimension_numbers = #tpu.dot_dimension_numbers<[1], [0], [0], [1], [0, 0, 1, 1], [], []>} : vector<8x32xf32>, vector<32x32xf32>, vector<8x32xf32> -> vector<8x32xf32>
    %c2_152 = arith.constant 2 : index
    %c1_153 = arith.constant 1 : index
    %c0_154 = arith.constant 0 : index
    %c0_155 = arith.constant 0 : index
    %219 = vector.load %arg5[%c2_152, %c1_153, %c0_154, %c0_155] : memref<4x2x1x32xf32, #tpu.memory_space<vmem>>, vector<1x1x1x32xf32>
    %220 = vector.shape_cast %219 : vector<1x1x1x32xf32> to vector<1x32xf32>
    %221 = vector.broadcast %220 : vector<1x32xf32> to vector<8x32xf32>
    %222 = arith.addf %218, %221 : vector<8x32xf32>
    %cst_156 = arith.constant 5.000000e-01 : f32
    %223 = vector.broadcast %cst_156 : f32 to vector<8x32xf32>
    %224 = arith.mulf %223, %222 : vector<8x32xf32>
    %cst_157 = arith.constant 5.000000e-01 : f32
    %225 = vector.broadcast %cst_157 : f32 to vector<8x32xf32>
    %226 = arith.mulf %225, %222 : vector<8x32xf32>
    %227 = math.tanh %226 : vector<8x32xf32>
    %cst_158 = arith.constant 1.000000e+00 : f32
    %228 = vector.broadcast %cst_158 : f32 to vector<8x32xf32>
    %229 = arith.addf %228, %227 : vector<8x32xf32>
    %230 = arith.mulf %224, %229 : vector<8x32xf32>
    %c2_159 = arith.constant 2 : index
    %c0_160 = arith.constant 0 : index
    %c0_161 = arith.constant 0 : index
    %231 = vector.load %arg6[%c2_159, %c0_160, %c0_161] : memref<4x32x9xf32, #tpu.memory_space<vmem>>, vector<1x32x9xf32>
    %232 = vector.shape_cast %231 : vector<1x32x9xf32> to vector<32x9xf32>
    %cst_162 = arith.constant dense<0.000000e+00> : vector<8x9xf32>
    %233 = tpu.matmul %230, %232, %cst_162 {dimension_numbers = #tpu.dot_dimension_numbers<[1], [0], [0], [1], [0, 0, 1, 1], [], []>} : vector<8x32xf32>, vector<32x9xf32>, vector<8x9xf32> -> vector<8x9xf32>
    %c2_163 = arith.constant 2 : index
    %c0_164 = arith.constant 0 : index
    %c0_165 = arith.constant 0 : index
    %234 = vector.load %arg7[%c2_163, %c0_164, %c0_165] : memref<4x1x9xf32, #tpu.memory_space<vmem>>, vector<1x1x9xf32>
    %235 = vector.shape_cast %234 : vector<1x1x9xf32> to vector<1x9xf32>
    %236 = vector.broadcast %235 : vector<1x9xf32> to vector<8x9xf32>
    %237 = arith.addf %233, %236 : vector<8x9xf32>
    %c2_166 = arith.constant 2 : index
    %c0_167 = arith.constant 0 : index
    %c0_168 = arith.constant 0 : index
    %238 = vector.load %arg8[%c2_166, %c0_167, %c0_168] : memref<4x32x9xf32, #tpu.memory_space<vmem>>, vector<1x32x9xf32>
    %239 = vector.shape_cast %238 : vector<1x32x9xf32> to vector<32x9xf32>
    %cst_169 = arith.constant dense<0.000000e+00> : vector<8x9xf32>
    %240 = tpu.matmul %230, %239, %cst_169 {dimension_numbers = #tpu.dot_dimension_numbers<[1], [0], [0], [1], [0, 0, 1, 1], [], []>} : vector<8x32xf32>, vector<32x9xf32>, vector<8x9xf32> -> vector<8x9xf32>
    %c2_170 = arith.constant 2 : index
    %c0_171 = arith.constant 0 : index
    %c0_172 = arith.constant 0 : index
    %241 = vector.load %arg9[%c2_170, %c0_171, %c0_172] : memref<4x1x9xf32, #tpu.memory_space<vmem>>, vector<1x1x9xf32>
    %242 = vector.shape_cast %241 : vector<1x1x9xf32> to vector<1x9xf32>
    %243 = vector.broadcast %242 : vector<1x9xf32> to vector<8x9xf32>
    %244 = arith.addf %240, %243 : vector<8x9xf32>
    %245 = vector.broadcast %0 : vector<1x9xf32> to vector<8x9xf32>
    %246 = arith.subf %245, %244 : vector<8x9xf32>
    %cst_173 = arith.constant 0.000000e+00 : f32
    %247 = vector.broadcast %cst_173 : f32 to vector<8x9xf32>
    %248 = arith.maximumf %246, %247 : vector<8x9xf32>
    %249 = math.absf %246 : vector<8x9xf32>
    %cst_174 = arith.constant 0.000000e+00 : f32
    %250 = vector.broadcast %cst_174 : f32 to vector<8x9xf32>
    %251 = arith.subf %250, %249 : vector<8x9xf32>
    %252 = math.exp %251 : vector<8x9xf32>
    %253 = math.log1p %252 : vector<8x9xf32>
    %254 = arith.addf %248, %253 : vector<8x9xf32>
    %255 = vector.broadcast %0 : vector<1x9xf32> to vector<8x9xf32>
    %256 = arith.subf %255, %254 : vector<8x9xf32>
    %257 = vector.broadcast %1 : vector<1x9xf32> to vector<8x9xf32>
    %258 = arith.subf %256, %257 : vector<8x9xf32>
    %cst_175 = arith.constant 0.000000e+00 : f32
    %259 = vector.broadcast %cst_175 : f32 to vector<8x9xf32>
    %260 = arith.maximumf %258, %259 : vector<8x9xf32>
    %261 = math.absf %258 : vector<8x9xf32>
    %cst_176 = arith.constant 0.000000e+00 : f32
    %262 = vector.broadcast %cst_176 : f32 to vector<8x9xf32>
    %263 = arith.subf %262, %261 : vector<8x9xf32>
    %264 = math.exp %263 : vector<8x9xf32>
    %265 = math.log1p %264 : vector<8x9xf32>
    %266 = arith.addf %260, %265 : vector<8x9xf32>
    %267 = vector.broadcast %1 : vector<1x9xf32> to vector<8x9xf32>
    %268 = arith.addf %267, %266 : vector<8x9xf32>
    %c2_177 = arith.constant 2 : index
    %c0_178 = arith.constant 0 : index
    %c0_179 = arith.constant 0 : index
    %269 = vector.load %arg12[%c2_177, %c0_178, %c0_179] : memref<4x8x9xf32, #tpu.memory_space<vmem>>, vector<1x8x9xf32>
    %270 = vector.shape_cast %269 : vector<1x8x9xf32> to vector<8x9xf32>
    %271 = vector.shape_cast %237 : vector<8x9xf32> to vector<1x8x9xf32>
    tpu.vector_store %arg12[%c2_177, %c0_178, %c0_179], %271 {strides = array<i32>} : memref<4x8x9xf32, #tpu.memory_space<vmem>>, vector<1x8x9xf32>,
    %c2_180 = arith.constant 2 : index
    %c0_181 = arith.constant 0 : index
    %c0_182 = arith.constant 0 : index
    %272 = vector.load %arg13[%c2_180, %c0_181, %c0_182] : memref<4x8x9xf32, #tpu.memory_space<vmem>>, vector<1x8x9xf32>
    %273 = vector.shape_cast %272 : vector<1x8x9xf32> to vector<8x9xf32>
    %274 = vector.shape_cast %268 : vector<8x9xf32> to vector<1x8x9xf32>
    tpu.vector_store %arg13[%c2_180, %c0_181, %c0_182], %274 {strides = array<i32>} : memref<4x8x9xf32, #tpu.memory_space<vmem>>, vector<1x8x9xf32>,
    %c3 = arith.constant 3 : index
    %c0_183 = arith.constant 0 : index
    %c0_184 = arith.constant 0 : index
    %275 = vector.load %arg1[%c3, %c0_183, %c0_184] : memref<4x8x10xf32, #tpu.memory_space<vmem>>, vector<1x8x10xf32>
    %276 = vector.shape_cast %275 : vector<1x8x10xf32> to vector<8x10xf32>
    %c3_185 = arith.constant 3 : index
    %c0_186 = arith.constant 0 : index
    %c0_187 = arith.constant 0 : index
    %277 = vector.load %arg2[%c3_185, %c0_186, %c0_187] : memref<4x10x32xf32, #tpu.memory_space<vmem>>, vector<1x10x32xf32>
    %278 = vector.shape_cast %277 : vector<1x10x32xf32> to vector<10x32xf32>
    %cst_188 = arith.constant dense<0.000000e+00> : vector<8x32xf32>
    %279 = tpu.matmul %276, %278, %cst_188 {dimension_numbers = #tpu.dot_dimension_numbers<[1], [0], [0], [1], [0, 0, 1, 1], [], []>} : vector<8x10xf32>, vector<10x32xf32>, vector<8x32xf32> -> vector<8x32xf32>
    %c3_189 = arith.constant 3 : index
    %c0_190 = arith.constant 0 : index
    %c0_191 = arith.constant 0 : index
    %280 = vector.load %arg3[%c3_189, %c0_190, %c0_191] : memref<4x1x32xf32, #tpu.memory_space<vmem>>, vector<1x1x32xf32>
    %281 = vector.shape_cast %280 : vector<1x1x32xf32> to vector<1x32xf32>
    %282 = vector.broadcast %281 : vector<1x32xf32> to vector<8x32xf32>
    %283 = arith.addf %279, %282 : vector<8x32xf32>
    %cst_192 = arith.constant 5.000000e-01 : f32
    %284 = vector.broadcast %cst_192 : f32 to vector<8x32xf32>
    %285 = arith.mulf %284, %283 : vector<8x32xf32>
    %cst_193 = arith.constant 5.000000e-01 : f32
    %286 = vector.broadcast %cst_193 : f32 to vector<8x32xf32>
    %287 = arith.mulf %286, %283 : vector<8x32xf32>
    %288 = math.tanh %287 : vector<8x32xf32>
    %cst_194 = arith.constant 1.000000e+00 : f32
    %289 = vector.broadcast %cst_194 : f32 to vector<8x32xf32>
    %290 = arith.addf %289, %288 : vector<8x32xf32>
    %291 = arith.mulf %285, %290 : vector<8x32xf32>
    %c3_195 = arith.constant 3 : index
    %c0_196 = arith.constant 0 : index
    %c0_197 = arith.constant 0 : index
    %c0_198 = arith.constant 0 : index
    %292 = vector.load %arg4[%c3_195, %c0_196, %c0_197, %c0_198] : memref<4x2x32x32xf32, #tpu.memory_space<vmem>>, vector<1x1x32x32xf32>
    %293 = vector.shape_cast %292 : vector<1x1x32x32xf32> to vector<32x32xf32>
    %cst_199 = arith.constant dense<0.000000e+00> : vector<8x32xf32>
    %294 = tpu.matmul %291, %293, %cst_199 {dimension_numbers = #tpu.dot_dimension_numbers<[1], [0], [0], [1], [0, 0, 1, 1], [], []>} : vector<8x32xf32>, vector<32x32xf32>, vector<8x32xf32> -> vector<8x32xf32>
    %c3_200 = arith.constant 3 : index
    %c0_201 = arith.constant 0 : index
    %c0_202 = arith.constant 0 : index
    %c0_203 = arith.constant 0 : index
    %295 = vector.load %arg5[%c3_200, %c0_201, %c0_202, %c0_203] : memref<4x2x1x32xf32, #tpu.memory_space<vmem>>, vector<1x1x1x32xf32>
    %296 = vector.shape_cast %295 : vector<1x1x1x32xf32> to vector<1x32xf32>
    %297 = vector.broadcast %296 : vector<1x32xf32> to vector<8x32xf32>
    %298 = arith.addf %294, %297 : vector<8x32xf32>
    %cst_204 = arith.constant 5.000000e-01 : f32
    %299 = vector.broadcast %cst_204 : f32 to vector<8x32xf32>
    %300 = arith.mulf %299, %298 : vector<8x32xf32>
    %cst_205 = arith.constant 5.000000e-01 : f32
    %301 = vector.broadcast %cst_205 : f32 to vector<8x32xf32>
    %302 = arith.mulf %301, %298 : vector<8x32xf32>
    %303 = math.tanh %302 : vector<8x32xf32>
    %cst_206 = arith.constant 1.000000e+00 : f32
    %304 = vector.broadcast %cst_206 : f32 to vector<8x32xf32>
    %305 = arith.addf %304, %303 : vector<8x32xf32>
    %306 = arith.mulf %300, %305 : vector<8x32xf32>
    %c3_207 = arith.constant 3 : index
    %c1_208 = arith.constant 1 : index
    %c0_209 = arith.constant 0 : index
    %c0_210 = arith.constant 0 : index
    %307 = vector.load %arg4[%c3_207, %c1_208, %c0_209, %c0_210] : memref<4x2x32x32xf32, #tpu.memory_space<vmem>>, vector<1x1x32x32xf32>
    %308 = vector.shape_cast %307 : vector<1x1x32x32xf32> to vector<32x32xf32>
    %cst_211 = arith.constant dense<0.000000e+00> : vector<8x32xf32>
    %309 = tpu.matmul %306, %308, %cst_211 {dimension_numbers = #tpu.dot_dimension_numbers<[1], [0], [0], [1], [0, 0, 1, 1], [], []>} : vector<8x32xf32>, vector<32x32xf32>, vector<8x32xf32> -> vector<8x32xf32>
    %c3_212 = arith.constant 3 : index
    %c1_213 = arith.constant 1 : index
    %c0_214 = arith.constant 0 : index
    %c0_215 = arith.constant 0 : index
    %310 = vector.load %arg5[%c3_212, %c1_213, %c0_214, %c0_215] : memref<4x2x1x32xf32, #tpu.memory_space<vmem>>, vector<1x1x1x32xf32>
    %311 = vector.shape_cast %310 : vector<1x1x1x32xf32> to vector<1x32xf32>
    %312 = vector.broadcast %311 : vector<1x32xf32> to vector<8x32xf32>
    %313 = arith.addf %309, %312 : vector<8x32xf32>
    %cst_216 = arith.constant 5.000000e-01 : f32
    %314 = vector.broadcast %cst_216 : f32 to vector<8x32xf32>
    %315 = arith.mulf %314, %313 : vector<8x32xf32>
    %cst_217 = arith.constant 5.000000e-01 : f32
    %316 = vector.broadcast %cst_217 : f32 to vector<8x32xf32>
    %317 = arith.mulf %316, %313 : vector<8x32xf32>
    %318 = math.tanh %317 : vector<8x32xf32>
    %cst_218 = arith.constant 1.000000e+00 : f32
    %319 = vector.broadcast %cst_218 : f32 to vector<8x32xf32>
    %320 = arith.addf %319, %318 : vector<8x32xf32>
    %321 = arith.mulf %315, %320 : vector<8x32xf32>
    %c3_219 = arith.constant 3 : index
    %c0_220 = arith.constant 0 : index
    %c0_221 = arith.constant 0 : index
    %322 = vector.load %arg6[%c3_219, %c0_220, %c0_221] : memref<4x32x9xf32, #tpu.memory_space<vmem>>, vector<1x32x9xf32>
    %323 = vector.shape_cast %322 : vector<1x32x9xf32> to vector<32x9xf32>
    %cst_222 = arith.constant dense<0.000000e+00> : vector<8x9xf32>
    %324 = tpu.matmul %321, %323, %cst_222 {dimension_numbers = #tpu.dot_dimension_numbers<[1], [0], [0], [1], [0, 0, 1, 1], [], []>} : vector<8x32xf32>, vector<32x9xf32>, vector<8x9xf32> -> vector<8x9xf32>
    %c3_223 = arith.constant 3 : index
    %c0_224 = arith.constant 0 : index
    %c0_225 = arith.constant 0 : index
    %325 = vector.load %arg7[%c3_223, %c0_224, %c0_225] : memref<4x1x9xf32, #tpu.memory_space<vmem>>, vector<1x1x9xf32>
    %326 = vector.shape_cast %325 : vector<1x1x9xf32> to vector<1x9xf32>
    %327 = vector.broadcast %326 : vector<1x9xf32> to vector<8x9xf32>
    %328 = arith.addf %324, %327 : vector<8x9xf32>
    %c3_226 = arith.constant 3 : index
    %c0_227 = arith.constant 0 : index
    %c0_228 = arith.constant 0 : index
    %329 = vector.load %arg8[%c3_226, %c0_227, %c0_228] : memref<4x32x9xf32, #tpu.memory_space<vmem>>, vector<1x32x9xf32>
    %330 = vector.shape_cast %329 : vector<1x32x9xf32> to vector<32x9xf32>
    %cst_229 = arith.constant dense<0.000000e+00> : vector<8x9xf32>
    %331 = tpu.matmul %321, %330, %cst_229 {dimension_numbers = #tpu.dot_dimension_numbers<[1], [0], [0], [1], [0, 0, 1, 1], [], []>} : vector<8x32xf32>, vector<32x9xf32>, vector<8x9xf32> -> vector<8x9xf32>
    %c3_230 = arith.constant 3 : index
    %c0_231 = arith.constant 0 : index
    %c0_232 = arith.constant 0 : index
    %332 = vector.load %arg9[%c3_230, %c0_231, %c0_232] : memref<4x1x9xf32, #tpu.memory_space<vmem>>, vector<1x1x9xf32>
    %333 = vector.shape_cast %332 : vector<1x1x9xf32> to vector<1x9xf32>
    %334 = vector.broadcast %333 : vector<1x9xf32> to vector<8x9xf32>
    %335 = arith.addf %331, %334 : vector<8x9xf32>
    %336 = vector.broadcast %0 : vector<1x9xf32> to vector<8x9xf32>
    %337 = arith.subf %336, %335 : vector<8x9xf32>
    %cst_233 = arith.constant 0.000000e+00 : f32
    %338 = vector.broadcast %cst_233 : f32 to vector<8x9xf32>
    %339 = arith.maximumf %337, %338 : vector<8x9xf32>
    %340 = math.absf %337 : vector<8x9xf32>
    %cst_234 = arith.constant 0.000000e+00 : f32
    %341 = vector.broadcast %cst_234 : f32 to vector<8x9xf32>
    %342 = arith.subf %341, %340 : vector<8x9xf32>
    %343 = math.exp %342 : vector<8x9xf32>
    %344 = math.log1p %343 : vector<8x9xf32>
    %345 = arith.addf %339, %344 : vector<8x9xf32>
    %346 = vector.broadcast %0 : vector<1x9xf32> to vector<8x9xf32>
    %347 = arith.subf %346, %345 : vector<8x9xf32>
    %348 = vector.broadcast %1 : vector<1x9xf32> to vector<8x9xf32>
    %349 = arith.subf %347, %348 : vector<8x9xf32>
    %cst_235 = arith.constant 0.000000e+00 : f32
    %350 = vector.broadcast %cst_235 : f32 to vector<8x9xf32>
    %351 = arith.maximumf %349, %350 : vector<8x9xf32>
    %352 = math.absf %349 : vector<8x9xf32>
    %cst_236 = arith.constant 0.000000e+00 : f32
    %353 = vector.broadcast %cst_236 : f32 to vector<8x9xf32>
    %354 = arith.subf %353, %352 : vector<8x9xf32>
    %355 = math.exp %354 : vector<8x9xf32>
    %356 = math.log1p %355 : vector<8x9xf32>
    %357 = arith.addf %351, %356 : vector<8x9xf32>
    %358 = vector.broadcast %1 : vector<1x9xf32> to vector<8x9xf32>
    %359 = arith.addf %358, %357 : vector<8x9xf32>
    %c3_237 = arith.constant 3 : index
    %c0_238 = arith.constant 0 : index
    %c0_239 = arith.constant 0 : index
    %360 = vector.load %arg12[%c3_237, %c0_238, %c0_239] : memref<4x8x9xf32, #tpu.memory_space<vmem>>, vector<1x8x9xf32>
    %361 = vector.shape_cast %360 : vector<1x8x9xf32> to vector<8x9xf32>
    %362 = vector.shape_cast %328 : vector<8x9xf32> to vector<1x8x9xf32>
    tpu.vector_store %arg12[%c3_237, %c0_238, %c0_239], %362 {strides = array<i32>} : memref<4x8x9xf32, #tpu.memory_space<vmem>>, vector<1x8x9xf32>,
    %c3_240 = arith.constant 3 : index
    %c0_241 = arith.constant 0 : index
    %c0_242 = arith.constant 0 : index
    %363 = vector.load %arg13[%c3_240, %c0_241, %c0_242] : memref<4x8x9xf32, #tpu.memory_space<vmem>>, vector<1x8x9xf32>
    %364 = vector.shape_cast %363 : vector<1x8x9xf32> to vector<8x9xf32>
    %365 = vector.shape_cast %359 : vector<8x9xf32> to vector<1x8x9xf32>
    tpu.vector_store %arg13[%c3_240, %c0_241, %c0_242], %365 {strides = array<i32>} : memref<4x8x9xf32, #tpu.memory_space<vmem>>, vector<1x8x9xf32>,
    return
  }
  func.func @transform_0(%arg0: i32) -> (i32, i32, i32) {
    %c0_i32 = arith.constant 0 : i32
    %c0_i32_0 = arith.constant 0 : i32
    %c0_i32_1 = arith.constant 0 : i32
    return %c0_i32, %arg0, %c0_i32_0 : i32, i32, i32
  }
  func.func @transform_1(%arg0: i32) -> (i32, i32, i32) {
    %c0_i32 = arith.constant 0 : i32
    %c0_i32_0 = arith.constant 0 : i32
    %c0_i32_1 = arith.constant 0 : i32
    %c0_i32_2 = arith.constant 0 : i32
    return %c0_i32, %c0_i32_0, %c0_i32_1 : i32, i32, i32
  }
  func.func @transform_2(%arg0: i32) -> (i32, i32, i32) {
    %c0_i32 = arith.constant 0 : i32
    %c0_i32_0 = arith.constant 0 : i32
    %c0_i32_1 = arith.constant 0 : i32
    %c0_i32_2 = arith.constant 0 : i32
    return %c0_i32, %c0_i32_0, %c0_i32_1 : i32, i32, i32
  }
  func.func @transform_3(%arg0: i32) -> (i32, i32, i32, i32) {
    %c0_i32 = arith.constant 0 : i32
    %c0_i32_0 = arith.constant 0 : i32
    %c0_i32_1 = arith.constant 0 : i32
    %c0_i32_2 = arith.constant 0 : i32
    %c0_i32_3 = arith.constant 0 : i32
    return %c0_i32, %c0_i32_0, %c0_i32_1, %c0_i32_2 : i32, i32, i32, i32
  }
  func.func @transform_4(%arg0: i32) -> (i32, i32, i32, i32) {
    %c0_i32 = arith.constant 0 : i32
    %c0_i32_0 = arith.constant 0 : i32
    %c0_i32_1 = arith.constant 0 : i32
    %c0_i32_2 = arith.constant 0 : i32
    %c0_i32_3 = arith.constant 0 : i32
    return %c0_i32, %c0_i32_0, %c0_i32_1, %c0_i32_2 : i32, i32, i32, i32
  }
  func.func @transform_5(%arg0: i32) -> (i32, i32, i32) {
    %c0_i32 = arith.constant 0 : i32
    %c0_i32_0 = arith.constant 0 : i32
    %c0_i32_1 = arith.constant 0 : i32
    %c0_i32_2 = arith.constant 0 : i32
    return %c0_i32, %c0_i32_0, %c0_i32_1 : i32, i32, i32
  }
  func.func @transform_6(%arg0: i32) -> (i32, i32, i32) {
    %c0_i32 = arith.constant 0 : i32
    %c0_i32_0 = arith.constant 0 : i32
    %c0_i32_1 = arith.constant 0 : i32
    %c0_i32_2 = arith.constant 0 : i32
    return %c0_i32, %c0_i32_0, %c0_i32_1 : i32, i32, i32
  }
  func.func @transform_7(%arg0: i32) -> (i32, i32, i32) {
    %c0_i32 = arith.constant 0 : i32
    %c0_i32_0 = arith.constant 0 : i32
    %c0_i32_1 = arith.constant 0 : i32
    %c0_i32_2 = arith.constant 0 : i32
    return %c0_i32, %c0_i32_0, %c0_i32_1 : i32, i32, i32
  }
  func.func @transform_8(%arg0: i32) -> (i32, i32, i32) {
    %c0_i32 = arith.constant 0 : i32
    %c0_i32_0 = arith.constant 0 : i32
    %c0_i32_1 = arith.constant 0 : i32
    %c0_i32_2 = arith.constant 0 : i32
    return %c0_i32, %c0_i32_0, %c0_i32_1 : i32, i32, i32
  }
  func.func @transform_9(%arg0: i32) -> (i32, i32) {
    %c0_i32 = arith.constant 0 : i32
    %c0_i32_0 = arith.constant 0 : i32
    %c0_i32_1 = arith.constant 0 : i32
    return %c0_i32, %c0_i32_0 : i32, i32
  }
  func.func @transform_10(%arg0: i32) -> (i32, i32) {
    %c0_i32 = arith.constant 0 : i32
    %c0_i32_0 = arith.constant 0 : i32
    %c0_i32_1 = arith.constant 0 : i32
    return %c0_i32, %c0_i32_0 : i32, i32
  }
  func.func @transform_11(%arg0: i32) -> (i32, i32, i32) {
    %c0_i32 = arith.constant 0 : i32
    %c0_i32_0 = arith.constant 0 : i32
    %c0_i32_1 = arith.constant 0 : i32
    return %c0_i32, %arg0, %c0_i32_0 : i32, i32, i32
  }
  func.func @transform_12(%arg0: i32) -> (i32, i32, i32) {
    %c0_i32 = arith.constant 0 : i32
    %c0_i32_0 = arith.constant 0 : i32
    %c0_i32_1 = arith.constant 0 : i32
    return %c0_i32, %arg0, %c0_i32_0 : i32, i32, i32
  }
}

module attributes {stable_mosaic.version = 11 : i64} {
  func.func @_dynamics_kernel(%arg0: i32, %arg1: memref<4x8x10xf32, #tpu.memory_space<vmem>>, %arg2: memref<4x10x32xf32, #tpu.memory_space<vmem>>, %arg3: memref<4x1x32xf32, #tpu.memory_space<vmem>>, %arg4: memref<4x2x32x32xf32, #tpu.memory_space<vmem>>, %arg5: memref<4x2x1x32xf32, #tpu.memory_space<vmem>>, %arg6: memref<4x32x9xf32, #tpu.memory_space<vmem>>, %arg7: memref<4x1x9xf32, #tpu.memory_space<vmem>>, %arg8: memref<4x32x9xf32, #tpu.memory_space<vmem>>, %arg9: memref<4x1x9xf32, #tpu.memory_space<vmem>>, %arg10: memref<1x9xf32, #tpu.memory_space<vmem>>, %arg11: memref<1x9xf32, #tpu.memory_space<vmem>>, %arg12: memref<4x8x9xf32, #tpu.memory_space<vmem>>, %arg13: memref<4x8x9xf32, #tpu.memory_space<vmem>>) attributes {dimension_semantics = [#tpu.dimension_semantics<parallel>], iteration_bounds = array<i64: 1>, scalar_prefetch = 0 : i64, scratch_operands = 0 : i64, tpu.core_type = #tpu.core_type<tc>, window_params = [{transform_indices = @transform_0, window_bounds = array<i64: 4, 8, 10>}, {pipeline_mode = #tpu.pipeline_mode<synchronous>, transform_indices = @transform_1, window_bounds = array<i64: 4, 10, 32>}, {pipeline_mode = #tpu.pipeline_mode<synchronous>, transform_indices = @transform_2, window_bounds = array<i64: 4, 1, 32>}, {pipeline_mode = #tpu.pipeline_mode<synchronous>, transform_indices = @transform_3, window_bounds = array<i64: 4, 2, 32, 32>}, {pipeline_mode = #tpu.pipeline_mode<synchronous>, transform_indices = @transform_4, window_bounds = array<i64: 4, 2, 1, 32>}, {pipeline_mode = #tpu.pipeline_mode<synchronous>, transform_indices = @transform_5, window_bounds = array<i64: 4, 32, 9>}, {pipeline_mode = #tpu.pipeline_mode<synchronous>, transform_indices = @transform_6, window_bounds = array<i64: 4, 1, 9>}, {pipeline_mode = #tpu.pipeline_mode<synchronous>, transform_indices = @transform_7, window_bounds = array<i64: 4, 32, 9>}, {pipeline_mode = #tpu.pipeline_mode<synchronous>, transform_indices = @transform_8, window_bounds = array<i64: 4, 1, 9>}, {pipeline_mode = #tpu.pipeline_mode<synchronous>, transform_indices = @transform_9, window_bounds = array<i64: 1, 9>}, {pipeline_mode = #tpu.pipeline_mode<synchronous>, transform_indices = @transform_10, window_bounds = array<i64: 1, 9>}, {transform_indices = @transform_11, window_bounds = array<i64: 4, 8, 9>}, {transform_indices = @transform_12, window_bounds = array<i64: 4, 8, 9>}]} {
    %c0 = arith.constant 0 : index
    %c0_0 = arith.constant 0 : index
    %0 = vector.load %arg11[%c0, %c0_0] : memref<1x9xf32, #tpu.memory_space<vmem>>, vector<1x9xf32>
    %c0_1 = arith.constant 0 : index
    %c0_2 = arith.constant 0 : index
    %1 = vector.load %arg10[%c0_1, %c0_2] : memref<1x9xf32, #tpu.memory_space<vmem>>, vector<1x9xf32>
    %c0_3 = arith.constant 0 : index
    %c0_4 = arith.constant 0 : index
    %c0_5 = arith.constant 0 : index
    %2 = vector.load %arg1[%c0_3, %c0_4, %c0_5] : memref<4x8x10xf32, #tpu.memory_space<vmem>>, vector<1x8x10xf32>
    %3 = vector.shape_cast %2 : vector<1x8x10xf32> to vector<8x10xf32>
    %c0_6 = arith.constant 0 : index
    %c0_7 = arith.constant 0 : index
    %c0_8 = arith.constant 0 : index
    %4 = vector.load %arg2[%c0_6, %c0_7, %c0_8] : memref<4x10x32xf32, #tpu.memory_space<vmem>>, vector<1x10x32xf32>
    %5 = vector.shape_cast %4 : vector<1x10x32xf32> to vector<10x32xf32>
    %cst = arith.constant dense<0.000000e+00> : vector<8x32xf32>
    %6 = tpu.matmul %3, %5, %cst {dimension_numbers = #tpu.dot_dimension_numbers<[1], [0], [0], [1], [0, 0, 1, 1], [], []>} : vector<8x10xf32>, vector<10x32xf32>, vector<8x32xf32> -> vector<8x32xf32>
    %c0_9 = arith.constant 0 : index
    %c0_10 = arith.constant 0 : index
    %c0_11 = arith.constant 0 : index
    %7 = vector.load %arg3[%c0_9, %c0_10, %c0_11] : memref<4x1x32xf32, #tpu.memory_space<vmem>>, vector<1x1x32xf32>
    %8 = vector.shape_cast %7 : vector<1x1x32xf32> to vector<1x32xf32>
    %9 = vector.broadcast %8 : vector<1x32xf32> to vector<8x32xf32>
    %10 = arith.addf %6, %9 : vector<8x32xf32>
    %cst_12 = arith.constant 5.000000e-01 : f32
    %11 = vector.broadcast %cst_12 : f32 to vector<8x32xf32>
    %12 = arith.mulf %11, %10 : vector<8x32xf32>
    %cst_13 = arith.constant 5.000000e-01 : f32
    %13 = vector.broadcast %cst_13 : f32 to vector<8x32xf32>
    %14 = arith.mulf %13, %10 : vector<8x32xf32>
    %15 = math.tanh %14 : vector<8x32xf32>
    %cst_14 = arith.constant 1.000000e+00 : f32
    %16 = vector.broadcast %cst_14 : f32 to vector<8x32xf32>
    %17 = arith.addf %16, %15 : vector<8x32xf32>
    %18 = arith.mulf %12, %17 : vector<8x32xf32>
    %c0_15 = arith.constant 0 : index
    %c0_16 = arith.constant 0 : index
    %c0_17 = arith.constant 0 : index
    %c0_18 = arith.constant 0 : index
    %19 = vector.load %arg4[%c0_15, %c0_16, %c0_17, %c0_18] : memref<4x2x32x32xf32, #tpu.memory_space<vmem>>, vector<1x1x32x32xf32>
    %20 = vector.shape_cast %19 : vector<1x1x32x32xf32> to vector<32x32xf32>
    %cst_19 = arith.constant dense<0.000000e+00> : vector<8x32xf32>
    %21 = tpu.matmul %18, %20, %cst_19 {dimension_numbers = #tpu.dot_dimension_numbers<[1], [0], [0], [1], [0, 0, 1, 1], [], []>} : vector<8x32xf32>, vector<32x32xf32>, vector<8x32xf32> -> vector<8x32xf32>
    %c0_20 = arith.constant 0 : index
    %c0_21 = arith.constant 0 : index
    %c0_22 = arith.constant 0 : index
    %c0_23 = arith.constant 0 : index
    %22 = vector.load %arg5[%c0_20, %c0_21, %c0_22, %c0_23] : memref<4x2x1x32xf32, #tpu.memory_space<vmem>>, vector<1x1x1x32xf32>
    %23 = vector.shape_cast %22 : vector<1x1x1x32xf32> to vector<1x32xf32>
    %24 = vector.broadcast %23 : vector<1x32xf32> to vector<8x32xf32>
    %25 = arith.addf %21, %24 : vector<8x32xf32>
    %cst_24 = arith.constant 5.000000e-01 : f32
    %26 = vector.broadcast %cst_24 : f32 to vector<8x32xf32>
    %27 = arith.mulf %26, %25 : vector<8x32xf32>
    %cst_25 = arith.constant 5.000000e-01 : f32
    %28 = vector.broadcast %cst_25 : f32 to vector<8x32xf32>
    %29 = arith.mulf %28, %25 : vector<8x32xf32>
    %30 = math.tanh %29 : vector<8x32xf32>
    %cst_26 = arith.constant 1.000000e+00 : f32
    %31 = vector.broadcast %cst_26 : f32 to vector<8x32xf32>
    %32 = arith.addf %31, %30 : vector<8x32xf32>
    %33 = arith.mulf %27, %32 : vector<8x32xf32>
    %c0_27 = arith.constant 0 : index
    %c1 = arith.constant 1 : index
    %c0_28 = arith.constant 0 : index
    %c0_29 = arith.constant 0 : index
    %34 = vector.load %arg4[%c0_27, %c1, %c0_28, %c0_29] : memref<4x2x32x32xf32, #tpu.memory_space<vmem>>, vector<1x1x32x32xf32>
    %35 = vector.shape_cast %34 : vector<1x1x32x32xf32> to vector<32x32xf32>
    %cst_30 = arith.constant dense<0.000000e+00> : vector<8x32xf32>
    %36 = tpu.matmul %33, %35, %cst_30 {dimension_numbers = #tpu.dot_dimension_numbers<[1], [0], [0], [1], [0, 0, 1, 1], [], []>} : vector<8x32xf32>, vector<32x32xf32>, vector<8x32xf32> -> vector<8x32xf32>
    %c0_31 = arith.constant 0 : index
    %c1_32 = arith.constant 1 : index
    %c0_33 = arith.constant 0 : index
    %c0_34 = arith.constant 0 : index
    %37 = vector.load %arg5[%c0_31, %c1_32, %c0_33, %c0_34] : memref<4x2x1x32xf32, #tpu.memory_space<vmem>>, vector<1x1x1x32xf32>
    %38 = vector.shape_cast %37 : vector<1x1x1x32xf32> to vector<1x32xf32>
    %39 = vector.broadcast %38 : vector<1x32xf32> to vector<8x32xf32>
    %40 = arith.addf %36, %39 : vector<8x32xf32>
    %cst_35 = arith.constant 5.000000e-01 : f32
    %41 = vector.broadcast %cst_35 : f32 to vector<8x32xf32>
    %42 = arith.mulf %41, %40 : vector<8x32xf32>
    %cst_36 = arith.constant 5.000000e-01 : f32
    %43 = vector.broadcast %cst_36 : f32 to vector<8x32xf32>
    %44 = arith.mulf %43, %40 : vector<8x32xf32>
    %45 = math.tanh %44 : vector<8x32xf32>
    %cst_37 = arith.constant 1.000000e+00 : f32
    %46 = vector.broadcast %cst_37 : f32 to vector<8x32xf32>
    %47 = arith.addf %46, %45 : vector<8x32xf32>
    %48 = arith.mulf %42, %47 : vector<8x32xf32>
    %c0_38 = arith.constant 0 : index
    %c0_39 = arith.constant 0 : index
    %c0_40 = arith.constant 0 : index
    %49 = vector.load %arg6[%c0_38, %c0_39, %c0_40] : memref<4x32x9xf32, #tpu.memory_space<vmem>>, vector<1x32x9xf32>
    %50 = vector.shape_cast %49 : vector<1x32x9xf32> to vector<32x9xf32>
    %cst_41 = arith.constant dense<0.000000e+00> : vector<8x9xf32>
    %51 = tpu.matmul %48, %50, %cst_41 {dimension_numbers = #tpu.dot_dimension_numbers<[1], [0], [0], [1], [0, 0, 1, 1], [], []>} : vector<8x32xf32>, vector<32x9xf32>, vector<8x9xf32> -> vector<8x9xf32>
    %c0_42 = arith.constant 0 : index
    %c0_43 = arith.constant 0 : index
    %c0_44 = arith.constant 0 : index
    %52 = vector.load %arg7[%c0_42, %c0_43, %c0_44] : memref<4x1x9xf32, #tpu.memory_space<vmem>>, vector<1x1x9xf32>
    %53 = vector.shape_cast %52 : vector<1x1x9xf32> to vector<1x9xf32>
    %54 = vector.broadcast %53 : vector<1x9xf32> to vector<8x9xf32>
    %55 = arith.addf %51, %54 : vector<8x9xf32>
    %c0_45 = arith.constant 0 : index
    %c0_46 = arith.constant 0 : index
    %c0_47 = arith.constant 0 : index
    %56 = vector.load %arg8[%c0_45, %c0_46, %c0_47] : memref<4x32x9xf32, #tpu.memory_space<vmem>>, vector<1x32x9xf32>
    %57 = vector.shape_cast %56 : vector<1x32x9xf32> to vector<32x9xf32>
    %cst_48 = arith.constant dense<0.000000e+00> : vector<8x9xf32>
    %58 = tpu.matmul %48, %57, %cst_48 {dimension_numbers = #tpu.dot_dimension_numbers<[1], [0], [0], [1], [0, 0, 1, 1], [], []>} : vector<8x32xf32>, vector<32x9xf32>, vector<8x9xf32> -> vector<8x9xf32>
    %c0_49 = arith.constant 0 : index
    %c0_50 = arith.constant 0 : index
    %c0_51 = arith.constant 0 : index
    %59 = vector.load %arg9[%c0_49, %c0_50, %c0_51] : memref<4x1x9xf32, #tpu.memory_space<vmem>>, vector<1x1x9xf32>
    %60 = vector.shape_cast %59 : vector<1x1x9xf32> to vector<1x9xf32>
    %61 = vector.broadcast %60 : vector<1x9xf32> to vector<8x9xf32>
    %62 = arith.addf %58, %61 : vector<8x9xf32>
    %63 = vector.broadcast %0 : vector<1x9xf32> to vector<8x9xf32>
    %64 = arith.subf %63, %62 : vector<8x9xf32>
    %cst_52 = arith.constant 0.000000e+00 : f32
    %65 = vector.broadcast %cst_52 : f32 to vector<8x9xf32>
    %66 = arith.maximumf %64, %65 : vector<8x9xf32>
    %67 = math.absf %64 : vector<8x9xf32>
    %cst_53 = arith.constant 0.000000e+00 : f32
    %68 = vector.broadcast %cst_53 : f32 to vector<8x9xf32>
    %69 = arith.subf %68, %67 : vector<8x9xf32>
    %70 = math.exp %69 : vector<8x9xf32>
    %71 = math.log1p %70 : vector<8x9xf32>
    %72 = arith.addf %66, %71 : vector<8x9xf32>
    %73 = vector.broadcast %0 : vector<1x9xf32> to vector<8x9xf32>
    %74 = arith.subf %73, %72 : vector<8x9xf32>
    %75 = vector.broadcast %1 : vector<1x9xf32> to vector<8x9xf32>
    %76 = arith.subf %74, %75 : vector<8x9xf32>
    %cst_54 = arith.constant 0.000000e+00 : f32
    %77 = vector.broadcast %cst_54 : f32 to vector<8x9xf32>
    %78 = arith.maximumf %76, %77 : vector<8x9xf32>
    %79 = math.absf %76 : vector<8x9xf32>
    %cst_55 = arith.constant 0.000000e+00 : f32
    %80 = vector.broadcast %cst_55 : f32 to vector<8x9xf32>
    %81 = arith.subf %80, %79 : vector<8x9xf32>
    %82 = math.exp %81 : vector<8x9xf32>
    %83 = math.log1p %82 : vector<8x9xf32>
    %84 = arith.addf %78, %83 : vector<8x9xf32>
    %85 = vector.broadcast %1 : vector<1x9xf32> to vector<8x9xf32>
    %86 = arith.addf %85, %84 : vector<8x9xf32>
    %c0_56 = arith.constant 0 : index
    %c0_57 = arith.constant 0 : index
    %c0_58 = arith.constant 0 : index
    %87 = vector.load %arg12[%c0_56, %c0_57, %c0_58] : memref<4x8x9xf32, #tpu.memory_space<vmem>>, vector<1x8x9xf32>
    %88 = vector.shape_cast %87 : vector<1x8x9xf32> to vector<8x9xf32>
    %89 = vector.shape_cast %55 : vector<8x9xf32> to vector<1x8x9xf32>
    tpu.vector_store %arg12[%c0_56, %c0_57, %c0_58], %89 {strides = array<i32>} : memref<4x8x9xf32, #tpu.memory_space<vmem>>, vector<1x8x9xf32>,
    %c0_59 = arith.constant 0 : index
    %c0_60 = arith.constant 0 : index
    %c0_61 = arith.constant 0 : index
    %90 = vector.load %arg13[%c0_59, %c0_60, %c0_61] : memref<4x8x9xf32, #tpu.memory_space<vmem>>, vector<1x8x9xf32>
    %91 = vector.shape_cast %90 : vector<1x8x9xf32> to vector<8x9xf32>
    %92 = vector.shape_cast %86 : vector<8x9xf32> to vector<1x8x9xf32>
    tpu.vector_store %arg13[%c0_59, %c0_60, %c0_61], %92 {strides = array<i32>} : memref<4x8x9xf32, #tpu.memory_space<vmem>>, vector<1x8x9xf32>,
    %c1_62 = arith.constant 1 : index
    %c0_63 = arith.constant 0 : index
    %c0_64 = arith.constant 0 : index
    %93 = vector.load %arg1[%c1_62, %c0_63, %c0_64] : memref<4x8x10xf32, #tpu.memory_space<vmem>>, vector<1x8x10xf32>
    %94 = vector.shape_cast %93 : vector<1x8x10xf32> to vector<8x10xf32>
    %c1_65 = arith.constant 1 : index
    %c0_66 = arith.constant 0 : index
    %c0_67 = arith.constant 0 : index
    %95 = vector.load %arg2[%c1_65, %c0_66, %c0_67] : memref<4x10x32xf32, #tpu.memory_space<vmem>>, vector<1x10x32xf32>
    %96 = vector.shape_cast %95 : vector<1x10x32xf32> to vector<10x32xf32>
    %cst_68 = arith.constant dense<0.000000e+00> : vector<8x32xf32>
    %97 = tpu.matmul %94, %96, %cst_68 {dimension_numbers = #tpu.dot_dimension_numbers<[1], [0], [0], [1], [0, 0, 1, 1], [], []>} : vector<8x10xf32>, vector<10x32xf32>, vector<8x32xf32> -> vector<8x32xf32>
    %c1_69 = arith.constant 1 : index
    %c0_70 = arith.constant 0 : index
    %c0_71 = arith.constant 0 : index
    %98 = vector.load %arg3[%c1_69, %c0_70, %c0_71] : memref<4x1x32xf32, #tpu.memory_space<vmem>>, vector<1x1x32xf32>
    %99 = vector.shape_cast %98 : vector<1x1x32xf32> to vector<1x32xf32>
    %100 = vector.broadcast %99 : vector<1x32xf32> to vector<8x32xf32>
    %101 = arith.addf %97, %100 : vector<8x32xf32>
    %cst_72 = arith.constant 5.000000e-01 : f32
    %102 = vector.broadcast %cst_72 : f32 to vector<8x32xf32>
    %103 = arith.mulf %102, %101 : vector<8x32xf32>
    %cst_73 = arith.constant 5.000000e-01 : f32
    %104 = vector.broadcast %cst_73 : f32 to vector<8x32xf32>
    %105 = arith.mulf %104, %101 : vector<8x32xf32>
    %106 = math.tanh %105 : vector<8x32xf32>
    %cst_74 = arith.constant 1.000000e+00 : f32
    %107 = vector.broadcast %cst_74 : f32 to vector<8x32xf32>
    %108 = arith.addf %107, %106 : vector<8x32xf32>
    %109 = arith.mulf %103, %108 : vector<8x32xf32>
    %c1_75 = arith.constant 1 : index
    %c0_76 = arith.constant 0 : index
    %c0_77 = arith.constant 0 : index
    %c0_78 = arith.constant 0 : index
    %110 = vector.load %arg4[%c1_75, %c0_76, %c0_77, %c0_78] : memref<4x2x32x32xf32, #tpu.memory_space<vmem>>, vector<1x1x32x32xf32>
    %111 = vector.shape_cast %110 : vector<1x1x32x32xf32> to vector<32x32xf32>
    %cst_79 = arith.constant dense<0.000000e+00> : vector<8x32xf32>
    %112 = tpu.matmul %109, %111, %cst_79 {dimension_numbers = #tpu.dot_dimension_numbers<[1], [0], [0], [1], [0, 0, 1, 1], [], []>} : vector<8x32xf32>, vector<32x32xf32>, vector<8x32xf32> -> vector<8x32xf32>
    %c1_80 = arith.constant 1 : index
    %c0_81 = arith.constant 0 : index
    %c0_82 = arith.constant 0 : index
    %c0_83 = arith.constant 0 : index
    %113 = vector.load %arg5[%c1_80, %c0_81, %c0_82, %c0_83] : memref<4x2x1x32xf32, #tpu.memory_space<vmem>>, vector<1x1x1x32xf32>
    %114 = vector.shape_cast %113 : vector<1x1x1x32xf32> to vector<1x32xf32>
    %115 = vector.broadcast %114 : vector<1x32xf32> to vector<8x32xf32>
    %116 = arith.addf %112, %115 : vector<8x32xf32>
    %cst_84 = arith.constant 5.000000e-01 : f32
    %117 = vector.broadcast %cst_84 : f32 to vector<8x32xf32>
    %118 = arith.mulf %117, %116 : vector<8x32xf32>
    %cst_85 = arith.constant 5.000000e-01 : f32
    %119 = vector.broadcast %cst_85 : f32 to vector<8x32xf32>
    %120 = arith.mulf %119, %116 : vector<8x32xf32>
    %121 = math.tanh %120 : vector<8x32xf32>
    %cst_86 = arith.constant 1.000000e+00 : f32
    %122 = vector.broadcast %cst_86 : f32 to vector<8x32xf32>
    %123 = arith.addf %122, %121 : vector<8x32xf32>
    %124 = arith.mulf %118, %123 : vector<8x32xf32>
    %c1_87 = arith.constant 1 : index
    %c1_88 = arith.constant 1 : index
    %c0_89 = arith.constant 0 : index
    %c0_90 = arith.constant 0 : index
    %125 = vector.load %arg4[%c1_87, %c1_88, %c0_89, %c0_90] : memref<4x2x32x32xf32, #tpu.memory_space<vmem>>, vector<1x1x32x32xf32>
    %126 = vector.shape_cast %125 : vector<1x1x32x32xf32> to vector<32x32xf32>
    %cst_91 = arith.constant dense<0.000000e+00> : vector<8x32xf32>
    %127 = tpu.matmul %124, %126, %cst_91 {dimension_numbers = #tpu.dot_dimension_numbers<[1], [0], [0], [1], [0, 0, 1, 1], [], []>} : vector<8x32xf32>, vector<32x32xf32>, vector<8x32xf32> -> vector<8x32xf32>
    %c1_92 = arith.constant 1 : index
    %c1_93 = arith.constant 1 : index
    %c0_94 = arith.constant 0 : index
    %c0_95 = arith.constant 0 : index
    %128 = vector.load %arg5[%c1_92, %c1_93, %c0_94, %c0_95] : memref<4x2x1x32xf32, #tpu.memory_space<vmem>>, vector<1x1x1x32xf32>
    %129 = vector.shape_cast %128 : vector<1x1x1x32xf32> to vector<1x32xf32>
    %130 = vector.broadcast %129 : vector<1x32xf32> to vector<8x32xf32>
    %131 = arith.addf %127, %130 : vector<8x32xf32>
    %cst_96 = arith.constant 5.000000e-01 : f32
    %132 = vector.broadcast %cst_96 : f32 to vector<8x32xf32>
    %133 = arith.mulf %132, %131 : vector<8x32xf32>
    %cst_97 = arith.constant 5.000000e-01 : f32
    %134 = vector.broadcast %cst_97 : f32 to vector<8x32xf32>
    %135 = arith.mulf %134, %131 : vector<8x32xf32>
    %136 = math.tanh %135 : vector<8x32xf32>
    %cst_98 = arith.constant 1.000000e+00 : f32
    %137 = vector.broadcast %cst_98 : f32 to vector<8x32xf32>
    %138 = arith.addf %137, %136 : vector<8x32xf32>
    %139 = arith.mulf %133, %138 : vector<8x32xf32>
    %c1_99 = arith.constant 1 : index
    %c0_100 = arith.constant 0 : index
    %c0_101 = arith.constant 0 : index
    %140 = vector.load %arg6[%c1_99, %c0_100, %c0_101] : memref<4x32x9xf32, #tpu.memory_space<vmem>>, vector<1x32x9xf32>
    %141 = vector.shape_cast %140 : vector<1x32x9xf32> to vector<32x9xf32>
    %cst_102 = arith.constant dense<0.000000e+00> : vector<8x9xf32>
    %142 = tpu.matmul %139, %141, %cst_102 {dimension_numbers = #tpu.dot_dimension_numbers<[1], [0], [0], [1], [0, 0, 1, 1], [], []>} : vector<8x32xf32>, vector<32x9xf32>, vector<8x9xf32> -> vector<8x9xf32>
    %c1_103 = arith.constant 1 : index
    %c0_104 = arith.constant 0 : index
    %c0_105 = arith.constant 0 : index
    %143 = vector.load %arg7[%c1_103, %c0_104, %c0_105] : memref<4x1x9xf32, #tpu.memory_space<vmem>>, vector<1x1x9xf32>
    %144 = vector.shape_cast %143 : vector<1x1x9xf32> to vector<1x9xf32>
    %145 = vector.broadcast %144 : vector<1x9xf32> to vector<8x9xf32>
    %146 = arith.addf %142, %145 : vector<8x9xf32>
    %c1_106 = arith.constant 1 : index
    %c0_107 = arith.constant 0 : index
    %c0_108 = arith.constant 0 : index
    %147 = vector.load %arg8[%c1_106, %c0_107, %c0_108] : memref<4x32x9xf32, #tpu.memory_space<vmem>>, vector<1x32x9xf32>
    %148 = vector.shape_cast %147 : vector<1x32x9xf32> to vector<32x9xf32>
    %cst_109 = arith.constant dense<0.000000e+00> : vector<8x9xf32>
    %149 = tpu.matmul %139, %148, %cst_109 {dimension_numbers = #tpu.dot_dimension_numbers<[1], [0], [0], [1], [0, 0, 1, 1], [], []>} : vector<8x32xf32>, vector<32x9xf32>, vector<8x9xf32> -> vector<8x9xf32>
    %c1_110 = arith.constant 1 : index
    %c0_111 = arith.constant 0 : index
    %c0_112 = arith.constant 0 : index
    %150 = vector.load %arg9[%c1_110, %c0_111, %c0_112] : memref<4x1x9xf32, #tpu.memory_space<vmem>>, vector<1x1x9xf32>
    %151 = vector.shape_cast %150 : vector<1x1x9xf32> to vector<1x9xf32>
    %152 = vector.broadcast %151 : vector<1x9xf32> to vector<8x9xf32>
    %153 = arith.addf %149, %152 : vector<8x9xf32>
    %154 = vector.broadcast %0 : vector<1x9xf32> to vector<8x9xf32>
    %155 = arith.subf %154, %153 : vector<8x9xf32>
    %cst_113 = arith.constant 0.000000e+00 : f32
    %156 = vector.broadcast %cst_113 : f32 to vector<8x9xf32>
    %157 = arith.maximumf %155, %156 : vector<8x9xf32>
    %158 = math.absf %155 : vector<8x9xf32>
    %cst_114 = arith.constant 0.000000e+00 : f32
    %159 = vector.broadcast %cst_114 : f32 to vector<8x9xf32>
    %160 = arith.subf %159, %158 : vector<8x9xf32>
    %161 = math.exp %160 : vector<8x9xf32>
    %162 = math.log1p %161 : vector<8x9xf32>
    %163 = arith.addf %157, %162 : vector<8x9xf32>
    %164 = vector.broadcast %0 : vector<1x9xf32> to vector<8x9xf32>
    %165 = arith.subf %164, %163 : vector<8x9xf32>
    %166 = vector.broadcast %1 : vector<1x9xf32> to vector<8x9xf32>
    %167 = arith.subf %165, %166 : vector<8x9xf32>
    %cst_115 = arith.constant 0.000000e+00 : f32
    %168 = vector.broadcast %cst_115 : f32 to vector<8x9xf32>
    %169 = arith.maximumf %167, %168 : vector<8x9xf32>
    %170 = math.absf %167 : vector<8x9xf32>
    %cst_116 = arith.constant 0.000000e+00 : f32
    %171 = vector.broadcast %cst_116 : f32 to vector<8x9xf32>
    %172 = arith.subf %171, %170 : vector<8x9xf32>
    %173 = math.exp %172 : vector<8x9xf32>
    %174 = math.log1p %173 : vector<8x9xf32>
    %175 = arith.addf %169, %174 : vector<8x9xf32>
    %176 = vector.broadcast %1 : vector<1x9xf32> to vector<8x9xf32>
    %177 = arith.addf %176, %175 : vector<8x9xf32>
    %c1_117 = arith.constant 1 : index
    %c0_118 = arith.constant 0 : index
    %c0_119 = arith.constant 0 : index
    %178 = vector.load %arg12[%c1_117, %c0_118, %c0_119] : memref<4x8x9xf32, #tpu.memory_space<vmem>>, vector<1x8x9xf32>
    %179 = vector.shape_cast %178 : vector<1x8x9xf32> to vector<8x9xf32>
    %180 = vector.shape_cast %146 : vector<8x9xf32> to vector<1x8x9xf32>
    tpu.vector_store %arg12[%c1_117, %c0_118, %c0_119], %180 {strides = array<i32>} : memref<4x8x9xf32, #tpu.memory_space<vmem>>, vector<1x8x9xf32>,
    %c1_120 = arith.constant 1 : index
    %c0_121 = arith.constant 0 : index
    %c0_122 = arith.constant 0 : index
    %181 = vector.load %arg13[%c1_120, %c0_121, %c0_122] : memref<4x8x9xf32, #tpu.memory_space<vmem>>, vector<1x8x9xf32>
    %182 = vector.shape_cast %181 : vector<1x8x9xf32> to vector<8x9xf32>
    %183 = vector.shape_cast %177 : vector<8x9xf32> to vector<1x8x9xf32>
    tpu.vector_store %arg13[%c1_120, %c0_121, %c0_122], %183 {strides = array<i32>} : memref<4x8x9xf32, #tpu.memory_space<vmem>>, vector<1x8x9xf32>,
    %c2 = arith.constant 2 : index
    %c0_123 = arith.constant 0 : index
    %c0_124 = arith.constant 0 : index
    %184 = vector.load %arg1[%c2, %c0_123, %c0_124] : memref<4x8x10xf32, #tpu.memory_space<vmem>>, vector<1x8x10xf32>
    %185 = vector.shape_cast %184 : vector<1x8x10xf32> to vector<8x10xf32>
    %c2_125 = arith.constant 2 : index
    %c0_126 = arith.constant 0 : index
    %c0_127 = arith.constant 0 : index
    %186 = vector.load %arg2[%c2_125, %c0_126, %c0_127] : memref<4x10x32xf32, #tpu.memory_space<vmem>>, vector<1x10x32xf32>
    %187 = vector.shape_cast %186 : vector<1x10x32xf32> to vector<10x32xf32>
    %cst_128 = arith.constant dense<0.000000e+00> : vector<8x32xf32>
    %188 = tpu.matmul %185, %187, %cst_128 {dimension_numbers = #tpu.dot_dimension_numbers<[1], [0], [0], [1], [0, 0, 1, 1], [], []>} : vector<8x10xf32>, vector<10x32xf32>, vector<8x32xf32> -> vector<8x32xf32>
    %c2_129 = arith.constant 2 : index
    %c0_130 = arith.constant 0 : index
    %c0_131 = arith.constant 0 : index
    %189 = vector.load %arg3[%c2_129, %c0_130, %c0_131] : memref<4x1x32xf32, #tpu.memory_space<vmem>>, vector<1x1x32xf32>
    %190 = vector.shape_cast %189 : vector<1x1x32xf32> to vector<1x32xf32>
    %191 = vector.broadcast %190 : vector<1x32xf32> to vector<8x32xf32>
    %192 = arith.addf %188, %191 : vector<8x32xf32>
    %cst_132 = arith.constant 5.000000e-01 : f32
    %193 = vector.broadcast %cst_132 : f32 to vector<8x32xf32>
    %194 = arith.mulf %193, %192 : vector<8x32xf32>
    %cst_133 = arith.constant 5.000000e-01 : f32
    %195 = vector.broadcast %cst_133 : f32 to vector<8x32xf32>
    %196 = arith.mulf %195, %192 : vector<8x32xf32>
    %197 = math.tanh %196 : vector<8x32xf32>
    %cst_134 = arith.constant 1.000000e+00 : f32
    %198 = vector.broadcast %cst_134 : f32 to vector<8x32xf32>
    %199 = arith.addf %198, %197 : vector<8x32xf32>
    %200 = arith.mulf %194, %199 : vector<8x32xf32>
    %c2_135 = arith.constant 2 : index
    %c0_136 = arith.constant 0 : index
    %c0_137 = arith.constant 0 : index
    %c0_138 = arith.constant 0 : index
    %201 = vector.load %arg4[%c2_135, %c0_136, %c0_137, %c0_138] : memref<4x2x32x32xf32, #tpu.memory_space<vmem>>, vector<1x1x32x32xf32>
    %202 = vector.shape_cast %201 : vector<1x1x32x32xf32> to vector<32x32xf32>
    %cst_139 = arith.constant dense<0.000000e+00> : vector<8x32xf32>
    %203 = tpu.matmul %200, %202, %cst_139 {dimension_numbers = #tpu.dot_dimension_numbers<[1], [0], [0], [1], [0, 0, 1, 1], [], []>} : vector<8x32xf32>, vector<32x32xf32>, vector<8x32xf32> -> vector<8x32xf32>
    %c2_140 = arith.constant 2 : index
    %c0_141 = arith.constant 0 : index
    %c0_142 = arith.constant 0 : index
    %c0_143 = arith.constant 0 : index
    %204 = vector.load %arg5[%c2_140, %c0_141, %c0_142, %c0_143] : memref<4x2x1x32xf32, #tpu.memory_space<vmem>>, vector<1x1x1x32xf32>
    %205 = vector.shape_cast %204 : vector<1x1x1x32xf32> to vector<1x32xf32>
    %206 = vector.broadcast %205 : vector<1x32xf32> to vector<8x32xf32>
    %207 = arith.addf %203, %206 : vector<8x32xf32>
    %cst_144 = arith.constant 5.000000e-01 : f32
    %208 = vector.broadcast %cst_144 : f32 to vector<8x32xf32>
    %209 = arith.mulf %208, %207 : vector<8x32xf32>
    %cst_145 = arith.constant 5.000000e-01 : f32
    %210 = vector.broadcast %cst_145 : f32 to vector<8x32xf32>
    %211 = arith.mulf %210, %207 : vector<8x32xf32>
    %212 = math.tanh %211 : vector<8x32xf32>
    %cst_146 = arith.constant 1.000000e+00 : f32
    %213 = vector.broadcast %cst_146 : f32 to vector<8x32xf32>
    %214 = arith.addf %213, %212 : vector<8x32xf32>
    %215 = arith.mulf %209, %214 : vector<8x32xf32>
    %c2_147 = arith.constant 2 : index
    %c1_148 = arith.constant 1 : index
    %c0_149 = arith.constant 0 : index
    %c0_150 = arith.constant 0 : index
    %216 = vector.load %arg4[%c2_147, %c1_148, %c0_149, %c0_150] : memref<4x2x32x32xf32, #tpu.memory_space<vmem>>, vector<1x1x32x32xf32>
    %217 = vector.shape_cast %216 : vector<1x1x32x32xf32> to vector<32x32xf32>
    %cst_151 = arith.constant dense<0.000000e+00> : vector<8x32xf32>
    %218 = tpu.matmul %215, %217, %cst_151 {dimension_numbers = #tpu.dot_dimension_numbers<[1], [0], [0], [1], [0, 0, 1, 1], [], []>} : vector<8x32xf32>, vector<32x32xf32>, vector<8x32xf32> -> vector<8x32xf32>
    %c2_152 = arith.constant 2 : index
    %c1_153 = arith.constant 1 : index
    %c0_154 = arith.constant 0 : index
    %c0_155 = arith.constant 0 : index
    %219 = vector.load %arg5[%c2_152, %c1_153, %c0_154, %c0_155] : memref<4x2x1x32xf32, #tpu.memory_space<vmem>>, vector<1x1x1x32xf32>
    %220 = vector.shape_cast %219 : vector<1x1x1x32xf32> to vector<1x32xf32>
    %221 = vector.broadcast %220 : vector<1x32xf32> to vector<8x32xf32>
    %222 = arith.addf %218, %221 : vector<8x32xf32>
    %cst_156 = arith.constant 5.000000e-01 : f32
    %223 = vector.broadcast %cst_156 : f32 to vector<8x32xf32>
    %224 = arith.mulf %223, %222 : vector<8x32xf32>
    %cst_157 = arith.constant 5.000000e-01 : f32
    %225 = vector.broadcast %cst_157 : f32 to vector<8x32xf32>
    %226 = arith.mulf %225, %222 : vector<8x32xf32>
    %227 = math.tanh %226 : vector<8x32xf32>
    %cst_158 = arith.constant 1.000000e+00 : f32
    %228 = vector.broadcast %cst_158 : f32 to vector<8x32xf32>
    %229 = arith.addf %228, %227 : vector<8x32xf32>
    %230 = arith.mulf %224, %229 : vector<8x32xf32>
    %c2_159 = arith.constant 2 : index
    %c0_160 = arith.constant 0 : index
    %c0_161 = arith.constant 0 : index
    %231 = vector.load %arg6[%c2_159, %c0_160, %c0_161] : memref<4x32x9xf32, #tpu.memory_space<vmem>>, vector<1x32x9xf32>
    %232 = vector.shape_cast %231 : vector<1x32x9xf32> to vector<32x9xf32>
    %cst_162 = arith.constant dense<0.000000e+00> : vector<8x9xf32>
    %233 = tpu.matmul %230, %232, %cst_162 {dimension_numbers = #tpu.dot_dimension_numbers<[1], [0], [0], [1], [0, 0, 1, 1], [], []>} : vector<8x32xf32>, vector<32x9xf32>, vector<8x9xf32> -> vector<8x9xf32>
    %c2_163 = arith.constant 2 : index
    %c0_164 = arith.constant 0 : index
    %c0_165 = arith.constant 0 : index
    %234 = vector.load %arg7[%c2_163, %c0_164, %c0_165] : memref<4x1x9xf32, #tpu.memory_space<vmem>>, vector<1x1x9xf32>
    %235 = vector.shape_cast %234 : vector<1x1x9xf32> to vector<1x9xf32>
    %236 = vector.broadcast %235 : vector<1x9xf32> to vector<8x9xf32>
    %237 = arith.addf %233, %236 : vector<8x9xf32>
    %c2_166 = arith.constant 2 : index
    %c0_167 = arith.constant 0 : index
    %c0_168 = arith.constant 0 : index
    %238 = vector.load %arg8[%c2_166, %c0_167, %c0_168] : memref<4x32x9xf32, #tpu.memory_space<vmem>>, vector<1x32x9xf32>
    %239 = vector.shape_cast %238 : vector<1x32x9xf32> to vector<32x9xf32>
    %cst_169 = arith.constant dense<0.000000e+00> : vector<8x9xf32>
    %240 = tpu.matmul %230, %239, %cst_169 {dimension_numbers = #tpu.dot_dimension_numbers<[1], [0], [0], [1], [0, 0, 1, 1], [], []>} : vector<8x32xf32>, vector<32x9xf32>, vector<8x9xf32> -> vector<8x9xf32>
    %c2_170 = arith.constant 2 : index
    %c0_171 = arith.constant 0 : index
    %c0_172 = arith.constant 0 : index
    %241 = vector.load %arg9[%c2_170, %c0_171, %c0_172] : memref<4x1x9xf32, #tpu.memory_space<vmem>>, vector<1x1x9xf32>
    %242 = vector.shape_cast %241 : vector<1x1x9xf32> to vector<1x9xf32>
    %243 = vector.broadcast %242 : vector<1x9xf32> to vector<8x9xf32>
    %244 = arith.addf %240, %243 : vector<8x9xf32>
    %245 = vector.broadcast %0 : vector<1x9xf32> to vector<8x9xf32>
    %246 = arith.subf %245, %244 : vector<8x9xf32>
    %cst_173 = arith.constant 0.000000e+00 : f32
    %247 = vector.broadcast %cst_173 : f32 to vector<8x9xf32>
    %248 = arith.maximumf %246, %247 : vector<8x9xf32>
    %249 = math.absf %246 : vector<8x9xf32>
    %cst_174 = arith.constant 0.000000e+00 : f32
    %250 = vector.broadcast %cst_174 : f32 to vector<8x9xf32>
    %251 = arith.subf %250, %249 : vector<8x9xf32>
    %252 = math.exp %251 : vector<8x9xf32>
    %253 = math.log1p %252 : vector<8x9xf32>
    %254 = arith.addf %248, %253 : vector<8x9xf32>
    %255 = vector.broadcast %0 : vector<1x9xf32> to vector<8x9xf32>
    %256 = arith.subf %255, %254 : vector<8x9xf32>
    %257 = vector.broadcast %1 : vector<1x9xf32> to vector<8x9xf32>
    %258 = arith.subf %256, %257 : vector<8x9xf32>
    %cst_175 = arith.constant 0.000000e+00 : f32
    %259 = vector.broadcast %cst_175 : f32 to vector<8x9xf32>
    %260 = arith.maximumf %258, %259 : vector<8x9xf32>
    %261 = math.absf %258 : vector<8x9xf32>
    %cst_176 = arith.constant 0.000000e+00 : f32
    %262 = vector.broadcast %cst_176 : f32 to vector<8x9xf32>
    %263 = arith.subf %262, %261 : vector<8x9xf32>
    %264 = math.exp %263 : vector<8x9xf32>
    %265 = math.log1p %264 : vector<8x9xf32>
    %266 = arith.addf %260, %265 : vector<8x9xf32>
    %267 = vector.broadcast %1 : vector<1x9xf32> to vector<8x9xf32>
    %268 = arith.addf %267, %266 : vector<8x9xf32>
    %c2_177 = arith.constant 2 : index
    %c0_178 = arith.constant 0 : index
    %c0_179 = arith.constant 0 : index
    %269 = vector.load %arg12[%c2_177, %c0_178, %c0_179] : memref<4x8x9xf32, #tpu.memory_space<vmem>>, vector<1x8x9xf32>
    %270 = vector.shape_cast %269 : vector<1x8x9xf32> to vector<8x9xf32>
    %271 = vector.shape_cast %237 : vector<8x9xf32> to vector<1x8x9xf32>
    tpu.vector_store %arg12[%c2_177, %c0_178, %c0_179], %271 {strides = array<i32>} : memref<4x8x9xf32, #tpu.memory_space<vmem>>, vector<1x8x9xf32>,
    %c2_180 = arith.constant 2 : index
    %c0_181 = arith.constant 0 : index
    %c0_182 = arith.constant 0 : index
    %272 = vector.load %arg13[%c2_180, %c0_181, %c0_182] : memref<4x8x9xf32, #tpu.memory_space<vmem>>, vector<1x8x9xf32>
    %273 = vector.shape_cast %272 : vector<1x8x9xf32> to vector<8x9xf32>
    %274 = vector.shape_cast %268 : vector<8x9xf32> to vector<1x8x9xf32>
    tpu.vector_store %arg13[%c2_180, %c0_181, %c0_182], %274 {strides = array<i32>} : memref<4x8x9xf32, #tpu.memory_space<vmem>>, vector<1x8x9xf32>,
    %c3 = arith.constant 3 : index
    %c0_183 = arith.constant 0 : index
    %c0_184 = arith.constant 0 : index
    %275 = vector.load %arg1[%c3, %c0_183, %c0_184] : memref<4x8x10xf32, #tpu.memory_space<vmem>>, vector<1x8x10xf32>
    %276 = vector.shape_cast %275 : vector<1x8x10xf32> to vector<8x10xf32>
    %c3_185 = arith.constant 3 : index
    %c0_186 = arith.constant 0 : index
    %c0_187 = arith.constant 0 : index
    %277 = vector.load %arg2[%c3_185, %c0_186, %c0_187] : memref<4x10x32xf32, #tpu.memory_space<vmem>>, vector<1x10x32xf32>
    %278 = vector.shape_cast %277 : vector<1x10x32xf32> to vector<10x32xf32>
    %cst_188 = arith.constant dense<0.000000e+00> : vector<8x32xf32>
    %279 = tpu.matmul %276, %278, %cst_188 {dimension_numbers = #tpu.dot_dimension_numbers<[1], [0], [0], [1], [0, 0, 1, 1], [], []>} : vector<8x10xf32>, vector<10x32xf32>, vector<8x32xf32> -> vector<8x32xf32>
    %c3_189 = arith.constant 3 : index
    %c0_190 = arith.constant 0 : index
    %c0_191 = arith.constant 0 : index
    %280 = vector.load %arg3[%c3_189, %c0_190, %c0_191] : memref<4x1x32xf32, #tpu.memory_space<vmem>>, vector<1x1x32xf32>
    %281 = vector.shape_cast %280 : vector<1x1x32xf32> to vector<1x32xf32>
    %282 = vector.broadcast %281 : vector<1x32xf32> to vector<8x32xf32>
    %283 = arith.addf %279, %282 : vector<8x32xf32>
    %cst_192 = arith.constant 5.000000e-01 : f32
    %284 = vector.broadcast %cst_192 : f32 to vector<8x32xf32>
    %285 = arith.mulf %284, %283 : vector<8x32xf32>
    %cst_193 = arith.constant 5.000000e-01 : f32
    %286 = vector.broadcast %cst_193 : f32 to vector<8x32xf32>
    %287 = arith.mulf %286, %283 : vector<8x32xf32>
    %288 = math.tanh %287 : vector<8x32xf32>
    %cst_194 = arith.constant 1.000000e+00 : f32
    %289 = vector.broadcast %cst_194 : f32 to vector<8x32xf32>
    %290 = arith.addf %289, %288 : vector<8x32xf32>
    %291 = arith.mulf %285, %290 : vector<8x32xf32>
    %c3_195 = arith.constant 3 : index
    %c0_196 = arith.constant 0 : index
    %c0_197 = arith.constant 0 : index
    %c0_198 = arith.constant 0 : index
    %292 = vector.load %arg4[%c3_195, %c0_196, %c0_197, %c0_198] : memref<4x2x32x32xf32, #tpu.memory_space<vmem>>, vector<1x1x32x32xf32>
    %293 = vector.shape_cast %292 : vector<1x1x32x32xf32> to vector<32x32xf32>
    %cst_199 = arith.constant dense<0.000000e+00> : vector<8x32xf32>
    %294 = tpu.matmul %291, %293, %cst_199 {dimension_numbers = #tpu.dot_dimension_numbers<[1], [0], [0], [1], [0, 0, 1, 1], [], []>} : vector<8x32xf32>, vector<32x32xf32>, vector<8x32xf32> -> vector<8x32xf32>
    %c3_200 = arith.constant 3 : index
    %c0_201 = arith.constant 0 : index
    %c0_202 = arith.constant 0 : index
    %c0_203 = arith.constant 0 : index
    %295 = vector.load %arg5[%c3_200, %c0_201, %c0_202, %c0_203] : memref<4x2x1x32xf32, #tpu.memory_space<vmem>>, vector<1x1x1x32xf32>
    %296 = vector.shape_cast %295 : vector<1x1x1x32xf32> to vector<1x32xf32>
    %297 = vector.broadcast %296 : vector<1x32xf32> to vector<8x32xf32>
    %298 = arith.addf %294, %297 : vector<8x32xf32>
    %cst_204 = arith.constant 5.000000e-01 : f32
    %299 = vector.broadcast %cst_204 : f32 to vector<8x32xf32>
    %300 = arith.mulf %299, %298 : vector<8x32xf32>
    %cst_205 = arith.constant 5.000000e-01 : f32
    %301 = vector.broadcast %cst_205 : f32 to vector<8x32xf32>
    %302 = arith.mulf %301, %298 : vector<8x32xf32>
    %303 = math.tanh %302 : vector<8x32xf32>
    %cst_206 = arith.constant 1.000000e+00 : f32
    %304 = vector.broadcast %cst_206 : f32 to vector<8x32xf32>
    %305 = arith.addf %304, %303 : vector<8x32xf32>
    %306 = arith.mulf %300, %305 : vector<8x32xf32>
    %c3_207 = arith.constant 3 : index
    %c1_208 = arith.constant 1 : index
    %c0_209 = arith.constant 0 : index
    %c0_210 = arith.constant 0 : index
    %307 = vector.load %arg4[%c3_207, %c1_208, %c0_209, %c0_210] : memref<4x2x32x32xf32, #tpu.memory_space<vmem>>, vector<1x1x32x32xf32>
    %308 = vector.shape_cast %307 : vector<1x1x32x32xf32> to vector<32x32xf32>
    %cst_211 = arith.constant dense<0.000000e+00> : vector<8x32xf32>
    %309 = tpu.matmul %306, %308, %cst_211 {dimension_numbers = #tpu.dot_dimension_numbers<[1], [0], [0], [1], [0, 0, 1, 1], [], []>} : vector<8x32xf32>, vector<32x32xf32>, vector<8x32xf32> -> vector<8x32xf32>
    %c3_212 = arith.constant 3 : index
    %c1_213 = arith.constant 1 : index
    %c0_214 = arith.constant 0 : index
    %c0_215 = arith.constant 0 : index
    %310 = vector.load %arg5[%c3_212, %c1_213, %c0_214, %c0_215] : memref<4x2x1x32xf32, #tpu.memory_space<vmem>>, vector<1x1x1x32xf32>
    %311 = vector.shape_cast %310 : vector<1x1x1x32xf32> to vector<1x32xf32>
    %312 = vector.broadcast %311 : vector<1x32xf32> to vector<8x32xf32>
    %313 = arith.addf %309, %312 : vector<8x32xf32>
    %cst_216 = arith.constant 5.000000e-01 : f32
    %314 = vector.broadcast %cst_216 : f32 to vector<8x32xf32>
    %315 = arith.mulf %314, %313 : vector<8x32xf32>
    %cst_217 = arith.constant 5.000000e-01 : f32
    %316 = vector.broadcast %cst_217 : f32 to vector<8x32xf32>
    %317 = arith.mulf %316, %313 : vector<8x32xf32>
    %318 = math.tanh %317 : vector<8x32xf32>
    %cst_218 = arith.constant 1.000000e+00 : f32
    %319 = vector.broadcast %cst_218 : f32 to vector<8x32xf32>
    %320 = arith.addf %319, %318 : vector<8x32xf32>
    %321 = arith.mulf %315, %320 : vector<8x32xf32>
    %c3_219 = arith.constant 3 : index
    %c0_220 = arith.constant 0 : index
    %c0_221 = arith.constant 0 : index
    %322 = vector.load %arg6[%c3_219, %c0_220, %c0_221] : memref<4x32x9xf32, #tpu.memory_space<vmem>>, vector<1x32x9xf32>
    %323 = vector.shape_cast %322 : vector<1x32x9xf32> to vector<32x9xf32>
    %cst_222 = arith.constant dense<0.000000e+00> : vector<8x9xf32>
    %324 = tpu.matmul %321, %323, %cst_222 {dimension_numbers = #tpu.dot_dimension_numbers<[1], [0], [0], [1], [0, 0, 1, 1], [], []>} : vector<8x32xf32>, vector<32x9xf32>, vector<8x9xf32> -> vector<8x9xf32>
    %c3_223 = arith.constant 3 : index
    %c0_224 = arith.constant 0 : index
    %c0_225 = arith.constant 0 : index
    %325 = vector.load %arg7[%c3_223, %c0_224, %c0_225] : memref<4x1x9xf32, #tpu.memory_space<vmem>>, vector<1x1x9xf32>
    %326 = vector.shape_cast %325 : vector<1x1x9xf32> to vector<1x9xf32>
    %327 = vector.broadcast %326 : vector<1x9xf32> to vector<8x9xf32>
    %328 = arith.addf %324, %327 : vector<8x9xf32>
    %c3_226 = arith.constant 3 : index
    %c0_227 = arith.constant 0 : index
    %c0_228 = arith.constant 0 : index
    %329 = vector.load %arg8[%c3_226, %c0_227, %c0_228] : memref<4x32x9xf32, #tpu.memory_space<vmem>>, vector<1x32x9xf32>
    %330 = vector.shape_cast %329 : vector<1x32x9xf32> to vector<32x9xf32>
    %cst_229 = arith.constant dense<0.000000e+00> : vector<8x9xf32>
    %331 = tpu.matmul %321, %330, %cst_229 {dimension_numbers = #tpu.dot_dimension_numbers<[1], [0], [0], [1], [0, 0, 1, 1], [], []>} : vector<8x32xf32>, vector<32x9xf32>, vector<8x9xf32> -> vector<8x9xf32>
    %c3_230 = arith.constant 3 : index
    %c0_231 = arith.constant 0 : index
    %c0_232 = arith.constant 0 : index
    %332 = vector.load %arg9[%c3_230, %c0_231, %c0_232] : memref<4x1x9xf32, #tpu.memory_space<vmem>>, vector<1x1x9xf32>
    %333 = vector.shape_cast %332 : vector<1x1x9xf32> to vector<1x9xf32>
    %334 = vector.broadcast %333 : vector<1x9xf32> to vector<8x9xf32>
    %335 = arith.addf %331, %334 : vector<8x9xf32>
    %336 = vector.broadcast %0 : vector<1x9xf32> to vector<8x9xf32>
    %337 = arith.subf %336, %335 : vector<8x9xf32>
    %cst_233 = arith.constant 0.000000e+00 : f32
    %338 = vector.broadcast %cst_233 : f32 to vector<8x9xf32>
    %339 = arith.maximumf %337, %338 : vector<8x9xf32>
    %340 = math.absf %337 : vector<8x9xf32>
    %cst_234 = arith.constant 0.000000e+00 : f32
    %341 = vector.broadcast %cst_234 : f32 to vector<8x9xf32>
    %342 = arith.subf %341, %340 : vector<8x9xf32>
    %343 = math.exp %342 : vector<8x9xf32>
    %344 = math.log1p %343 : vector<8x9xf32>
    %345 = arith.addf %339, %344 : vector<8x9xf32>
    %346 = vector.broadcast %0 : vector<1x9xf32> to vector<8x9xf32>
    %347 = arith.subf %346, %345 : vector<8x9xf32>
    %348 = vector.broadcast %1 : vector<1x9xf32> to vector<8x9xf32>
    %349 = arith.subf %347, %348 : vector<8x9xf32>
    %cst_235 = arith.constant 0.000000e+00 : f32
    %350 = vector.broadcast %cst_235 : f32 to vector<8x9xf32>
    %351 = arith.maximumf %349, %350 : vector<8x9xf32>
    %352 = math.absf %349 : vector<8x9xf32>
    %cst_236 = arith.constant 0.000000e+00 : f32
    %353 = vector.broadcast %cst_236 : f32 to vector<8x9xf32>
    %354 = arith.subf %353, %352 : vector<8x9xf32>
    %355 = math.exp %354 : vector<8x9xf32>
    %356 = math.log1p %355 : vector<8x9xf32>
    %357 = arith.addf %351, %356 : vector<8x9xf32>
    %358 = vector.broadcast %1 : vector<1x9xf32> to vector<8x9xf32>
    %359 = arith.addf %358, %357 : vector<8x9xf32>
    %c3_237 = arith.constant 3 : index
    %c0_238 = arith.constant 0 : index
    %c0_239 = arith.constant 0 : index
    %360 = vector.load %arg12[%c3_237, %c0_238, %c0_239] : memref<4x8x9xf32, #tpu.memory_space<vmem>>, vector<1x8x9xf32>
    %361 = vector.shape_cast %360 : vector<1x8x9xf32> to vector<8x9xf32>
    %362 = vector.shape_cast %328 : vector<8x9xf32> to vector<1x8x9xf32>
    tpu.vector_store %arg12[%c3_237, %c0_238, %c0_239], %362 {strides = array<i32>} : memref<4x8x9xf32, #tpu.memory_space<vmem>>, vector<1x8x9xf32>,
    %c3_240 = arith.constant 3 : index
    %c0_241 = arith.constant 0 : index
    %c0_242 = arith.constant 0 : index
    %363 = vector.load %arg13[%c3_240, %c0_241, %c0_242] : memref<4x8x9xf32, #tpu.memory_space<vmem>>, vector<1x8x9xf32>
    %364 = vector.shape_cast %363 : vector<1x8x9xf32> to vector<8x9xf32>
    %365 = vector.shape_cast %359 : vector<8x9xf32> to vector<1x8x9xf32>
    tpu.vector_store %arg13[%c3_240, %c0_241, %c0_242], %365 {strides = array<i32>} : memref<4x8x9xf32, #tpu.memory_space<vmem>>, vector<1x8x9xf32>,
    return
  }
  func.func @transform_0(%arg0: i32) -> (i32, i32, i32) {
    %c0_i32 = arith.constant 0 : i32
    %c0_i32_0 = arith.constant 0 : i32
    %c0_i32_1 = arith.constant 0 : i32
    return %c0_i32, %arg0, %c0_i32_0 : i32, i32, i32
  }
  func.func @transform_1(%arg0: i32) -> (i32, i32, i32) {
    %c0_i32 = arith.constant 0 : i32
    %c0_i32_0 = arith.constant 0 : i32
    %c0_i32_1 = arith.constant 0 : i32
    %c0_i32_2 = arith.constant 0 : i32
    return %c0_i32, %c0_i32_0, %c0_i32_1 : i32, i32, i32
  }
  func.func @transform_2(%arg0: i32) -> (i32, i32, i32) {
    %c0_i32 = arith.constant 0 : i32
    %c0_i32_0 = arith.constant 0 : i32
    %c0_i32_1 = arith.constant 0 : i32
    %c0_i32_2 = arith.constant 0 : i32
    return %c0_i32, %c0_i32_0, %c0_i32_1 : i32, i32, i32
  }
  func.func @transform_3(%arg0: i32) -> (i32, i32, i32, i32) {
    %c0_i32 = arith.constant 0 : i32
    %c0_i32_0 = arith.constant 0 : i32
    %c0_i32_1 = arith.constant 0 : i32
    %c0_i32_2 = arith.constant 0 : i32
    %c0_i32_3 = arith.constant 0 : i32
    return %c0_i32, %c0_i32_0, %c0_i32_1, %c0_i32_2 : i32, i32, i32, i32
  }
  func.func @transform_4(%arg0: i32) -> (i32, i32, i32, i32) {
    %c0_i32 = arith.constant 0 : i32
    %c0_i32_0 = arith.constant 0 : i32
    %c0_i32_1 = arith.constant 0 : i32
    %c0_i32_2 = arith.constant 0 : i32
    %c0_i32_3 = arith.constant 0 : i32
    return %c0_i32, %c0_i32_0, %c0_i32_1, %c0_i32_2 : i32, i32, i32, i32
  }
  func.func @transform_5(%arg0: i32) -> (i32, i32, i32) {
    %c0_i32 = arith.constant 0 : i32
    %c0_i32_0 = arith.constant 0 : i32
    %c0_i32_1 = arith.constant 0 : i32
    %c0_i32_2 = arith.constant 0 : i32
    return %c0_i32, %c0_i32_0, %c0_i32_1 : i32, i32, i32
  }
  func.func @transform_6(%arg0: i32) -> (i32, i32, i32) {
    %c0_i32 = arith.constant 0 : i32
    %c0_i32_0 = arith.constant 0 : i32
    %c0_i32_1 = arith.constant 0 : i32
    %c0_i32_2 = arith.constant 0 : i32
    return %c0_i32, %c0_i32_0, %c0_i32_1 : i32, i32, i32
  }
  func.func @transform_7(%arg0: i32) -> (i32, i32, i32) {
    %c0_i32 = arith.constant 0 : i32
    %c0_i32_0 = arith.constant 0 : i32
    %c0_i32_1 = arith.constant 0 : i32
    %c0_i32_2 = arith.constant 0 : i32
    return %c0_i32, %c0_i32_0, %c0_i32_1 : i32, i32, i32
  }
  func.func @transform_8(%arg0: i32) -> (i32, i32, i32) {
    %c0_i32 = arith.constant 0 : i32
    %c0_i32_0 = arith.constant 0 : i32
    %c0_i32_1 = arith.constant 0 : i32
    %c0_i32_2 = arith.constant 0 : i32
    return %c0_i32, %c0_i32_0, %c0_i32_1 : i32, i32, i32
  }
  func.func @transform_9(%arg0: i32) -> (i32, i32) {
    %c0_i32 = arith.constant 0 : i32
    %c0_i32_0 = arith.constant 0 : i32
    %c0_i32_1 = arith.constant 0 : i32
    return %c0_i32, %c0_i32_0 : i32, i32
  }
  func.func @transform_10(%arg0: i32) -> (i32, i32) {
    %c0_i32 = arith.constant 0 : i32
    %c0_i32_0 = arith.constant 0 : i32
    %c0_i32_1 = arith.constant 0 : i32
    return %c0_i32, %c0_i32_0 : i32, i32
  }
  func.func @transform_11(%arg0: i32) -> (i32, i32, i32) {
    %c0_i32 = arith.constant 0 : i32
    %c0_i32_0 = arith.constant 0 : i32
    %c0_i32_1 = arith.constant 0 : i32
    return %c0_i32, %arg0, %c0_i32_0 : i32, i32, i32
  }
  func.func @transform_12(%arg0: i32) -> (i32, i32, i32) {
    %c0_i32 = arith.constant 0 : i32
    %c0_i32_0 = arith.constant 0 : i32
    %c0_i32_1 = arith.constant 0 : i32
    return %c0_i32, %arg0, %c0_i32_0 : i32, i32, i32
  }
}

</mosaic_0001>

<bundles_post_ra>
// kernel: tpu_custom_call.1
= control target key start
LH: loop header
LB: loop body
LE: loop exit
PB: predicated region body
PF: predicated region fallthrough
CT: control target
= control target key end

     0   :  { %18 = vsyncpa [#allocation3], 0  ;;  %vm55_vm0 = vcmask 1041408   ;;  %vm51_vm1 = vcmask 80896   ;;  %s1601_s0 = inlined_call_operand.vmem [shape: f32[4,8,10], index: 0, kind: input, shape index: {}]   ;;  %s1602_s1 = inlined_call_operand.vmem [shape: f32[4,10,32], index: 1, kind: input, shape index: {}]   ;;  %s1603_s2 = inlined_call_operand.vmem [shape: f32[4,1,32], index: 2, kind: input, shape index: {}]   ;;  %s1604_s3 = inlined_call_operand.vmem [shape: f32[4,2,32,32], index: 3, kind: input, shape index: {}]   ;;  %s1605_s4 = inlined_call_operand.vmem [shape: f32[4,2,1,32], index: 4, kind: input, shape index: {}]   ;;  %s1606_s5 = inlined_call_operand.vmem [shape: f32[4,32,9], index: 5, kind: input, shape index: {}]   ;;  %s1607_s6 = inlined_call_operand.vmem [shape: f32[4,1,9], index: 6, kind: input, shape index: {}]   ;;  %s1608_s7 = inlined_call_operand.vmem [shape: f32[4,32,9], index: 7, kind: input, shape index: {}]   ;;  %s1609_s8 = inlined_call_operand.vmem [shape: f32[4,1,9], index: 8, kind: input, shape index: {}]   ;;  %s1610_s9 = inlined_call_operand.vmem [shape: f32[1,9], index: 9, kind: input, shape index: {}]   ;;  %s1611_s10 = inlined_call_operand.vmem [shape: f32[1,9], index: 10, kind: input, shape index: {}]   ;;  %s1612_s11 = inlined_call_operand.hbm [shape: f32[4,8,9], index: 11, kind: output, shape index: {0}]   ;;  %s1613_s12 = inlined_call_operand.hbm [shape: f32[4,8,9], index: 12, kind: output, shape index: {1}]  }
   0x1   :  { %v46_v0 = vld [vmem:[%s1602_s1 + $0x8] sm:$0x3]  ;;  %v45_v1 = vld [vmem:[%s1602_s1] sm:$0xff] }
   0x2   :  { %939 = vmatpush.msk.msra.mxu0 %vm55_vm0, %v46_v0  ;;  %v44_v2 = vld [vmem:[%s1601_s0] sm:$0xff] }
   0x4   :  { %74 = vmatpush.msra.mxu0 %v45_v1 }
   0x5   :  { %940 = vmatmul.msk.f32.vlgmr.msra.gmra.mxu0 %vm51_vm1, %v44_v2 }
   0x6   :  { %19 = vsyncpa [#allocation5], 0  ;;  %v86_v3 = vld [vmem:[%s1604_s3 + $0x18] sm:$0xff]  ;;  %v85_v4 = vld [vmem:[%s1604_s3 + $0x10] sm:$0xff]  ;;  %vm91_vm2 = vcmask 261120   ;;  %vm255_vm3 = vcmask 72704  }
   0x7   :  { %107 = vmatpush.msra.mxu1 %v86_v3  ;;  %v84_v5 = vld [vmem:[%s1604_s3 + $0x8] sm:$0xff]  ;;  %v83_v6 = vld [vmem:[%s1604_s3] sm:$0xff]  ;;  %v952_v7 = vld [vmem:[%s1602_s1 + $0x18] sm:$0x3]  ;;  %s1174_s30 = smov [#allocation2]   ;;  %s909_s16 = sshll.u32 %s1612_s11, 4  ;;  %s910_s16 = int_to_ptr.hbm [resolvable:$true] %s909_s16 }
   0x8   :  { %v951_v8 = vld [vmem:[%s1602_s1 + $0x10] sm:$0xff]  ;;  %v1044_v9 = vld [vmem:[%s1603_s2] ss:$0 sm:$0xff]  ;;  %v950_v16 = vld [vmem:[%s1601_s0 + $0x8] sm:$0xff]  ;;  %s907_s13 = sshll.u32 %s1174_s30, 4  ;;  %s1176_s17 = smov 8   ;;  %s908_s13 = int_to_ptr.vmem [resolvable:$true] %s907_s13 }
   0x9   :  { %108 = vmatpush.msra.mxu1 %v85_v4  ;;  %v945_v17 = vld [vmem:[%s1604_s3 + $0x38] sm:$0xff]  ;;  %v944_v18 = vld [vmem:[%s1604_s3 + $0x30] sm:$0xff]  ;;  %v943_v19 = vld [vmem:[%s1604_s3 + $0x28] sm:$0xff]  ;;  %s922_s20 = sshll.u32 %s1613_s12, 4  ;;  %s923_s20 = int_to_ptr.hbm [resolvable:$true] %s922_s20 }
   0xa   :  { %144 = vmatpush.msra.mxu2 %v945_v17  ;;  %v942_v20 = vld [vmem:[%s1604_s3 + $0x20] sm:$0xff]  ;;  %v959_v21 = vld [vmem:[%s1604_s3 + $0x58] sm:$0xff]  ;;  %v958_v22 = vld [vmem:[%s1604_s3 + $0x50] sm:$0xff] }
   0xb   :  { %109 = vmatpush.msra.mxu1 %v84_v5  ;;  %v957_v23 = vld [vmem:[%s1604_s3 + $0x48] sm:$0xff]  ;;  %v956_v24 = vld [vmem:[%s1604_s3 + $0x40] sm:$0xff]  ;;  %v980_v41 = vld [vmem:[%s1601_s0 + $0x10] sm:$0xff] }
   0xc   :  { %145 = vmatpush.msra.mxu2 %v944_v18  ;;  %v1045_v25 = vld [vmem:[%s1605_s4] ss:$0 sm:$0xff]  ;;  %v1046_v29 = vld [vmem:[%s1603_s2 + $0x1] ss:$0 sm:$0xff]  ;;  %v982_v36 = vld [vmem:[%s1602_s1 + $0x28] sm:$0x3] }
   0xd   :  { %110 = vmatpush.msra.mxu1 %v83_v6  ;;  %v981_v37 = vld [vmem:[%s1602_s1 + $0x20] sm:$0xff]  ;;  %v159_v42 = vld [vmem:[%s1606_s5 + $0x18] sm:$0xff]  ;;  %v158_v44 = vld [vmem:[%s1606_s5 + $0x10] sm:$0xff] }
   0xe   :  { %146 = vmatpush.msra.mxu2 %v943_v19  ;;  %v190_v43 = vld [vmem:[%s1608_s7 + $0x18] sm:$0xff]  ;;  %179 = vmatpush.msra.mxu3 %v159_v42  ;;  %v189_v45 = vld [vmem:[%s1608_s7 + $0x10] sm:$0xff]  ;;  %v157_v46 = vld [vmem:[%s1606_s5 + $0x8] sm:$0xff] }
   0xf   :  { %954 = vmatpush.msk.msrb.mxu1 %vm55_vm0, %v952_v7  ;;  %207 = vmatpush.msrb.mxu0 %v190_v43  ;;  %v188_v47 = vld [vmem:[%s1608_s7 + $0x8] sm:$0xff]  ;;  %v156_v48 = vld [vmem:[%s1606_s5] sm:$0xff]  ;;  %v965_v50 = vld [vmem:[%s1604_s3 + $0x78] sm:$0xff] }
  0x10   :  { %147 = vmatpush.msra.mxu2 %v942_v20  ;;  %180 = vmatpush.msra.mxu3 %v158_v44  ;;  %v187_v49 = vld [vmem:[%s1608_s7] sm:$0xff]  ;;  %v964_v51 = vld [vmem:[%s1604_s3 + $0x70] sm:$0xff]  ;;  %v963_v52 = vld [vmem:[%s1604_s3 + $0x68] sm:$0xff] }
  0x11   :  { %289 = vmatpush.msrb.mxu1 %v951_v8  ;;  %208 = vmatpush.msrb.mxu0 %v189_v45  ;;  %v962_v53 = vld [vmem:[%s1604_s3 + $0x60] sm:$0xff]  ;;  %v989_v2 = vld [vmem:[%s1604_s3 + $0x98] sm:$0xff]  ;;  %v988_v4 = vld [vmem:[%s1604_s3 + $0x90] sm:$0xff] }
  0x12   :  { %323 = vmatpush.msrb.mxu2 %v959_v21  ;;  %181 = vmatpush.msra.mxu3 %v157_v46  ;;  %v1047_v54 = vld [vmem:[%s1605_s4 + $0x1] ss:$0 sm:$0xff]  ;;  %v1048_v58 = vld [vmem:[%s1605_s4 + $0x2] ss:$0 sm:$0xff]  ;;  %v987_v6 = vld [vmem:[%s1604_s3 + $0x88] sm:$0xff] }
  0x13   :  { %209 = vmatpush.msrb.mxu0 %v188_v47  ;;  %v1049_v0 = vld [vmem:[%s1603_s2 + $0x2] ss:$0 sm:$0xff]  ;;  %v1010_v17 = vld [vmem:[%s1601_s0 + $0x18] sm:$0xff]  ;;  %v970_v20 = vld [vmem:[%s1606_s5 + $0x30] sm:$0xff] }
  0x14   :  { %324 = vmatpush.msrb.mxu2 %v958_v22  ;;  %182 = vmatpush.msra.mxu3 %v156_v48  ;;  %v971_v18 = vld [vmem:[%s1606_s5 + $0x38] sm:$0xff]  ;;  %v976_v21 = vld [vmem:[%s1608_s7 + $0x30] sm:$0xff]  ;;  %v969_v22 = vld [vmem:[%s1606_s5 + $0x28] sm:$0xff] }
  0x15   :  { %210 = vmatpush.msrb.mxu0 %v187_v49  ;;  %v977_v19 = vld [vmem:[%s1608_s7 + $0x38] sm:$0xff]  ;;  %v1055_v48 = vld [vmem:[%s1605_s4 + $0x4] ss:$0 sm:$0xff] }
  0x16   :  { %325 = vmatpush.msrb.mxu2 %v957_v23  ;;  %360 = vmatpush.msrb.mxu3 %v965_v50  ;;  %v975_v23 = vld [vmem:[%s1608_s7 + $0x28] sm:$0xff] }
  0x17   :  { %397 = vmatpush.msra.mxu0 %v971_v18 }
  0x18   :  { %326 = vmatpush.msrb.mxu2 %v956_v24  ;;  %361 = vmatpush.msrb.mxu3 %v964_v51  ;;  %v968_v24 = vld [vmem:[%s1606_s5 + $0x20] sm:$0xff] }
  0x19   :  { %398 = vmatpush.msra.mxu0 %v970_v20 }
  0x1a   :  { %362 = vmatpush.msrb.mxu3 %v963_v52 }
  0x1b   :  { %399 = vmatpush.msra.mxu0 %v969_v22 }
  0x1c   :  { %363 = vmatpush.msrb.mxu3 %v962_v53 }
  0x1d   :  { %400 = vmatpush.msra.mxu0 %v968_v24 }
  0x82   :  { %v76_v10 = vpop.f32.mrf.mxu0 }
  0x83   :  { %v77_v11 = vadd.f32 %v1044_v9, %v76_v10  ;;  %v986_v10 = vld [vmem:[%s1604_s3 + $0x80] sm:$0xff] }
  0x85   :  { %v79_v12 = vmul.f32 0.5, %v77_v11 }
  0x87   :  { %1066 = vtanh.f32 %v79_v12 }
  0x8d   :  { %v1067_v13 = vpop.eup %1066 }
  0x8e   :  { %v81_v14 = vadd.f32 1.0, %v1067_v13  ;;  %v1011_v13 = vld [vmem:[%s1602_s1 + $0x30] sm:$0xff] }
  0x90   :  { %v82_v15 = vmul.f32 %v81_v14, %v79_v12  ;;  %v1012_v12 = vld [vmem:[%s1602_s1 + $0x38] sm:$0x3] }
  0x92   :  { %941 = vmatmul.msk.f32.vlgmr.msra.gmra.mxu1 %vm91_vm2, %v82_v15 }
  0x93   :  { %427 = vmatpush.msra.mxu1 %v977_v19 }
  0x95   :  { %428 = vmatpush.msra.mxu1 %v976_v21 }
  0x97   :  { %429 = vmatpush.msra.mxu1 %v975_v23 }
  0x9a   :  { %955 = vmatmul.msk.f32.vlgmr.msrb.gmra.mxu1 %vm51_vm1, %v950_v16 }
 0x10f   :  { %v112_v26 = vpop.f32.mrf.mxu1 }
 0x110   :  { %v113_v27 = vadd.f32 %v1045_v25, %v112_v26  ;;  %v974_v25 = vld [vmem:[%s1608_s7 + $0x20] sm:$0xff] }
 0x111   :  { %v1050_v26 = vld [vmem:[%s1609_s8] ss:$0 sm:$0xff]  ;;  %430 = vmatpush.msra.mxu1 %v974_v25 }
 0x112   :  { %v115_v28 = vmul.f32 0.5, %v113_v27  ;;  %v995_v27 = vld [vmem:[%s1604_s3 + $0xb8] sm:$0xff] }
 0x114   :  { %1068 = vtanh.f32 %v115_v28 }
 0x117   :  { %v291_v30 = vpop.f32.mrf.mxu1 }
 0x118   :  { %v292_v31 = vadd.f32 %v1046_v29, %v291_v30  ;;  %v994_v30 = vld [vmem:[%s1604_s3 + $0xb0] sm:$0xff] }
 0x11a   :  { %v1069_v32 = vpop.eup %1068  ;;  %v294_v33 = vmul.f32 0.5, %v292_v31 }
 0x11b   :  { %v117_v34 = vadd.f32 1.0, %v1069_v32  ;;  %v993_v32 = vld [vmem:[%s1604_s3 + $0xa8] sm:$0xff] }
 0x11c   :  { %1070 = vtanh.f32 %v294_v33 }
 0x11d   :  { %v118_v35 = vmul.f32 %v117_v34, %v115_v28  ;;  %v1429_v28 = vld [vmem:[%s1611_s10] ss:$0 sm:$0xff] }
 0x11e   :  { %v1053_v34 = vld [vmem:[%s1607_s6] ss:$0 sm:$0xff] }
 0x11f   :  { %947 = vmatmul.msk.f32.vlgmr.msra.gmra.mxu2 %vm91_vm2, %v118_v35  ;;  %v992_v35 = vld [vmem:[%s1604_s3 + $0xa0] sm:$0xff] }
 0x120   :  { %984 = vmatpush.msk.msra.mxu2 %vm55_vm0, %v982_v36 }
 0x122   :  { %v1071_v38 = vpop.eup %1070  ;;  %504 = vmatpush.msra.mxu2 %v981_v37 }
 0x123   :  { %v296_v39 = vadd.f32 1.0, %v1071_v38 }
 0x125   :  { %v297_v40 = vmul.f32 %v296_v39, %v294_v33 }
 0x127   :  { %961 = vmatmul.msk.f32.vlgmr.msrb.gmra.mxu2 %vm91_vm2, %v297_v40 }
 0x12f   :  { %985 = vmatmul.msk.f32.vlgmr.msra.gmra.mxu2 %vm51_vm1, %v980_v41  ;;  %v1054_v41 = vld [vmem:[%s1605_s4 + $0x3] ss:$0 sm:$0xff] }
 0x1a2   :  { %v149_v55 = vpop.f32.mrf.mxu2 }
 0x1a3   :  { %v150_v56 = vadd.f32 %v1047_v54, %v149_v55 }
 0x1a5   :  { %v152_v57 = vmul.f32 0.5, %v150_v56 }
 0x1a7   :  { %1072 = vtanh.f32 %v152_v57 }
 0x1aa   :  { %v328_v59 = vpop.f32.mrf.mxu2 }
 0x1ab   :  { %v329_v60 = vadd.f32 %v1048_v58, %v328_v59  ;;  %v1056_v59 = vld [vmem:[%s1603_s2 + $0x3] ss:$0 sm:$0xff] }
 0x1ad   :  { %v1073_v61 = vpop.eup %1072  ;;  %v331_v62 = vmul.f32 0.5, %v329_v60 }
 0x1ae   :  { %v154_v63 = vadd.f32 1.0, %v1073_v61 }
 0x1af   :  { %1074 = vtanh.f32 %v331_v62 }
 0x1b0   :  { %v155_v1 = vmul.f32 %v154_v63, %v152_v57 }
 0x1b2   :  { %948 = vmatmul.msk.f32.vlgmr.msra.gmra.mxu3 %vm91_vm2, %v155_v1  ;;  %949 = vmatmul.msk.f32.vlgmr.msrb.gmra.mxu0 %vm91_vm2, %v155_v1  ;;  %v506_v3 = vpop.f32.mrf.mxu2  ;;  %v1460_v1 = vld [vmem:[%s1610_s9] ss:$0 sm:$0xff] }
 0x1b3   :  { %v507_v5 = vadd.f32 %v1049_v0, %v506_v3  ;;  %538 = vmatpush.msra.mxu3 %v989_v2  ;;  %575 = vmatpush.msrb.mxu0 %v995_v27  ;;  %v1018_v3 = vld [vmem:[%s1604_s3 + $0xd0] sm:$0xff] }
 0x1b5   :  { %v1075_v7 = vpop.eup %1074  ;;  %v509_v8 = vmul.f32 0.5, %v507_v5  ;;  %539 = vmatpush.msra.mxu3 %v988_v4  ;;  %576 = vmatpush.msrb.mxu0 %v994_v30 }
 0x1b6   :  { %v333_v9 = vadd.f32 1.0, %v1075_v7 }
 0x1b7   :  { %1076 = vtanh.f32 %v509_v8  ;;  %540 = vmatpush.msra.mxu3 %v987_v6  ;;  %577 = vmatpush.msrb.mxu0 %v993_v32  ;;  %v1017_v6 = vld [vmem:[%s1604_s3 + $0xc8] sm:$0xff]  ;;  %v1001_v32 = vld [vmem:[%s1606_s5 + $0x58] sm:$0xff] }
 0x1b8   :  { %v334_v11 = vmul.f32 %v333_v9, %v331_v62  ;;  %v1019_v62 = vld [vmem:[%s1604_s3 + $0xd8] sm:$0xff]  ;;  %612 = vmatpush.msrb.mxu1 %v1001_v32 }
 0x1b9   :  { %541 = vmatpush.msra.mxu3 %v986_v10  ;;  %578 = vmatpush.msrb.mxu0 %v992_v35  ;;  %v1006_v35 = vld [vmem:[%s1608_s7 + $0x50] sm:$0xff] }
 0x1ba   :  { %967 = vmatmul.msk.f32.vlgmr.msrb.gmra.mxu3 %vm91_vm2, %v334_v11  ;;  %v1016_v11 = vld [vmem:[%s1604_s3 + $0xc0] sm:$0xff] }
 0x1bb   :  { %1014 = vmatpush.msk.msrb.mxu3 %vm55_vm0, %v1012_v12 }
 0x1bd   :  { %v1077_v14 = vpop.eup %1076  ;;  %719 = vmatpush.msrb.mxu3 %v1011_v13 }
 0x1be   :  { %v511_v15 = vadd.f32 1.0, %v1077_v14 }
 0x1c0   :  { %v512_v16 = vmul.f32 %v511_v15, %v509_v8 }
 0x1c2   :  { %991 = vmatmul.msk.f32.vlgmr.msra.gmra.mxu3 %vm91_vm2, %v512_v16 }
 0x1ca   :  { %1015 = vmatmul.msk.f32.vlgmr.msrb.gmra.mxu3 %vm51_vm1, %v1010_v17 }
 0x22f   :  { %v212_v29 = vpop.f32.mrf.mxu0 }
 0x230   :  { %v213_v31 = vadd.f32 %v1050_v26, %v212_v29 }
 0x232   :  { %v218_v33 = vsub.f32 %v1429_v28, %v213_v31 }
 0x234   :  { %v220_v36 = vand.u32 2147483647, %v218_v33  ;;  %v219_v60 = vmax.f32 %v218_v33, 0.0  ;;  %v1007_v33 = vld [vmem:[%s1608_s7 + $0x58] sm:$0xff] }
 0x235   :  { %v184_v37 = vpop.f32.mrf.mxu3  ;;  %642 = vmatpush.msrb.mxu2 %v1007_v33 }
 0x236   :  { %v221_v38 = vsub.f32 0.0, %v220_v36  ;;  %v185_v39 = vadd.f32 %v1053_v34, %v184_v37  ;;  %v1000_v34 = vld [vmem:[%s1606_s5 + $0x50] sm:$0xff]  ;;  %v999_v36 = vld [vmem:[%s1606_s5 + $0x48] sm:$0xff] }
 0x237   :  { %613 = vmatpush.msrb.mxu1 %v1000_v34  ;;  %643 = vmatpush.msrb.mxu2 %v1006_v35  ;;  %v1005_v37 = vld [vmem:[%s1608_s7 + $0x48] sm:$0xff]  ;;  %v1037_v34 = vld [vmem:[%s1608_s7 + $0x78] sm:$0xff] }
 0x238   :  { %v222_v40 = vmul.f32 1.442695, %v221_v38  ;;  %256 = vst.msk [vmem:[#allocation2] sm:$0xff] %vm255_vm3, %v185_v39  ;;  %v998_v38 = vld [vmem:[%s1606_s5 + $0x40] sm:$0xff]  ;;  %v1031_v35 = vld [vmem:[%s1606_s5 + $0x78] sm:$0xff]  ;;  %857 = vmatpush.msra.mxu3 %v1037_v34 }
 0x239   :  { %614 = vmatpush.msrb.mxu1 %v999_v36  ;;  %644 = vmatpush.msrb.mxu2 %v1005_v37  ;;  %v1004_v39 = vld [vmem:[%s1608_s7 + $0x40] sm:$0xff]  ;;  %v1036_v36 = vld [vmem:[%s1608_s7 + $0x70] sm:$0xff] }
 0x23a   :  { %1078 = vpow2.f32 %v222_v40  ;;  %v1025_v40 = vld [vmem:[%s1604_s3 + $0xf8] sm:$0xff]  ;;  %v1030_v37 = vld [vmem:[%s1606_s5 + $0x70] sm:$0xff]  ;;  %858 = vmatpush.msra.mxu3 %v1036_v36 }
 0x23b   :  { %615 = vmatpush.msrb.mxu1 %v998_v38  ;;  %645 = vmatpush.msrb.mxu2 %v1004_v39  ;;  %v1035_v38 = vld [vmem:[%s1608_s7 + $0x68] sm:$0xff] }
 0x23c   :  { %v1029_v39 = vld [vmem:[%s1606_s5 + $0x68] sm:$0xff]  ;;  %859 = vmatpush.msra.mxu3 %v1035_v38 }
 0x23d   :  { %v365_v42 = vpop.f32.mrf.mxu3  ;;  %827 = vmatpush.msra.mxu2 %v1031_v35 }
 0x23e   :  { %v366_v43 = vadd.f32 %v1054_v41, %v365_v42  ;;  %v1024_v41 = vld [vmem:[%s1604_s3 + $0xf0] sm:$0xff]  ;;  %v1023_v42 = vld [vmem:[%s1604_s3 + $0xe8] sm:$0xff] }
 0x23f   :  { %828 = vmatpush.msra.mxu2 %v1030_v37 }
 0x240   :  { %v1079_v44 = vpop.eup %1078  ;;  %v368_v45 = vmul.f32 0.5, %v366_v43  ;;  %v1057_v43 = vld [vmem:[%s1607_s6 + $0x1] ss:$0 sm:$0xff] }
 0x241   :  { %v224_v46 = vadd.f32 1.0, %v1079_v44  ;;  %v227_v47 = vmul.f32 -0.5, %v1079_v44  ;;  %v230_v52 = vand.u32 2147483647, %v1079_v44  ;;  %829 = vmatpush.msra.mxu2 %v1029_v39 }
 0x242   :  { %1080 = vtanh.f32 %v368_v45 }
 0x243   :  { %1082 = vlog2.f32 %v224_v46  ;;  %v228_v50 = vadd.f32 1.0, %v227_v47  ;;  %vm231_vm4 = vcmp.lt.f32.partialorder %v230_v52, 0.0004427343  ;;  %v1059_v52 = vld [vmem:[%s1605_s4 + $0x5] ss:$0 sm:$0xff] }
 0x245   :  { %v543_v49 = vpop.f32.mrf.mxu3  ;;  %v229_v58 = vmul.f32 %v1079_v44, %v228_v50  ;;  %v1058_v44 = vld [vmem:[%s1609_s8 + $0x1] ss:$0 sm:$0xff] }
 0x246   :  { %v544_v51 = vadd.f32 %v1055_v48, %v543_v49 }
 0x248   :  { %v1081_v53 = vpop.eup %1080  ;;  %v546_v54 = vmul.f32 0.5, %v544_v51 }
 0x249   :  { %v1083_v55 = vpop.eup %1082  ;;  %v370_v56 = vadd.f32 1.0, %v1081_v53 }
 0x24a   :  { %v226_v57 = vmul.f32 0.6931472, %v1083_v55  ;;  %1084 = vtanh.f32 %v546_v54 }
 0x24b   :  { %v371_v61 = vmul.f32 %v370_v56, %v368_v45  ;;  %v1022_v45 = vld [vmem:[%s1604_s3 + $0xe0] sm:$0xff] }
 0x24c   :  { %v232_v63 = vsel %vm231_vm4, %v229_v58, %v226_v57  ;;  %v1060_v58 = vld [vmem:[%s1605_s4 + $0x6] ss:$0 sm:$0xff] }
 0x24d   :  { %v233_v0 = vadd.f32 %v232_v63, %v219_v60  ;;  %973 = vmatmul.msk.f32.vlgmr.msra.gmra.mxu0 %vm91_vm2, %v371_v61  ;;  %979 = vmatmul.msk.f32.vlgmr.msra.gmra.mxu1 %vm91_vm2, %v371_v61  ;;  %v721_v2 = vpop.f32.mrf.mxu3 }
 0x24e   :  { %v722_v4 = vadd.f32 %v1056_v59, %v721_v2  ;;  %753 = vmatpush.msra.mxu0 %v1019_v62  ;;  %790 = vmatpush.msra.mxu1 %v1025_v40  ;;  %v1034_v40 = vld [vmem:[%s1608_s7 + $0x60] sm:$0xff] }
 0x24f   :  { %v234_v5 = vsub.f32 %v1429_v28, %v233_v0  ;;  %860 = vmatpush.msra.mxu3 %v1034_v40 }
 0x250   :  { %v1085_v7 = vpop.eup %1084  ;;  %v724_v8 = vmul.f32 0.5, %v722_v4  ;;  %754 = vmatpush.msra.mxu0 %v1018_v3  ;;  %791 = vmatpush.msra.mxu1 %v1024_v41  ;;  %v1028_v41 = vld [vmem:[%s1606_s5 + $0x60] sm:$0xff] }
 0x251   :  { %v238_v9 = vsub.f32 %v234_v5, %v1460_v1  ;;  %v548_v10 = vadd.f32 1.0, %v1085_v7  ;;  %830 = vmatpush.msra.mxu2 %v1028_v41 }
 0x252   :  { %1086 = vtanh.f32 %v724_v8  ;;  %755 = vmatpush.msra.mxu0 %v1017_v6  ;;  %792 = vmatpush.msra.mxu1 %v1023_v42  ;;  %v1061_v42 = vld [vmem:[%s1607_s6 + $0x2] ss:$0 sm:$0xff] }
 0x253   :  { %v240_v12 = vand.u32 2147483647, %v238_v9  ;;  %v549_v13 = vmul.f32 %v548_v10, %v546_v54  ;;  %v239_v27 = vmax.f32 %v238_v9, 0.0 }
 0x254   :  { %756 = vmatpush.msra.mxu0 %v1016_v11  ;;  %793 = vmatpush.msra.mxu1 %v1022_v45  ;;  %v1062_v45 = vld [vmem:[%s1609_s8 + $0x2] ss:$0 sm:$0xff] }
 0x255   :  { %v241_v14 = vsub.f32 0.0, %v240_v12  ;;  %997 = vmatmul.msk.f32.vlgmr.msrb.gmra.mxu0 %vm91_vm2, %v549_v13 }
 0x257   :  { %v242_v15 = vmul.f32 1.442695, %v241_v14 }
 0x258   :  { %v1087_v16 = vpop.eup %1086 }
 0x259   :  { %1088 = vpow2.f32 %v242_v15  ;;  %v726_v17 = vadd.f32 1.0, %v1087_v16 }
 0x25b   :  { %v727_v18 = vmul.f32 %v726_v17, %v724_v8 }
 0x25d   :  { %1021 = vmatmul.msk.f32.vlgmr.msra.gmra.mxu0 %vm91_vm2, %v727_v18 }
 0x25f   :  { %v1089_v19 = vpop.eup %1088 }
 0x260   :  { %v244_v20 = vadd.f32 1.0, %v1089_v19  ;;  %v247_v21 = vmul.f32 -0.5, %v1089_v19  ;;  %v250_v23 = vand.u32 2147483647, %v1089_v19 }
 0x262   :  { %1090 = vlog2.f32 %v244_v20  ;;  %v248_v22 = vadd.f32 1.0, %v247_v21  ;;  %vm251_vm5 = vcmp.lt.f32.partialorder %v250_v23, 0.0004427343 }
 0x264   :  { %v249_v26 = vmul.f32 %v1089_v19, %v248_v22 }
 0x268   :  { %v1091_v24 = vpop.eup %1090 }
 0x269   :  { %v246_v25 = vmul.f32 0.6931472, %v1091_v24 }
 0x26b   :  { %v252_v29 = vsel %vm251_vm5, %v249_v26, %v246_v25 }
 0x26c   :  { %v253_v30 = vadd.f32 %v252_v29, %v239_v27 }
 0x26e   :  { %v254_v31 = vadd.f32 %v1460_v1, %v253_v30 }
 0x270   :  { %257 = vst.msk [vmem:[#allocation4] sm:$0xff] %vm255_vm3, %v254_v31 }
 0x2ca   :  { %v402_v46 = vpop.f32.mrf.mxu0  ;;  %v432_v47 = vpop.f32.mrf.mxu1 }
 0x2cb   :  { %v403_v48 = vadd.f32 %v1057_v43, %v402_v46  ;;  %v433_v49 = vadd.f32 %v1058_v44, %v432_v47  ;;  %v1063_v46 = vld [vmem:[%s1605_s4 + $0x7] ss:$0 sm:$0xff] }
 0x2cd   :  { %470 = vst.msk [vmem:[#allocation2 + $0x8] sm:$0xff] %vm255_vm3, %v403_v48  ;;  %v435_v50 = vsub.f32 %v1429_v28, %v433_v49 }
 0x2cf   :  { %v437_v51 = vand.u32 2147483647, %v435_v50  ;;  %v436_v11 = vmax.f32 %v435_v50, 0.0 }
 0x2d1   :  { %v438_v53 = vsub.f32 0.0, %v437_v51 }
 0x2d2   :  { %v580_v54 = vpop.f32.mrf.mxu0 }
 0x2d3   :  { %v439_v55 = vmul.f32 1.442695, %v438_v53  ;;  %v581_v56 = vadd.f32 %v1059_v52, %v580_v54 }
 0x2d5   :  { %1092 = vpow2.f32 %v439_v55  ;;  %v583_v57 = vmul.f32 0.5, %v581_v56 }
 0x2d7   :  { %1094 = vtanh.f32 %v583_v57 }
 0x2da   :  { %v758_v59 = vpop.f32.mrf.mxu0 }
 0x2db   :  { %v1093_v60 = vpop.eup %1092  ;;  %v759_v61 = vadd.f32 %v1060_v58, %v758_v59 }
 0x2dc   :  { %v441_v62 = vadd.f32 1.0, %v1093_v60  ;;  %v444_v0 = vmul.f32 -0.5, %v1093_v60  ;;  %v447_v6 = vand.u32 2147483647, %v1093_v60 }
 0x2dd   :  { %v1095_v63 = vpop.eup %1094  ;;  %v761_v2 = vmul.f32 0.5, %v759_v61 }
 0x2de   :  { %1096 = vlog2.f32 %v441_v62  ;;  %v585_v3 = vadd.f32 1.0, %v1095_v63  ;;  %v445_v5 = vadd.f32 1.0, %v444_v0  ;;  %vm448_vm6 = vcmp.lt.f32.partialorder %v447_v6, 0.0004427343 }
 0x2df   :  { %1098 = vtanh.f32 %v761_v2 }
 0x2e0   :  { %v586_v4 = vmul.f32 %v585_v3, %v583_v57  ;;  %v446_v10 = vmul.f32 %v1093_v60, %v445_v5 }
 0x2e2   :  { %1003 = vmatmul.msk.f32.vlgmr.msrb.gmra.mxu1 %vm91_vm2, %v586_v4  ;;  %1009 = vmatmul.msk.f32.vlgmr.msrb.gmra.mxu2 %vm91_vm2, %v586_v4 }
 0x2e4   :  { %v1097_v7 = vpop.eup %1096 }
 0x2e5   :  { %v1099_v8 = vpop.eup %1098  ;;  %v443_v9 = vmul.f32 0.6931472, %v1097_v7 }
 0x2e6   :  { %v763_v12 = vadd.f32 1.0, %v1099_v8 }
 0x2e7   :  { %v449_v13 = vsel %vm448_vm6, %v446_v10, %v443_v9 }
 0x2e8   :  { %v450_v14 = vadd.f32 %v449_v13, %v436_v11  ;;  %v764_v15 = vmul.f32 %v763_v12, %v761_v2 }
 0x2ea   :  { %v451_v16 = vsub.f32 %v1429_v28, %v450_v14  ;;  %1027 = vmatmul.msk.f32.vlgmr.msra.gmra.mxu1 %vm91_vm2, %v764_v15 }
 0x2ec   :  { %v452_v17 = vsub.f32 %v451_v16, %v1460_v1 }
 0x2ee   :  { %v454_v18 = vand.u32 2147483647, %v452_v17  ;;  %v453_v30 = vmax.f32 %v452_v17, 0.0 }
 0x2f0   :  { %v455_v19 = vsub.f32 0.0, %v454_v18 }
 0x2f2   :  { %v456_v20 = vmul.f32 1.442695, %v455_v19 }
 0x2f4   :  { %1100 = vpow2.f32 %v456_v20 }
 0x2fa   :  { %v1101_v21 = vpop.eup %1100 }
 0x2fb   :  { %v458_v22 = vadd.f32 1.0, %v1101_v21  ;;  %v461_v23 = vmul.f32 -0.5, %v1101_v21  ;;  %v464_v25 = vand.u32 2147483647, %v1101_v21 }
 0x2fd   :  { %1102 = vlog2.f32 %v458_v22  ;;  %v462_v24 = vadd.f32 1.0, %v461_v23  ;;  %vm465_vm7 = vcmp.lt.f32.partialorder %v464_v25, 0.0004427343  ;;  %v1065_v25 = vld [vmem:[%s1609_s8 + $0x3] ss:$0 sm:$0xff]  ;;  %s1177_s8 = smov [#allocation4]  }
 0x2fe   :  { %s920_s11 = sshll.u32 %s1177_s8, 4  ;;  %s921_s11 = int_to_ptr.vmem [resolvable:$true] %s920_s11 }
 0x2ff   :  { %v463_v29 = vmul.f32 %v1101_v21, %v462_v24  ;;  %v1064_v24 = vld [vmem:[%s1607_s6 + $0x3] ss:$0 sm:$0xff]  ;;  %s1175_s6 = smov 128  }
 0x303   :  { %v1103_v26 = vpop.eup %1102 }
 0x304   :  { %v460_v27 = vmul.f32 0.6931472, %v1103_v26 }
 0x306   :  { %v466_v31 = vsel %vm465_vm7, %v463_v29, %v460_v27 }
 0x307   :  { %v467_v32 = vadd.f32 %v466_v31, %v453_v30 }
 0x309   :  { %v468_v33 = vadd.f32 %v1460_v1, %v467_v32 }
 0x30b   :  { %472 = vst.msk [vmem:[#allocation4 + $0x8] sm:$0xff] %vm255_vm3, %v468_v33 }
 0x35f   :  { %v617_v43 = vpop.f32.mrf.mxu1 }
 0x360   :  { %v618_v44 = vadd.f32 %v1061_v42, %v617_v43 }
 0x362   :  { %685 = vst.msk [vmem:[#allocation2 + $0x10] sm:$0xff] %vm255_vm3, %v618_v44 }
 0x365   :  { %v647_v47 = vpop.f32.mrf.mxu2 }
 0x366   :  { %v648_v48 = vadd.f32 %v1062_v45, %v647_v47 }
 0x367   :  { %v795_v49 = vpop.f32.mrf.mxu1 }
 0x368   :  { %v650_v50 = vsub.f32 %v1429_v28, %v648_v48  ;;  %v796_v51 = vadd.f32 %v1063_v46, %v795_v49 }
 0x36a   :  { %v652_v52 = vand.u32 2147483647, %v650_v50  ;;  %v798_v53 = vmul.f32 0.5, %v796_v51  ;;  %v651_v4 = vmax.f32 %v650_v50, 0.0 }
 0x36c   :  { %v653_v54 = vsub.f32 0.0, %v652_v52  ;;  %1104 = vtanh.f32 %v798_v53 }
 0x36e   :  { %v654_v55 = vmul.f32 1.442695, %v653_v54 }
 0x370   :  { %1106 = vpow2.f32 %v654_v55 }
 0x372   :  { %v1105_v56 = vpop.eup %1104 }
 0x373   :  { %v800_v57 = vadd.f32 1.0, %v1105_v56 }
 0x375   :  { %v801_v58 = vmul.f32 %v800_v57, %v798_v53 }
 0x376   :  { %v1107_v59 = vpop.eup %1106 }
 0x377   :  { %v656_v60 = vadd.f32 1.0, %v1107_v59  ;;  %1033 = vmatmul.msk.f32.vlgmr.msra.gmra.mxu2 %vm91_vm2, %v801_v58  ;;  %1039 = vmatmul.msk.f32.vlgmr.msra.gmra.mxu3 %vm91_vm2, %v801_v58  ;;  %v659_v61 = vmul.f32 -0.5, %v1107_v59  ;;  %v662_v63 = vand.u32 2147483647, %v1107_v59 }
 0x379   :  { %1108 = vlog2.f32 %v656_v60  ;;  %v660_v62 = vadd.f32 1.0, %v659_v61  ;;  %vm663_vm8 = vcmp.lt.f32.partialorder %v662_v63, 0.0004427343 }
 0x37b   :  { %v661_v3 = vmul.f32 %v1107_v59, %v660_v62 }
 0x37f   :  { %v1109_v0 = vpop.eup %1108 }
 0x380   :  { %v658_v2 = vmul.f32 0.6931472, %v1109_v0 }
 0x382   :  { %v664_v5 = vsel %vm663_vm8, %v661_v3, %v658_v2 }
 0x383   :  { %v665_v6 = vadd.f32 %v664_v5, %v651_v4 }
 0x385   :  { %v666_v7 = vsub.f32 %v1429_v28, %v665_v6 }
 0x387   :  { %v667_v8 = vsub.f32 %v666_v7, %v1460_v1 }
 0x389   :  { %v669_v9 = vand.u32 2147483647, %v667_v8  ;;  %v668_v20 = vmax.f32 %v667_v8, 0.0 }
 0x38b   :  { %v670_v10 = vsub.f32 0.0, %v669_v9 }
 0x38d   :  { %v671_v11 = vmul.f32 1.442695, %v670_v10 }
 0x38f   :  { %1110 = vpow2.f32 %v671_v11 }
 0x395   :  { %v1111_v12 = vpop.eup %1110 }
 0x396   :  { %v673_v13 = vadd.f32 1.0, %v1111_v12  ;;  %v676_v14 = vmul.f32 -0.5, %v1111_v12  ;;  %v679_v16 = vand.u32 2147483647, %v1111_v12 }
 0x398   :  { %1112 = vlog2.f32 %v673_v13  ;;  %v677_v15 = vadd.f32 1.0, %v676_v14  ;;  %vm680_vm9 = vcmp.lt.f32.partialorder %v679_v16, 0.0004427343 }
 0x39a   :  { %v678_v19 = vmul.f32 %v1111_v12, %v677_v15 }
 0x39e   :  { %v1113_v17 = vpop.eup %1112 }
 0x39f   :  { %v675_v18 = vmul.f32 0.6931472, %v1113_v17 }
 0x3a1   :  { %v681_v21 = vsel %vm680_vm9, %v678_v19, %v675_v18 }
 0x3a2   :  { %v682_v22 = vadd.f32 %v681_v21, %v668_v20 }
 0x3a4   :  { %v683_v23 = vadd.f32 %v1460_v1, %v682_v22 }
 0x3a6   :  { %687 = vst.msk [vmem:[#allocation4 + $0x10] sm:$0xff] %vm255_vm3, %v683_v23 }
 0x3fa   :  { %v832_v26 = vpop.f32.mrf.mxu2  ;;  %v862_v27 = vpop.f32.mrf.mxu3 }
 0x3fb   :  { %v833_v29 = vadd.f32 %v1064_v24, %v832_v26  ;;  %v863_v30 = vadd.f32 %v1065_v25, %v862_v27 }
 0x3fd   :  { %900 = vst.msk [vmem:[#allocation2 + $0x18] sm:$0xff] %vm255_vm3, %v833_v29  ;;  %v865_v31 = vsub.f32 %v1429_v28, %v863_v30 }
 0x3fe   :  { %915 = dma.vmem_to_hbm [thread:$0]  %s908_s13, 512, %s910_s16, [#allocation3], %s1175_s6, %s1175_s6, %s1176_s17  }
 0x3ff   :  { %v867_v32 = vand.u32 2147483647, %v865_v31  ;;  %v866_v43 = vmax.f32 %v865_v31, 0.0 }
 0x401   :  { %v868_v33 = vsub.f32 0.0, %v867_v32 }
 0x403   :  { %v869_v34 = vmul.f32 1.442695, %v868_v33 }
 0x405   :  { %1114 = vpow2.f32 %v869_v34 }
 0x40b   :  { %v1115_v35 = vpop.eup %1114 }
 0x40c   :  { %v871_v36 = vadd.f32 1.0, %v1115_v35  ;;  %v874_v37 = vmul.f32 -0.5, %v1115_v35  ;;  %v877_v39 = vand.u32 2147483647, %v1115_v35 }
 0x40e   :  { %1116 = vlog2.f32 %v871_v36  ;;  %v875_v38 = vadd.f32 1.0, %v874_v37  ;;  %vm878_vm10 = vcmp.lt.f32.partialorder %v877_v39, 0.0004427343 }
 0x410   :  { %v876_v42 = vmul.f32 %v1115_v35, %v875_v38 }
 0x414   :  { %v1117_v40 = vpop.eup %1116 }
 0x415   :  { %v873_v41 = vmul.f32 0.6931472, %v1117_v40 }
 0x417   :  { %v879_v44 = vsel %vm878_vm10, %v876_v42, %v873_v41 }
 0x418   :  { %v880_v45 = vadd.f32 %v879_v44, %v866_v43 }
 0x41a   :  { %v881_v46 = vsub.f32 %v1429_v28, %v880_v45 }
 0x41c   :  { %v882_v47 = vsub.f32 %v881_v46, %v1460_v1 }
 0x41e   :  { %v884_v48 = vand.u32 2147483647, %v882_v47  ;;  %v883_v59 = vmax.f32 %v882_v47, 0.0 }
 0x420   :  { %v885_v49 = vsub.f32 0.0, %v884_v48 }
 0x422   :  { %v886_v50 = vmul.f32 1.442695, %v885_v49 }
 0x424   :  { %1118 = vpow2.f32 %v886_v50 }
 0x42a   :  { %v1119_v51 = vpop.eup %1118 }
 0x42b   :  { %v888_v52 = vadd.f32 1.0, %v1119_v51  ;;  %v891_v53 = vmul.f32 -0.5, %v1119_v51  ;;  %v894_v55 = vand.u32 2147483647, %v1119_v51 }
 0x42d   :  { %1120 = vlog2.f32 %v888_v52  ;;  %v892_v54 = vadd.f32 1.0, %v891_v53  ;;  %vm895_vm11 = vcmp.lt.f32.partialorder %v894_v55, 0.0004427343 }
 0x42f   :  { %v893_v58 = vmul.f32 %v1119_v51, %v892_v54 }
 0x433   :  { %v1121_v56 = vpop.eup %1120 }
 0x434   :  { %v890_v57 = vmul.f32 0.6931472, %v1121_v56 }
 0x436   :  { %v896_v60 = vsel %vm895_vm11, %v893_v58, %v890_v57 }
 0x437   :  { %v897_v28 = vadd.f32 %v896_v60, %v883_v59 }
 0x439   :  { %v898_v61 = vadd.f32 %v1460_v1, %v897_v28 }
 0x43b   :  { %902 = vst.msk [vmem:[#allocation4 + $0x18] sm:$0xff] %vm255_vm3, %v898_v61 }
 0x43c   :  { %928 = dma.vmem_to_hbm [thread:$0]  %s921_s11, 512, %s923_s20, [#allocation5], %s1175_s6, %s1175_s6, %s1176_s17  }
 0x43d   :  { %1170 = dma.done.wait [#allocation3], 512  }
 0x43e   :  { %1171 = vsyncadd [#allocation3], 4294966784 }
 0x43f   :  { %1172 = dma.done.wait [#allocation5], 512  }
 0x440   :  { %1173 = vsyncadd [#allocation5], 4294966784 }
 0x441   :  { %937 = vsyncpa [#allocation3], 1 }
 0x442   :  { %938 = vsyncpa [#allocation5], 1 }

// kernel: tpu_custom_call.1
= control target key start
LH: loop header
LB: loop body
LE: loop exit
PB: predicated region body
PF: predicated region fallthrough
CT: control target
= control target key end

     0   :  { %18 = vsyncpa [#allocation3], 0  ;;  %vm55_vm0 = vcmask 1041408   ;;  %vm51_vm1 = vcmask 80896   ;;  %s1601_s0 = inlined_call_operand.vmem [shape: f32[4,8,10], index: 0, kind: input, shape index: {}]   ;;  %s1602_s1 = inlined_call_operand.vmem [shape: f32[4,10,32], index: 1, kind: input, shape index: {}]   ;;  %s1603_s2 = inlined_call_operand.vmem [shape: f32[4,1,32], index: 2, kind: input, shape index: {}]   ;;  %s1604_s3 = inlined_call_operand.vmem [shape: f32[4,2,32,32], index: 3, kind: input, shape index: {}]   ;;  %s1605_s4 = inlined_call_operand.vmem [shape: f32[4,2,1,32], index: 4, kind: input, shape index: {}]   ;;  %s1606_s5 = inlined_call_operand.vmem [shape: f32[4,32,9], index: 5, kind: input, shape index: {}]   ;;  %s1607_s6 = inlined_call_operand.vmem [shape: f32[4,1,9], index: 6, kind: input, shape index: {}]   ;;  %s1608_s7 = inlined_call_operand.vmem [shape: f32[4,32,9], index: 7, kind: input, shape index: {}]   ;;  %s1609_s8 = inlined_call_operand.vmem [shape: f32[4,1,9], index: 8, kind: input, shape index: {}]   ;;  %s1610_s9 = inlined_call_operand.vmem [shape: f32[1,9], index: 9, kind: input, shape index: {}]   ;;  %s1611_s10 = inlined_call_operand.vmem [shape: f32[1,9], index: 10, kind: input, shape index: {}]   ;;  %s1612_s11 = inlined_call_operand.hbm [shape: f32[4,8,9], index: 11, kind: output, shape index: {0}]   ;;  %s1613_s12 = inlined_call_operand.hbm [shape: f32[4,8,9], index: 12, kind: output, shape index: {1}]  }
   0x1   :  { %v46_v0 = vld [vmem:[%s1602_s1 + $0x8] sm:$0x3]  ;;  %v45_v1 = vld [vmem:[%s1602_s1] sm:$0xff] }
   0x2   :  { %939 = vmatpush.msk.msra.mxu0 %vm55_vm0, %v46_v0  ;;  %v44_v2 = vld [vmem:[%s1601_s0] sm:$0xff] }
   0x4   :  { %74 = vmatpush.msra.mxu0 %v45_v1 }
   0x5   :  { %940 = vmatmul.msk.f32.vlgmr.msra.gmra.mxu0 %vm51_vm1, %v44_v2 }
   0x6   :  { %19 = vsyncpa [#allocation5], 0  ;;  %v86_v3 = vld [vmem:[%s1604_s3 + $0x18] sm:$0xff]  ;;  %v85_v4 = vld [vmem:[%s1604_s3 + $0x10] sm:$0xff]  ;;  %vm91_vm2 = vcmask 261120   ;;  %vm255_vm3 = vcmask 72704  }
   0x7   :  { %107 = vmatpush.msra.mxu1 %v86_v3  ;;  %v84_v5 = vld [vmem:[%s1604_s3 + $0x8] sm:$0xff]  ;;  %v83_v6 = vld [vmem:[%s1604_s3] sm:$0xff]  ;;  %v952_v7 = vld [vmem:[%s1602_s1 + $0x18] sm:$0x3]  ;;  %s1174_s30 = smov [#allocation2]   ;;  %s909_s16 = sshll.u32 %s1612_s11, 4  ;;  %s910_s16 = int_to_ptr.hbm [resolvable:$true] %s909_s16 }
   0x8   :  { %v951_v8 = vld [vmem:[%s1602_s1 + $0x10] sm:$0xff]  ;;  %v1044_v9 = vld [vmem:[%s1603_s2] ss:$0 sm:$0xff]  ;;  %v950_v16 = vld [vmem:[%s1601_s0 + $0x8] sm:$0xff]  ;;  %s907_s13 = sshll.u32 %s1174_s30, 4  ;;  %s1176_s17 = smov 8   ;;  %s908_s13 = int_to_ptr.vmem [resolvable:$true] %s907_s13 }
   0x9   :  { %108 = vmatpush.msra.mxu1 %v85_v4  ;;  %v945_v17 = vld [vmem:[%s1604_s3 + $0x38] sm:$0xff]  ;;  %v944_v18 = vld [vmem:[%s1604_s3 + $0x30] sm:$0xff]  ;;  %v943_v19 = vld [vmem:[%s1604_s3 + $0x28] sm:$0xff]  ;;  %s922_s20 = sshll.u32 %s1613_s12, 4  ;;  %s923_s20 = int_to_ptr.hbm [resolvable:$true] %s922_s20 }
   0xa   :  { %144 = vmatpush.msra.mxu2 %v945_v17  ;;  %v942_v20 = vld [vmem:[%s1604_s3 + $0x20] sm:$0xff]  ;;  %v959_v21 = vld [vmem:[%s1604_s3 + $0x58] sm:$0xff]  ;;  %v958_v22 = vld [vmem:[%s1604_s3 + $0x50] sm:$0xff] }
   0xb   :  { %109 = vmatpush.msra.mxu1 %v84_v5  ;;  %v957_v23 = vld [vmem:[%s1604_s3 + $0x48] sm:$0xff]  ;;  %v956_v24 = vld [vmem:[%s1604_s3 + $0x40] sm:$0xff]  ;;  %v980_v41 = vld [vmem:[%s1601_s0 + $0x10] sm:$0xff] }
   0xc   :  { %145 = vmatpush.msra.mxu2 %v944_v18  ;;  %v1045_v25 = vld [vmem:[%s1605_s4] ss:$0 sm:$0xff]  ;;  %v1046_v29 = vld [vmem:[%s1603_s2 + $0x1] ss:$0 sm:$0xff]  ;;  %v982_v36 = vld [vmem:[%s1602_s1 + $0x28] sm:$0x3] }
   0xd   :  { %110 = vmatpush.msra.mxu1 %v83_v6  ;;  %v981_v37 = vld [vmem:[%s1602_s1 + $0x20] sm:$0xff]  ;;  %v159_v42 = vld [vmem:[%s1606_s5 + $0x18] sm:$0xff]  ;;  %v158_v44 = vld [vmem:[%s1606_s5 + $0x10] sm:$0xff] }
   0xe   :  { %146 = vmatpush.msra.mxu2 %v943_v19  ;;  %v190_v43 = vld [vmem:[%s1608_s7 + $0x18] sm:$0xff]  ;;  %179 = vmatpush.msra.mxu3 %v159_v42  ;;  %v189_v45 = vld [vmem:[%s1608_s7 + $0x10] sm:$0xff]  ;;  %v157_v46 = vld [vmem:[%s1606_s5 + $0x8] sm:$0xff] }
   0xf   :  { %954 = vmatpush.msk.msrb.mxu1 %vm55_vm0, %v952_v7  ;;  %207 = vmatpush.msrb.mxu0 %v190_v43  ;;  %v188_v47 = vld [vmem:[%s1608_s7 + $0x8] sm:$0xff]  ;;  %v156_v48 = vld [vmem:[%s1606_s5] sm:$0xff]  ;;  %v965_v50 = vld [vmem:[%s1604_s3 + $0x78] sm:$0xff] }
  0x10   :  { %147 = vmatpush.msra.mxu2 %v942_v20  ;;  %180 = vmatpush.msra.mxu3 %v158_v44  ;;  %v187_v49 = vld [vmem:[%s1608_s7] sm:$0xff]  ;;  %v964_v51 = vld [vmem:[%s1604_s3 + $0x70] sm:$0xff]  ;;  %v963_v52 = vld [vmem:[%s1604_s3 + $0x68] sm:$0xff] }
  0x11   :  { %289 = vmatpush.msrb.mxu1 %v951_v8  ;;  %208 = vmatpush.msrb.mxu0 %v189_v45  ;;  %v962_v53 = vld [vmem:[%s1604_s3 + $0x60] sm:$0xff]  ;;  %v989_v2 = vld [vmem:[%s1604_s3 + $0x98] sm:$0xff]  ;;  %v988_v4 = vld [vmem:[%s1604_s3 + $0x90] sm:$0xff] }
  0x12   :  { %323 = vmatpush.msrb.mxu2 %v959_v21  ;;  %181 = vmatpush.msra.mxu3 %v157_v46  ;;  %v1047_v54 = vld [vmem:[%s1605_s4 + $0x1] ss:$0 sm:$0xff]  ;;  %v1048_v58 = vld [vmem:[%s1605_s4 + $0x2] ss:$0 sm:$0xff]  ;;  %v987_v6 = vld [vmem:[%s1604_s3 + $0x88] sm:$0xff] }
  0x13   :  { %209 = vmatpush.msrb.mxu0 %v188_v47  ;;  %v1049_v0 = vld [vmem:[%s1603_s2 + $0x2] ss:$0 sm:$0xff]  ;;  %v1010_v17 = vld [vmem:[%s1601_s0 + $0x18] sm:$0xff]  ;;  %v970_v20 = vld [vmem:[%s1606_s5 + $0x30] sm:$0xff] }
  0x14   :  { %324 = vmatpush.msrb.mxu2 %v958_v22  ;;  %182 = vmatpush.msra.mxu3 %v156_v48  ;;  %v971_v18 = vld [vmem:[%s1606_s5 + $0x38] sm:$0xff]  ;;  %v976_v21 = vld [vmem:[%s1608_s7 + $0x30] sm:$0xff]  ;;  %v969_v22 = vld [vmem:[%s1606_s5 + $0x28] sm:$0xff] }
  0x15   :  { %210 = vmatpush.msrb.mxu0 %v187_v49  ;;  %v977_v19 = vld [vmem:[%s1608_s7 + $0x38] sm:$0xff]  ;;  %v1055_v48 = vld [vmem:[%s1605_s4 + $0x4] ss:$0 sm:$0xff] }
  0x16   :  { %325 = vmatpush.msrb.mxu2 %v957_v23  ;;  %360 = vmatpush.msrb.mxu3 %v965_v50  ;;  %v975_v23 = vld [vmem:[%s1608_s7 + $0x28] sm:$0xff] }
  0x17   :  { %397 = vmatpush.msra.mxu0 %v971_v18 }
  0x18   :  { %326 = vmatpush.msrb.mxu2 %v956_v24  ;;  %361 = vmatpush.msrb.mxu3 %v964_v51  ;;  %v968_v24 = vld [vmem:[%s1606_s5 + $0x20] sm:$0xff] }
  0x19   :  { %398 = vmatpush.msra.mxu0 %v970_v20 }
  0x1a   :  { %362 = vmatpush.msrb.mxu3 %v963_v52 }
  0x1b   :  { %399 = vmatpush.msra.mxu0 %v969_v22 }
  0x1c   :  { %363 = vmatpush.msrb.mxu3 %v962_v53 }
  0x1d   :  { %400 = vmatpush.msra.mxu0 %v968_v24 }
  0x82   :  { %v76_v10 = vpop.f32.mrf.mxu0 }
  0x83   :  { %v77_v11 = vadd.f32 %v1044_v9, %v76_v10  ;;  %v986_v10 = vld [vmem:[%s1604_s3 + $0x80] sm:$0xff] }
  0x85   :  { %v79_v12 = vmul.f32 0.5, %v77_v11 }
  0x87   :  { %1066 = vtanh.f32 %v79_v12 }
  0x8d   :  { %v1067_v13 = vpop.eup %1066 }
  0x8e   :  { %v81_v14 = vadd.f32 1.0, %v1067_v13  ;;  %v1011_v13 = vld [vmem:[%s1602_s1 + $0x30] sm:$0xff] }
  0x90   :  { %v82_v15 = vmul.f32 %v81_v14, %v79_v12  ;;  %v1012_v12 = vld [vmem:[%s1602_s1 + $0x38] sm:$0x3] }
  0x92   :  { %941 = vmatmul.msk.f32.vlgmr.msra.gmra.mxu1 %vm91_vm2, %v82_v15 }
  0x93   :  { %427 = vmatpush.msra.mxu1 %v977_v19 }
  0x95   :  { %428 = vmatpush.msra.mxu1 %v976_v21 }
  0x97   :  { %429 = vmatpush.msra.mxu1 %v975_v23 }
  0x9a   :  { %955 = vmatmul.msk.f32.vlgmr.msrb.gmra.mxu1 %vm51_vm1, %v950_v16 }
 0x10f   :  { %v112_v26 = vpop.f32.mrf.mxu1 }
 0x110   :  { %v113_v27 = vadd.f32 %v1045_v25, %v112_v26  ;;  %v974_v25 = vld [vmem:[%s1608_s7 + $0x20] sm:$0xff] }
 0x111   :  { %v1050_v26 = vld [vmem:[%s1609_s8] ss:$0 sm:$0xff]  ;;  %430 = vmatpush.msra.mxu1 %v974_v25 }
 0x112   :  { %v115_v28 = vmul.f32 0.5, %v113_v27  ;;  %v995_v27 = vld [vmem:[%s1604_s3 + $0xb8] sm:$0xff] }
 0x114   :  { %1068 = vtanh.f32 %v115_v28 }
 0x117   :  { %v291_v30 = vpop.f32.mrf.mxu1 }
 0x118   :  { %v292_v31 = vadd.f32 %v1046_v29, %v291_v30  ;;  %v994_v30 = vld [vmem:[%s1604_s3 + $0xb0] sm:$0xff] }
 0x11a   :  { %v1069_v32 = vpop.eup %1068  ;;  %v294_v33 = vmul.f32 0.5, %v292_v31 }
 0x11b   :  { %v117_v34 = vadd.f32 1.0, %v1069_v32  ;;  %v993_v32 = vld [vmem:[%s1604_s3 + $0xa8] sm:$0xff] }
 0x11c   :  { %1070 = vtanh.f32 %v294_v33 }
 0x11d   :  { %v118_v35 = vmul.f32 %v117_v34, %v115_v28  ;;  %v1429_v28 = vld [vmem:[%s1611_s10] ss:$0 sm:$0xff] }
 0x11e   :  { %v1053_v34 = vld [vmem:[%s1607_s6] ss:$0 sm:$0xff] }
 0x11f   :  { %947 = vmatmul.msk.f32.vlgmr.msra.gmra.mxu2 %vm91_vm2, %v118_v35  ;;  %v992_v35 = vld [vmem:[%s1604_s3 + $0xa0] sm:$0xff] }
 0x120   :  { %984 = vmatpush.msk.msra.mxu2 %vm55_vm0, %v982_v36 }
 0x122   :  { %v1071_v38 = vpop.eup %1070  ;;  %504 = vmatpush.msra.mxu2 %v981_v37 }
 0x123   :  { %v296_v39 = vadd.f32 1.0, %v1071_v38 }
 0x125   :  { %v297_v40 = vmul.f32 %v296_v39, %v294_v33 }
 0x127   :  { %961 = vmatmul.msk.f32.vlgmr.msrb.gmra.mxu2 %vm91_vm2, %v297_v40 }
 0x12f   :  { %985 = vmatmul.msk.f32.vlgmr.msra.gmra.mxu2 %vm51_vm1, %v980_v41  ;;  %v1054_v41 = vld [vmem:[%s1605_s4 + $0x3] ss:$0 sm:$0xff] }
 0x1a2   :  { %v149_v55 = vpop.f32.mrf.mxu2 }
 0x1a3   :  { %v150_v56 = vadd.f32 %v1047_v54, %v149_v55 }
 0x1a5   :  { %v152_v57 = vmul.f32 0.5, %v150_v56 }
 0x1a7   :  { %1072 = vtanh.f32 %v152_v57 }
 0x1aa   :  { %v328_v59 = vpop.f32.mrf.mxu2 }
 0x1ab   :  { %v329_v60 = vadd.f32 %v1048_v58, %v328_v59  ;;  %v1056_v59 = vld [vmem:[%s1603_s2 + $0x3] ss:$0 sm:$0xff] }
 0x1ad   :  { %v1073_v61 = vpop.eup %1072  ;;  %v331_v62 = vmul.f32 0.5, %v329_v60 }
 0x1ae   :  { %v154_v63 = vadd.f32 1.0, %v1073_v61 }
 0x1af   :  { %1074 = vtanh.f32 %v331_v62 }
 0x1b0   :  { %v155_v1 = vmul.f32 %v154_v63, %v152_v57 }
 0x1b2   :  { %948 = vmatmul.msk.f32.vlgmr.msra.gmra.mxu3 %vm91_vm2, %v155_v1  ;;  %949 = vmatmul.msk.f32.vlgmr.msrb.gmra.mxu0 %vm91_vm2, %v155_v1  ;;  %v506_v3 = vpop.f32.mrf.mxu2  ;;  %v1460_v1 = vld [vmem:[%s1610_s9] ss:$0 sm:$0xff] }
 0x1b3   :  { %v507_v5 = vadd.f32 %v1049_v0, %v506_v3  ;;  %538 = vmatpush.msra.mxu3 %v989_v2  ;;  %575 = vmatpush.msrb.mxu0 %v995_v27  ;;  %v1018_v3 = vld [vmem:[%s1604_s3 + $0xd0] sm:$0xff] }
 0x1b5   :  { %v1075_v7 = vpop.eup %1074  ;;  %v509_v8 = vmul.f32 0.5, %v507_v5  ;;  %539 = vmatpush.msra.mxu3 %v988_v4  ;;  %576 = vmatpush.msrb.mxu0 %v994_v30 }
 0x1b6   :  { %v333_v9 = vadd.f32 1.0, %v1075_v7 }
 0x1b7   :  { %1076 = vtanh.f32 %v509_v8  ;;  %540 = vmatpush.msra.mxu3 %v987_v6  ;;  %577 = vmatpush.msrb.mxu0 %v993_v32  ;;  %v1017_v6 = vld [vmem:[%s1604_s3 + $0xc8] sm:$0xff]  ;;  %v1001_v32 = vld [vmem:[%s1606_s5 + $0x58] sm:$0xff] }
 0x1b8   :  { %v334_v11 = vmul.f32 %v333_v9, %v331_v62  ;;  %v1019_v62 = vld [vmem:[%s1604_s3 + $0xd8] sm:$0xff]  ;;  %612 = vmatpush.msrb.mxu1 %v1001_v32 }
 0x1b9   :  { %541 = vmatpush.msra.mxu3 %v986_v10  ;;  %578 = vmatpush.msrb.mxu0 %v992_v35  ;;  %v1006_v35 = vld [vmem:[%s1608_s7 + $0x50] sm:$0xff] }
 0x1ba   :  { %967 = vmatmul.msk.f32.vlgmr.msrb.gmra.mxu3 %vm91_vm2, %v334_v11  ;;  %v1016_v11 = vld [vmem:[%s1604_s3 + $0xc0] sm:$0xff] }
 0x1bb   :  { %1014 = vmatpush.msk.msrb.mxu3 %vm55_vm0, %v1012_v12 }
 0x1bd   :  { %v1077_v14 = vpop.eup %1076  ;;  %719 = vmatpush.msrb.mxu3 %v1011_v13 }
 0x1be   :  { %v511_v15 = vadd.f32 1.0, %v1077_v14 }
 0x1c0   :  { %v512_v16 = vmul.f32 %v511_v15, %v509_v8 }
 0x1c2   :  { %991 = vmatmul.msk.f32.vlgmr.msra.gmra.mxu3 %vm91_vm2, %v512_v16 }
 0x1ca   :  { %1015 = vmatmul.msk.f32.vlgmr.msrb.gmra.mxu3 %vm51_vm1, %v1010_v17 }
 0x22f   :  { %v212_v29 = vpop.f32.mrf.mxu0 }
 0x230   :  { %v213_v31 = vadd.f32 %v1050_v26, %v212_v29 }
 0x232   :  { %v218_v33 = vsub.f32 %v1429_v28, %v213_v31 }
 0x234   :  { %v220_v36 = vand.u32 2147483647, %v218_v33  ;;  %v219_v60 = vmax.f32 %v218_v33, 0.0  ;;  %v1007_v33 = vld [vmem:[%s1608_s7 + $0x58] sm:$0xff] }
 0x235   :  { %v184_v37 = vpop.f32.mrf.mxu3  ;;  %642 = vmatpush.msrb.mxu2 %v1007_v33 }
 0x236   :  { %v221_v38 = vsub.f32 0.0, %v220_v36  ;;  %v185_v39 = vadd.f32 %v1053_v34, %v184_v37  ;;  %v1000_v34 = vld [vmem:[%s1606_s5 + $0x50] sm:$0xff]  ;;  %v999_v36 = vld [vmem:[%s1606_s5 + $0x48] sm:$0xff] }
 0x237   :  { %613 = vmatpush.msrb.mxu1 %v1000_v34  ;;  %643 = vmatpush.msrb.mxu2 %v1006_v35  ;;  %v1005_v37 = vld [vmem:[%s1608_s7 + $0x48] sm:$0xff]  ;;  %v1037_v34 = vld [vmem:[%s1608_s7 + $0x78] sm:$0xff] }
 0x238   :  { %v222_v40 = vmul.f32 1.442695, %v221_v38  ;;  %256 = vst.msk [vmem:[#allocation2] sm:$0xff] %vm255_vm3, %v185_v39  ;;  %v998_v38 = vld [vmem:[%s1606_s5 + $0x40] sm:$0xff]  ;;  %v1031_v35 = vld [vmem:[%s1606_s5 + $0x78] sm:$0xff]  ;;  %857 = vmatpush.msra.mxu3 %v1037_v34 }
 0x239   :  { %614 = vmatpush.msrb.mxu1 %v999_v36  ;;  %644 = vmatpush.msrb.mxu2 %v1005_v37  ;;  %v1004_v39 = vld [vmem:[%s1608_s7 + $0x40] sm:$0xff]  ;;  %v1036_v36 = vld [vmem:[%s1608_s7 + $0x70] sm:$0xff] }
 0x23a   :  { %1078 = vpow2.f32 %v222_v40  ;;  %v1025_v40 = vld [vmem:[%s1604_s3 + $0xf8] sm:$0xff]  ;;  %v1030_v37 = vld [vmem:[%s1606_s5 + $0x70] sm:$0xff]  ;;  %858 = vmatpush.msra.mxu3 %v1036_v36 }
 0x23b   :  { %615 = vmatpush.msrb.mxu1 %v998_v38  ;;  %645 = vmatpush.msrb.mxu2 %v1004_v39  ;;  %v1035_v38 = vld [vmem:[%s1608_s7 + $0x68] sm:$0xff] }
 0x23c   :  { %v1029_v39 = vld [vmem:[%s1606_s5 + $0x68] sm:$0xff]  ;;  %859 = vmatpush.msra.mxu3 %v1035_v38 }
 0x23d   :  { %v365_v42 = vpop.f32.mrf.mxu3  ;;  %827 = vmatpush.msra.mxu2 %v1031_v35 }
 0x23e   :  { %v366_v43 = vadd.f32 %v1054_v41, %v365_v42  ;;  %v1024_v41 = vld [vmem:[%s1604_s3 + $0xf0] sm:$0xff]  ;;  %v1023_v42 = vld [vmem:[%s1604_s3 + $0xe8] sm:$0xff] }
 0x23f   :  { %828 = vmatpush.msra.mxu2 %v1030_v37 }
 0x240   :  { %v1079_v44 = vpop.eup %1078  ;;  %v368_v45 = vmul.f32 0.5, %v366_v43  ;;  %v1057_v43 = vld [vmem:[%s1607_s6 + $0x1] ss:$0 sm:$0xff] }
 0x241   :  { %v224_v46 = vadd.f32 1.0, %v1079_v44  ;;  %v227_v47 = vmul.f32 -0.5, %v1079_v44  ;;  %v230_v52 = vand.u32 2147483647, %v1079_v44  ;;  %829 = vmatpush.msra.mxu2 %v1029_v39 }
 0x242   :  { %1080 = vtanh.f32 %v368_v45 }
 0x243   :  { %1082 = vlog2.f32 %v224_v46  ;;  %v228_v50 = vadd.f32 1.0, %v227_v47  ;;  %vm231_vm4 = vcmp.lt.f32.partialorder %v230_v52, 0.0004427343  ;;  %v1059_v52 = vld [vmem:[%s1605_s4 + $0x5] ss:$0 sm:$0xff] }
 0x245   :  { %v543_v49 = vpop.f32.mrf.mxu3  ;;  %v229_v58 = vmul.f32 %v1079_v44, %v228_v50  ;;  %v1058_v44 = vld [vmem:[%s1609_s8 + $0x1] ss:$0 sm:$0xff] }
 0x246   :  { %v544_v51 = vadd.f32 %v1055_v48, %v543_v49 }
 0x248   :  { %v1081_v53 = vpop.eup %1080  ;;  %v546_v54 = vmul.f32 0.5, %v544_v51 }
 0x249   :  { %v1083_v55 = vpop.eup %1082  ;;  %v370_v56 = vadd.f32 1.0, %v1081_v53 }
 0x24a   :  { %v226_v57 = vmul.f32 0.6931472, %v1083_v55  ;;  %1084 = vtanh.f32 %v546_v54 }
 0x24b   :  { %v371_v61 = vmul.f32 %v370_v56, %v368_v45  ;;  %v1022_v45 = vld [vmem:[%s1604_s3 + $0xe0] sm:$0xff] }
 0x24c   :  { %v232_v63 = vsel %vm231_vm4, %v229_v58, %v226_v57  ;;  %v1060_v58 = vld [vmem:[%s1605_s4 + $0x6] ss:$0 sm:$0xff] }
 0x24d   :  { %v233_v0 = vadd.f32 %v232_v63, %v219_v60  ;;  %973 = vmatmul.msk.f32.vlgmr.msra.gmra.mxu0 %vm91_vm2, %v371_v61  ;;  %979 = vmatmul.msk.f32.vlgmr.msra.gmra.mxu1 %vm91_vm2, %v371_v61  ;;  %v721_v2 = vpop.f32.mrf.mxu3 }
 0x24e   :  { %v722_v4 = vadd.f32 %v1056_v59, %v721_v2  ;;  %753 = vmatpush.msra.mxu0 %v1019_v62  ;;  %790 = vmatpush.msra.mxu1 %v1025_v40  ;;  %v1034_v40 = vld [vmem:[%s1608_s7 + $0x60] sm:$0xff] }
 0x24f   :  { %v234_v5 = vsub.f32 %v1429_v28, %v233_v0  ;;  %860 = vmatpush.msra.mxu3 %v1034_v40 }
 0x250   :  { %v1085_v7 = vpop.eup %1084  ;;  %v724_v8 = vmul.f32 0.5, %v722_v4  ;;  %754 = vmatpush.msra.mxu0 %v1018_v3  ;;  %791 = vmatpush.msra.mxu1 %v1024_v41  ;;  %v1028_v41 = vld [vmem:[%s1606_s5 + $0x60] sm:$0xff] }
 0x251   :  { %v238_v9 = vsub.f32 %v234_v5, %v1460_v1  ;;  %v548_v10 = vadd.f32 1.0, %v1085_v7  ;;  %830 = vmatpush.msra.mxu2 %v1028_v41 }
 0x252   :  { %1086 = vtanh.f32 %v724_v8  ;;  %755 = vmatpush.msra.mxu0 %v1017_v6  ;;  %792 = vmatpush.msra.mxu1 %v1023_v42  ;;  %v1061_v42 = vld [vmem:[%s1607_s6 + $0x2] ss:$0 sm:$0xff] }
 0x253   :  { %v240_v12 = vand.u32 2147483647, %v238_v9  ;;  %v549_v13 = vmul.f32 %v548_v10, %v546_v54  ;;  %v239_v27 = vmax.f32 %v238_v9, 0.0 }
 0x254   :  { %756 = vmatpush.msra.mxu0 %v1016_v11  ;;  %793 = vmatpush.msra.mxu1 %v1022_v45  ;;  %v1062_v45 = vld [vmem:[%s1609_s8 + $0x2] ss:$0 sm:$0xff] }
 0x255   :  { %v241_v14 = vsub.f32 0.0, %v240_v12  ;;  %997 = vmatmul.msk.f32.vlgmr.msrb.gmra.mxu0 %vm91_vm2, %v549_v13 }
 0x257   :  { %v242_v15 = vmul.f32 1.442695, %v241_v14 }
 0x258   :  { %v1087_v16 = vpop.eup %1086 }
 0x259   :  { %1088 = vpow2.f32 %v242_v15  ;;  %v726_v17 = vadd.f32 1.0, %v1087_v16 }
 0x25b   :  { %v727_v18 = vmul.f32 %v726_v17, %v724_v8 }
 0x25d   :  { %1021 = vmatmul.msk.f32.vlgmr.msra.gmra.mxu0 %vm91_vm2, %v727_v18 }
 0x25f   :  { %v1089_v19 = vpop.eup %1088 }
 0x260   :  { %v244_v20 = vadd.f32 1.0, %v1089_v19  ;;  %v247_v21 = vmul.f32 -0.5, %v1089_v19  ;;  %v250_v23 = vand.u32 2147483647, %v1089_v19 }
 0x262   :  { %1090 = vlog2.f32 %v244_v20  ;;  %v248_v22 = vadd.f32 1.0, %v247_v21  ;;  %vm251_vm5 = vcmp.lt.f32.partialorder %v250_v23, 0.0004427343 }
 0x264   :  { %v249_v26 = vmul.f32 %v1089_v19, %v248_v22 }
 0x268   :  { %v1091_v24 = vpop.eup %1090 }
 0x269   :  { %v246_v25 = vmul.f32 0.6931472, %v1091_v24 }
 0x26b   :  { %v252_v29 = vsel %vm251_vm5, %v249_v26, %v246_v25 }
 0x26c   :  { %v253_v30 = vadd.f32 %v252_v29, %v239_v27 }
 0x26e   :  { %v254_v31 = vadd.f32 %v1460_v1, %v253_v30 }
 0x270   :  { %257 = vst.msk [vmem:[#allocation4] sm:$0xff] %vm255_vm3, %v254_v31 }
 0x2ca   :  { %v402_v46 = vpop.f32.mrf.mxu0  ;;  %v432_v47 = vpop.f32.mrf.mxu1 }
 0x2cb   :  { %v403_v48 = vadd.f32 %v1057_v43, %v402_v46  ;;  %v433_v49 = vadd.f32 %v1058_v44, %v432_v47  ;;  %v1063_v46 = vld [vmem:[%s1605_s4 + $0x7] ss:$0 sm:$0xff] }
 0x2cd   :  { %470 = vst.msk [vmem:[#allocation2 + $0x8] sm:$0xff] %vm255_vm3, %v403_v48  ;;  %v435_v50 = vsub.f32 %v1429_v28, %v433_v49 }
 0x2cf   :  { %v437_v51 = vand.u32 2147483647, %v435_v50  ;;  %v436_v11 = vmax.f32 %v435_v50, 0.0 }
 0x2d1   :  { %v438_v53 = vsub.f32 0.0, %v437_v51 }
 0x2d2   :  { %v580_v54 = vpop.f32.mrf.mxu0 }
 0x2d3   :  { %v439_v55 = vmul.f32 1.442695, %v438_v53  ;;  %v581_v56 = vadd.f32 %v1059_v52, %v580_v54 }
 0x2d5   :  { %1092 = vpow2.f32 %v439_v55  ;;  %v583_v57 = vmul.f32 0.5, %v581_v56 }
 0x2d7   :  { %1094 = vtanh.f32 %v583_v57 }
 0x2da   :  { %v758_v59 = vpop.f32.mrf.mxu0 }
 0x2db   :  { %v1093_v60 = vpop.eup %1092  ;;  %v759_v61 = vadd.f32 %v1060_v58, %v758_v59 }
 0x2dc   :  { %v441_v62 = vadd.f32 1.0, %v1093_v60  ;;  %v444_v0 = vmul.f32 -0.5, %v1093_v60  ;;  %v447_v6 = vand.u32 2147483647, %v1093_v60 }
 0x2dd   :  { %v1095_v63 = vpop.eup %1094  ;;  %v761_v2 = vmul.f32 0.5, %v759_v61 }
 0x2de   :  { %1096 = vlog2.f32 %v441_v62  ;;  %v585_v3 = vadd.f32 1.0, %v1095_v63  ;;  %v445_v5 = vadd.f32 1.0, %v444_v0  ;;  %vm448_vm6 = vcmp.lt.f32.partialorder %v447_v6, 0.0004427343 }
 0x2df   :  { %1098 = vtanh.f32 %v761_v2 }
 0x2e0   :  { %v586_v4 = vmul.f32 %v585_v3, %v583_v57  ;;  %v446_v10 = vmul.f32 %v1093_v60, %v445_v5 }
 0x2e2   :  { %1003 = vmatmul.msk.f32.vlgmr.msrb.gmra.mxu1 %vm91_vm2, %v586_v4  ;;  %1009 = vmatmul.msk.f32.vlgmr.msrb.gmra.mxu2 %vm91_vm2, %v586_v4 }
 0x2e4   :  { %v1097_v7 = vpop.eup %1096 }
 0x2e5   :  { %v1099_v8 = vpop.eup %1098  ;;  %v443_v9 = vmul.f32 0.6931472, %v1097_v7 }
 0x2e6   :  { %v763_v12 = vadd.f32 1.0, %v1099_v8 }
 0x2e7   :  { %v449_v13 = vsel %vm448_vm6, %v446_v10, %v443_v9 }
 0x2e8   :  { %v450_v14 = vadd.f32 %v449_v13, %v436_v11  ;;  %v764_v15 = vmul.f32 %v763_v12, %v761_v2 }
 0x2ea   :  { %v451_v16 = vsub.f32 %v1429_v28, %v450_v14  ;;  %1027 = vmatmul.msk.f32.vlgmr.msra.gmra.mxu1 %vm91_vm2, %v764_v15 }
 0x2ec   :  { %v452_v17 = vsub.f32 %v451_v16, %v1460_v1 }
 0x2ee   :  { %v454_v18 = vand.u32 2147483647, %v452_v17  ;;  %v453_v30 = vmax.f32 %v452_v17, 0.0 }
 0x2f0   :  { %v455_v19 = vsub.f32 0.0, %v454_v18 }
 0x2f2   :  { %v456_v20 = vmul.f32 1.442695, %v455_v19 }
 0x2f4   :  { %1100 = vpow2.f32 %v456_v20 }
 0x2fa   :  { %v1101_v21 = vpop.eup %1100 }
 0x2fb   :  { %v458_v22 = vadd.f32 1.0, %v1101_v21  ;;  %v461_v23 = vmul.f32 -0.5, %v1101_v21  ;;  %v464_v25 = vand.u32 2147483647, %v1101_v21 }
 0x2fd   :  { %1102 = vlog2.f32 %v458_v22  ;;  %v462_v24 = vadd.f32 1.0, %v461_v23  ;;  %vm465_vm7 = vcmp.lt.f32.partialorder %v464_v25, 0.0004427343  ;;  %v1065_v25 = vld [vmem:[%s1609_s8 + $0x3] ss:$0 sm:$0xff]  ;;  %s1177_s8 = smov [#allocation4]  }
 0x2fe   :  { %s920_s11 = sshll.u32 %s1177_s8, 4  ;;  %s921_s11 = int_to_ptr.vmem [resolvable:$true] %s920_s11 }
 0x2ff   :  { %v463_v29 = vmul.f32 %v1101_v21, %v462_v24  ;;  %v1064_v24 = vld [vmem:[%s1607_s6 + $0x3] ss:$0 sm:$0xff]  ;;  %s1175_s6 = smov 128  }
 0x303   :  { %v1103_v26 = vpop.eup %1102 }
 0x304   :  { %v460_v27 = vmul.f32 0.6931472, %v1103_v26 }
 0x306   :  { %v466_v31 = vsel %vm465_vm7, %v463_v29, %v460_v27 }
 0x307   :  { %v467_v32 = vadd.f32 %v466_v31, %v453_v30 }
 0x309   :  { %v468_v33 = vadd.f32 %v1460_v1, %v467_v32 }
 0x30b   :  { %472 = vst.msk [vmem:[#allocation4 + $0x8] sm:$0xff] %vm255_vm3, %v468_v33 }
 0x35f   :  { %v617_v43 = vpop.f32.mrf.mxu1 }
 0x360   :  { %v618_v44 = vadd.f32 %v1061_v42, %v617_v43 }
 0x362   :  { %685 = vst.msk [vmem:[#allocation2 + $0x10] sm:$0xff] %vm255_vm3, %v618_v44 }
 0x365   :  { %v647_v47 = vpop.f32.mrf.mxu2 }
 0x366   :  { %v648_v48 = vadd.f32 %v1062_v45, %v647_v47 }
 0x367   :  { %v795_v49 = vpop.f32.mrf.mxu1 }
 0x368   :  { %v650_v50 = vsub.f32 %v1429_v28, %v648_v48  ;;  %v796_v51 = vadd.f32 %v1063_v46, %v795_v49 }
 0x36a   :  { %v652_v52 = vand.u32 2147483647, %v650_v50  ;;  %v798_v53 = vmul.f32 0.5, %v796_v51  ;;  %v651_v4 = vmax.f32 %v650_v50, 0.0 }
 0x36c   :  { %v653_v54 = vsub.f32 0.0, %v652_v52  ;;  %1104 = vtanh.f32 %v798_v53 }
 0x36e   :  { %v654_v55 = vmul.f32 1.442695, %v653_v54 }
 0x370   :  { %1106 = vpow2.f32 %v654_v55 }
 0x372   :  { %v1105_v56 = vpop.eup %1104 }
 0x373   :  { %v800_v57 = vadd.f32 1.0, %v1105_v56 }
 0x375   :  { %v801_v58 = vmul.f32 %v800_v57, %v798_v53 }
 0x376   :  { %v1107_v59 = vpop.eup %1106 }
 0x377   :  { %v656_v60 = vadd.f32 1.0, %v1107_v59  ;;  %1033 = vmatmul.msk.f32.vlgmr.msra.gmra.mxu2 %vm91_vm2, %v801_v58  ;;  %1039 = vmatmul.msk.f32.vlgmr.msra.gmra.mxu3 %vm91_vm2, %v801_v58  ;;  %v659_v61 = vmul.f32 -0.5, %v1107_v59  ;;  %v662_v63 = vand.u32 2147483647, %v1107_v59 }
 0x379   :  { %1108 = vlog2.f32 %v656_v60  ;;  %v660_v62 = vadd.f32 1.0, %v659_v61  ;;  %vm663_vm8 = vcmp.lt.f32.partialorder %v662_v63, 0.0004427343 }
 0x37b   :  { %v661_v3 = vmul.f32 %v1107_v59, %v660_v62 }
 0x37f   :  { %v1109_v0 = vpop.eup %1108 }
 0x380   :  { %v658_v2 = vmul.f32 0.6931472, %v1109_v0 }
 0x382   :  { %v664_v5 = vsel %vm663_vm8, %v661_v3, %v658_v2 }
 0x383   :  { %v665_v6 = vadd.f32 %v664_v5, %v651_v4 }
 0x385   :  { %v666_v7 = vsub.f32 %v1429_v28, %v665_v6 }
 0x387   :  { %v667_v8 = vsub.f32 %v666_v7, %v1460_v1 }
 0x389   :  { %v669_v9 = vand.u32 2147483647, %v667_v8  ;;  %v668_v20 = vmax.f32 %v667_v8, 0.0 }
 0x38b   :  { %v670_v10 = vsub.f32 0.0, %v669_v9 }
 0x38d   :  { %v671_v11 = vmul.f32 1.442695, %v670_v10 }
 0x38f   :  { %1110 = vpow2.f32 %v671_v11 }
 0x395   :  { %v1111_v12 = vpop.eup %1110 }
 0x396   :  { %v673_v13 = vadd.f32 1.0, %v1111_v12  ;;  %v676_v14 = vmul.f32 -0.5, %v1111_v12  ;;  %v679_v16 = vand.u32 2147483647, %v1111_v12 }
 0x398   :  { %1112 = vlog2.f32 %v673_v13  ;;  %v677_v15 = vadd.f32 1.0, %v676_v14  ;;  %vm680_vm9 = vcmp.lt.f32.partialorder %v679_v16, 0.0004427343 }
 0x39a   :  { %v678_v19 = vmul.f32 %v1111_v12, %v677_v15 }
 0x39e   :  { %v1113_v17 = vpop.eup %1112 }
 0x39f   :  { %v675_v18 = vmul.f32 0.6931472, %v1113_v17 }
 0x3a1   :  { %v681_v21 = vsel %vm680_vm9, %v678_v19, %v675_v18 }
 0x3a2   :  { %v682_v22 = vadd.f32 %v681_v21, %v668_v20 }
 0x3a4   :  { %v683_v23 = vadd.f32 %v1460_v1, %v682_v22 }
 0x3a6   :  { %687 = vst.msk [vmem:[#allocation4 + $0x10] sm:$0xff] %vm255_vm3, %v683_v23 }
 0x3fa   :  { %v832_v26 = vpop.f32.mrf.mxu2  ;;  %v862_v27 = vpop.f32.mrf.mxu3 }
 0x3fb   :  { %v833_v29 = vadd.f32 %v1064_v24, %v832_v26  ;;  %v863_v30 = vadd.f32 %v1065_v25, %v862_v27 }
 0x3fd   :  { %900 = vst.msk [vmem:[#allocation2 + $0x18] sm:$0xff] %vm255_vm3, %v833_v29  ;;  %v865_v31 = vsub.f32 %v1429_v28, %v863_v30 }
 0x3fe   :  { %915 = dma.vmem_to_hbm [thread:$0]  %s908_s13, 512, %s910_s16, [#allocation3], %s1175_s6, %s1175_s6, %s1176_s17  }
 0x3ff   :  { %v867_v32 = vand.u32 2147483647, %v865_v31  ;;  %v866_v43 = vmax.f32 %v865_v31, 0.0 }
 0x401   :  { %v868_v33 = vsub.f32 0.0, %v867_v32 }
 0x403   :  { %v869_v34 = vmul.f32 1.442695, %v868_v33 }
 0x405   :  { %1114 = vpow2.f32 %v869_v34 }
 0x40b   :  { %v1115_v35 = vpop.eup %1114 }
 0x40c   :  { %v871_v36 = vadd.f32 1.0, %v1115_v35  ;;  %v874_v37 = vmul.f32 -0.5, %v1115_v35  ;;  %v877_v39 = vand.u32 2147483647, %v1115_v35 }
 0x40e   :  { %1116 = vlog2.f32 %v871_v36  ;;  %v875_v38 = vadd.f32 1.0, %v874_v37  ;;  %vm878_vm10 = vcmp.lt.f32.partialorder %v877_v39, 0.0004427343 }
 0x410   :  { %v876_v42 = vmul.f32 %v1115_v35, %v875_v38 }
 0x414   :  { %v1117_v40 = vpop.eup %1116 }
 0x415   :  { %v873_v41 = vmul.f32 0.6931472, %v1117_v40 }
 0x417   :  { %v879_v44 = vsel %vm878_vm10, %v876_v42, %v873_v41 }
 0x418   :  { %v880_v45 = vadd.f32 %v879_v44, %v866_v43 }
 0x41a   :  { %v881_v46 = vsub.f32 %v1429_v28, %v880_v45 }
 0x41c   :  { %v882_v47 = vsub.f32 %v881_v46, %v1460_v1 }
 0x41e   :  { %v884_v48 = vand.u32 2147483647, %v882_v47  ;;  %v883_v59 = vmax.f32 %v882_v47, 0.0 }
 0x420   :  { %v885_v49 = vsub.f32 0.0, %v884_v48 }
 0x422   :  { %v886_v50 = vmul.f32 1.442695, %v885_v49 }
 0x424   :  { %1118 = vpow2.f32 %v886_v50 }
 0x42a   :  { %v1119_v51 = vpop.eup %1118 }
 0x42b   :  { %v888_v52 = vadd.f32 1.0, %v1119_v51  ;;  %v891_v53 = vmul.f32 -0.5, %v1119_v51  ;;  %v894_v55 = vand.u32 2147483647, %v1119_v51 }
 0x42d   :  { %1120 = vlog2.f32 %v888_v52  ;;  %v892_v54 = vadd.f32 1.0, %v891_v53  ;;  %vm895_vm11 = vcmp.lt.f32.partialorder %v894_v55, 0.0004427343 }
 0x42f   :  { %v893_v58 = vmul.f32 %v1119_v51, %v892_v54 }
 0x433   :  { %v1121_v56 = vpop.eup %1120 }
 0x434   :  { %v890_v57 = vmul.f32 0.6931472, %v1121_v56 }
 0x436   :  { %v896_v60 = vsel %vm895_vm11, %v893_v58, %v890_v57 }
 0x437   :  { %v897_v28 = vadd.f32 %v896_v60, %v883_v59 }
 0x439   :  { %v898_v61 = vadd.f32 %v1460_v1, %v897_v28 }
 0x43b   :  { %902 = vst.msk [vmem:[#allocation4 + $0x18] sm:$0xff] %vm255_vm3, %v898_v61 }
 0x43c   :  { %928 = dma.vmem_to_hbm [thread:$0]  %s921_s11, 512, %s923_s20, [#allocation5], %s1175_s6, %s1175_s6, %s1176_s17  }
 0x43d   :  { %1170 = dma.done.wait [#allocation3], 512  }
 0x43e   :  { %1171 = vsyncadd [#allocation3], 4294966784 }
 0x43f   :  { %1172 = dma.done.wait [#allocation5], 512  }
 0x440   :  { %1173 = vsyncadd [#allocation5], 4294966784 }
 0x441   :  { %937 = vsyncpa [#allocation3], 1 }
 0x442   :  { %938 = vsyncpa [#allocation5], 1 }

</bundles_post_ra>
